<compile_context>
chip_gen: v7x
topology: tpu7x:2x2x1
jax: 0.10.0
libtpu: 0.0.40
codegen_flags: <defaults>
</compile_context>

<pallas_src>
import math

import jax
import jax.numpy as jnp
from jax.experimental import pallas as pl
from jax.experimental.pallas import tpu as pltpu  # noqa: F401  (TPU backend module)

# ----------------------------- hyperparameters -----------------------------
B = 2           # batch
IN_CH = 1       # conv in_channel
H_SIG = 8       # "n_lead" (height)
W_SIG = 16      # "x_dim"  (width -> transformer sequence length)
OUT_CH = 32     # conv out_channel == transformer input_dim == embed_dim
EMBED = OUT_CH
NUM_LAYERS = 2
FF = 64         # dim_feedforward
HEADS = 4
HEAD_DIM = EMBED // HEADS
DROPOUT = 0.0   # -> identity
OUT_DIM = 16
N_DEMO = 2      # nonzero -> no demographic concatenation branch (matches module logic)
OUT_SIZE = 5
BN_EPS = 1e-5
LN_EPS = 1e-5

SEQ = W_SIG               # transformer sequence length
BS = B * SEQ              # batch folded into matmul M dimension


# ------------------------------ fused Pallas kernel ------------------------------
def _fused_forward_kernel(
    patches_ref, conv_w_ref, conv_scale_ref, conv_shift_ref,
    qkv_w_ref, qkv_b_ref, o_w_ref, o_b_ref,
    ff1_w_ref, ff1_b_ref, ff2_w_ref, ff2_b_ref,
    ln1_g_ref, ln1_b_ref, ln2_g_ref, ln2_b_ref,
    fc_w_ref, fc_b_ref, clf_w_ref, clf_b_ref,
    out_ref,
):
    f32 = jnp.float32

    def layernorm(x, g, b):
        mu = jnp.mean(x, axis=-1, keepdims=True)
        var = jnp.mean(jnp.square(x - mu), axis=-1, keepdims=True)
        return (x - mu) * jax.lax.rsqrt(var + LN_EPS) * g + b

    # ---- CNN feature extractor: conv3x3 (im2col matmul) + folded BN(eval) + ReLU ----
    p = patches_ref[...].reshape(B * H_SIG * W_SIG, 9 * IN_CH)            # (256, 9)
    y = jnp.dot(p, conv_w_ref[...], preferred_element_type=f32)          # (256, C_out)
    y = y * conv_scale_ref[...] + conv_shift_ref[...]
    y = jnp.maximum(y, 0.0)

    # ---- torch.mean(h, dim=-2).permute(0,2,1): mean over H -> (B, S=W, D=C_out) ----
    feat = y.reshape(B, H_SIG, W_SIG, EMBED)
    h = jnp.mean(feat, axis=1)                                            # (B, S, D)
    hb = h.reshape(BS, EMBED)                                             # (32, 32)

    scale = 1.0 / math.sqrt(HEAD_DIM)

    # ---- Transformer encoder (post-LN blocks), fully in-kernel ----
    for l in range(NUM_LAYERS):
        # QKV projection with batch folded into M
        qkv = jnp.dot(hb, qkv_w_ref[l], preferred_element_type=f32) + qkv_b_ref[l]  # (32, 96)
        qkv3 = qkv.reshape(B, SEQ, 3 * EMBED)                                        # (2, 16, 96)
        o_w_l = o_w_ref[l]                                                           # (32, 32)

        # per-head attention; head outputs feed the output projection directly
        attn = jnp.zeros((BS, EMBED), f32)
        for hd in range(HEADS):
            q_h = qkv3[:, :, hd * HEAD_DIM:(hd + 1) * HEAD_DIM]                       # (B, S, Dh)
            k_h = qkv3[:, :, EMBED + hd * HEAD_DIM:EMBED + (hd + 1) * HEAD_DIM]
            v_h = qkv3[:, :, 2 * EMBED + hd * HEAD_DIM:2 * EMBED + (hd + 1) * HEAD_DIM]

            s = jnp.einsum("bqd,bkd->bqk", q_h, k_h,
                           preferred_element_type=f32) * scale                       # (B, S, S)
            s = s - jnp.max(s, axis=-1, keepdims=True)
            e = jnp.exp(s)
            pr = e * pl.reciprocal(jnp.sum(e, axis=-1, keepdims=True), approx=True)
            o_h = jnp.einsum("bqk,bkd->bqd", pr, v_h,
                             preferred_element_type=f32)                              # (B, S, Dh)
            attn = attn + jnp.dot(o_h.reshape(BS, HEAD_DIM),
                                  o_w_l[hd * HEAD_DIM:(hd + 1) * HEAD_DIM, :],
                                  preferred_element_type=f32)                         # (32, 32)
        attn = attn + o_b_ref[l]

        # residual + LN1   (dropout p=0 -> identity)
        hb = layernorm(hb + attn, ln1_g_ref[l], ln1_b_ref[l])

        # FFN + residual + LN2
        ff = jnp.dot(hb, ff1_w_ref[l], preferred_element_type=f32) + ff1_b_ref[l]     # (32, 64)
        ff = jnp.maximum(ff, 0.0)
        ff = jnp.dot(ff, ff2_w_ref[l], preferred_element_type=f32) + ff2_b_ref[l]     # (32, 32)
        hb = layernorm(hb + ff, ln2_g_ref[l], ln2_b_ref[l])

    # ---- h.mean(dim=1) -> main_fc -> main_clf (n_demo != 0: no demographic concat) ----
    hm = jnp.mean(hb.reshape(B, SEQ, EMBED), axis=1)                                  # (B, D)
    fc = jnp.dot(hm, fc_w_ref[...], preferred_element_type=f32) + fc_b_ref[...]       # (B, 16)
    out = jnp.dot(fc, clf_w_ref[...], preferred_element_type=f32) + clf_b_ref[...]    # (B, 5)
    out_ref[...] = out


# ------------------------------ glue (XLA side) ------------------------------
def im2col3x3(x_nhwc):
    """3x3, stride 1, padding 1 patches.  (N,H,W,C) -> (N, H*W, 9*C).  Tiny one-time prep."""
    N, H, W, C = x_nhwc.shape
    xp = jnp.pad(x_nhwc, ((0, 0), (1, 1), (1, 1), (0, 0)))
    cols = [xp[:, dh:dh + H, dw:dw + W, :] for dh in range(3) for dw in range(3)]
    patches = jnp.concatenate(cols, axis=-1)
    return patches.reshape(N, H * W, 9 * C)


def forward(params, signal_nchw):
    # signal_nchw: (B, in_channel, H, W)  -- PyTorch NCHW convention
    x = jnp.transpose(signal_nchw, (0, 2, 3, 1)).astype(jnp.float32)      # -> NHWC
    patches = im2col3x3(x)                                                # (B, H*W, 9*C_in)

    # Fold Conv bias + BatchNorm2d(eval; running_mean=0, running_var=1) into one affine:
    #   y = (conv + b) * gamma/sqrt(1+eps) + beta = conv*scale + (b*scale + beta)
    conv_scale = (params["bn_gamma"] / jnp.sqrt(1.0 + BN_EPS)).reshape(1, OUT_CH)
    conv_shift = (params["conv_b"] * conv_scale[0] + params["bn_beta"]).reshape(1, OUT_CH)

    return pl.pallas_call(
        _fused_forward_kernel,
        out_shape=jax.ShapeDtypeStruct((B, OUT_SIZE), jnp.float32),
    )(
        patches, params["conv_w"], conv_scale, conv_shift,
        params["qkv_w"], params["qkv_b"], params["o_w"], params["o_b"],
        params["ff1_w"], params["ff1_b"], params["ff2_w"], params["ff2_b"],
        params["ln1_g"], params["ln1_b"], params["ln2_g"], params["ln2_b"],
        params["fc_w"], params["fc_b"], params["clf_w"], params["clf_b"],
    )


# ------------------------------ deterministic init ------------------------------
def init_params(key):
    ks = iter(jax.random.split(key, 64))
    p = {}

    # Conv2d: kaiming_uniform_ weight, zero bias
    fan_in_conv = IN_CH * 9
    bound = math.sqrt(6.0 / fan_in_conv)
    p["conv_w"] = jax.random.uniform(next(ks), (9 * IN_CH, OUT_CH), jnp.float32, -bound, bound)
    p["conv_b"] = jnp.zeros((OUT_CH,), jnp.float32)

    # BatchNorm2d: weight ~ N(1, 0.02), zero bias
    p["bn_gamma"] = 1.0 + 0.02 * jax.random.normal(next(ks), (OUT_CH,), jnp.float32)
    p["bn_beta"] = jnp.zeros((OUT_CH,), jnp.float32)

    def linear_init(kw, kb, fi, fo):
        # Linear: xavier_normal_(weight, gain=1.414); bias keeps PyTorch default uniform
        std = 1.414 * math.sqrt(2.0 / (fi + fo))
        w = std * jax.random.normal(kw, (fi, fo), jnp.float32)
        bb = 1.0 / math.sqrt(fi)
        b = jax.random.uniform(kb, (fo,), jnp.float32, -bb, bb)
        return w, b

    # per-layer transformer params, stacked on a leading layer axis for the fused kernel
    layers = []
    for _ in range(NUM_LAYERS):
        lp = {}
        # QKV in [Q; K; V] block layout (columns 0:D = Q, D:2D = K, 2D:3D = V), heads
        # are consecutive Dh-wide chunks inside each block (PyTorch MHA convention).
        lp["qkv_w"], lp["qkv_b"] = linear_init(next(ks), next(ks), EMBED, 3 * EMBED)
        lp["o_w"], lp["o_b"] = linear_init(next(ks), next(ks), EMBED, EMBED)
        lp["ff1_w"], lp["ff1_b"] = linear_init(next(ks), next(ks), EMBED, FF)
        lp["ff2_w"], lp["ff2_b"] = linear_init(next(ks), next(ks), FF, EMBED)
        lp["ln1_g"] = jnp.ones((EMBED,), jnp.float32)
        lp["ln1_b"] = jnp.zeros((EMBED,), jnp.float32)
        lp["ln2_g"] = jnp.ones((EMBED,), jnp.float32)
        lp["ln2_b"] = jnp.zeros((EMBED,), jnp.float32)
        layers.append(lp)

    def stack_w(name):
        return jnp.stack([lp[name] for lp in layers])                       # (L, fi, fo)

    def stack_v(name):
        return jnp.stack([lp[name].reshape(1, -1) for lp in layers])        # (L, 1, fo)

    p["qkv_w"] = stack_w("qkv_w"); p["qkv_b"] = stack_v("qkv_b")
    p["o_w"] = stack_w("o_w");     p["o_b"] = stack_v("o_b")
    p["ff1_w"] = stack_w("ff1_w"); p["ff1_b"] = stack_v("ff1_b")
    p["ff2_w"] = stack_w("ff2_w"); p["ff2_b"] = stack_v("ff2_b")
    p["ln1_g"] = stack_v("ln1_g"); p["ln1_b"] = stack_v("ln1_b")
    p["ln2_g"] = stack_v("ln2_g"); p["ln2_b"] = stack_v("ln2_b")

    fc_w, fc_b = linear_init(next(ks), next(ks), EMBED, OUT_DIM)
    p["fc_w"] = fc_w
    p["fc_b"] = fc_b.reshape(1, OUT_DIM)
    clf_w, clf_b = linear_init(next(ks), next(ks), OUT_DIM, OUT_SIZE)
    p["clf_w"] = clf_w
    p["clf_b"] = clf_b.reshape(1, OUT_SIZE)
    return p


# ------------------------------ main ------------------------------
if __name__ == "__main__":
    key = jax.random.PRNGKey(0)
    k_param, k_sig = jax.random.split(key)
    params = init_params(k_param)
    signal = jax.random.normal(k_sig, (B, IN_CH, H_SIG, W_SIG), jnp.float32)  # NCHW

    out = jax.jit(forward)(params, signal)
    out = jax.block_until_ready(out)
    assert out.shape == (B, OUT_SIZE), out.shape
    assert jnp.all(jnp.isfinite(out))
    print("KERNEL_OK")
</pallas_src>

<mosaic_0001>
module attributes {stable_mosaic.version = 11 : i64} {
  func.func @_fused_forward_kernel(%arg0: memref<2x128x9xf32, #tpu.memory_space<vmem>>, %arg1: memref<9x32xf32, #tpu.memory_space<vmem>>, %arg2: memref<1x32xf32, #tpu.memory_space<vmem>>, %arg3: memref<1x32xf32, #tpu.memory_space<vmem>>, %arg4: memref<2x32x96xf32, #tpu.memory_space<vmem>>, %arg5: memref<2x1x96xf32, #tpu.memory_space<vmem>>, %arg6: memref<2x32x32xf32, #tpu.memory_space<vmem>>, %arg7: memref<2x1x32xf32, #tpu.memory_space<vmem>>, %arg8: memref<2x32x64xf32, #tpu.memory_space<vmem>>, %arg9: memref<2x1x64xf32, #tpu.memory_space<vmem>>, %arg10: memref<2x64x32xf32, #tpu.memory_space<vmem>>, %arg11: memref<2x1x32xf32, #tpu.memory_space<vmem>>, %arg12: memref<2x1x32xf32, #tpu.memory_space<vmem>>, %arg13: memref<2x1x32xf32, #tpu.memory_space<vmem>>, %arg14: memref<2x1x32xf32, #tpu.memory_space<vmem>>, %arg15: memref<2x1x32xf32, #tpu.memory_space<vmem>>, %arg16: memref<32x16xf32, #tpu.memory_space<vmem>>, %arg17: memref<1x16xf32, #tpu.memory_space<vmem>>, %arg18: memref<16x5xf32, #tpu.memory_space<vmem>>, %arg19: memref<1x5xf32, #tpu.memory_space<vmem>>, %arg20: memref<2x5xf32, #tpu.memory_space<vmem>>) attributes {dimension_semantics = [], scalar_prefetch = 0 : i64, scratch_operands = 0 : i64, tpu.core_type = #tpu.core_type<tc>} {
    %c0 = arith.constant 0 : index
    %c0_0 = arith.constant 0 : index
    %c0_1 = arith.constant 0 : index
    %0 = vector.load %arg0[%c0, %c0_0, %c0_1] : memref<2x128x9xf32, #tpu.memory_space<vmem>>, vector<2x128x9xf32>
    %1 = vector.shape_cast %0 : vector<2x128x9xf32> to vector<256x9xf32>
    %c0_2 = arith.constant 0 : index
    %c0_3 = arith.constant 0 : index
    %2 = vector.load %arg1[%c0_2, %c0_3] : memref<9x32xf32, #tpu.memory_space<vmem>>, vector<9x32xf32>
    %cst = arith.constant dense<0.000000e+00> : vector<256x32xf32>
    %3 = tpu.matmul %1, %2, %cst {dimension_numbers = #tpu.dot_dimension_numbers<[1], [0], [0], [1], [0, 0, 1, 1], [], []>} : vector<256x9xf32>, vector<9x32xf32>, vector<256x32xf32> -> vector<256x32xf32>
    %c0_4 = arith.constant 0 : index
    %c0_5 = arith.constant 0 : index
    %4 = vector.load %arg2[%c0_4, %c0_5] : memref<1x32xf32, #tpu.memory_space<vmem>>, vector<1x32xf32>
    %5 = vector.broadcast %4 : vector<1x32xf32> to vector<256x32xf32>
    %6 = arith.mulf %3, %5 : vector<256x32xf32>
    %c0_6 = arith.constant 0 : index
    %c0_7 = arith.constant 0 : index
    %7 = vector.load %arg3[%c0_6, %c0_7] : memref<1x32xf32, #tpu.memory_space<vmem>>, vector<1x32xf32>
    %8 = vector.broadcast %7 : vector<1x32xf32> to vector<256x32xf32>
    %9 = arith.addf %6, %8 : vector<256x32xf32>
    %cst_8 = arith.constant 0.000000e+00 : f32
    %10 = vector.broadcast %cst_8 : f32 to vector<256x32xf32>
    %11 = arith.maximumf %9, %10 : vector<256x32xf32>
    %12 = vector.shape_cast %11 : vector<256x32xf32> to vector<2x8x16x32xf32>
    %cst_9 = arith.constant dense<0.000000e+00> : vector<2x16x32xf32>
    %13 = vector.multi_reduction <add>, %12, %cst_9 [1] : vector<2x8x16x32xf32> to vector<2x16x32xf32>
    %cst_10 = arith.constant 8.000000e+00 : f32
    %14 = vector.broadcast %cst_10 : f32 to vector<2x16x32xf32>
    %15 = arith.divf %13, %14 : vector<2x16x32xf32>
    %16 = vector.shape_cast %15 : vector<2x16x32xf32> to vector<32x32xf32>
    %c0_11 = arith.constant 0 : index
    %c0_12 = arith.constant 0 : index
    %c0_13 = arith.constant 0 : index
    %17 = vector.load %arg4[%c0_11, %c0_12, %c0_13] : memref<2x32x96xf32, #tpu.memory_space<vmem>>, vector<1x32x96xf32>
    %18 = vector.shape_cast %17 : vector<1x32x96xf32> to vector<32x96xf32>
    %cst_14 = arith.constant dense<0.000000e+00> : vector<32x96xf32>
    %19 = tpu.matmul %16, %18, %cst_14 {dimension_numbers = #tpu.dot_dimension_numbers<[1], [0], [0], [1], [0, 0, 1, 1], [], []>} : vector<32x32xf32>, vector<32x96xf32>, vector<32x96xf32> -> vector<32x96xf32>
    %c0_15 = arith.constant 0 : index
    %c0_16 = arith.constant 0 : index
    %c0_17 = arith.constant 0 : index
    %20 = vector.load %arg5[%c0_15, %c0_16, %c0_17] : memref<2x1x96xf32, #tpu.memory_space<vmem>>, vector<1x1x96xf32>
    %21 = vector.shape_cast %20 : vector<1x1x96xf32> to vector<1x96xf32>
    %22 = vector.broadcast %21 : vector<1x96xf32> to vector<32x96xf32>
    %23 = arith.addf %19, %22 : vector<32x96xf32>
    %24 = vector.shape_cast %23 : vector<32x96xf32> to vector<2x16x96xf32>
    %c0_18 = arith.constant 0 : index
    %c0_19 = arith.constant 0 : index
    %c0_20 = arith.constant 0 : index
    %25 = vector.load %arg6[%c0_18, %c0_19, %c0_20] : memref<2x32x32xf32, #tpu.memory_space<vmem>>, vector<1x32x32xf32>
    %26 = vector.shape_cast %25 : vector<1x32x32xf32> to vector<32x32xf32>
    %cst_21 = arith.constant 0.000000e+00 : f32
    %27 = vector.broadcast %cst_21 : f32 to vector<32x32xf32>
    %28 = vector.extract_strided_slice %24 {offsets = [0, 0, 0], sizes = [2, 16, 8], strides = [1, 1, 1]} : vector<2x16x96xf32> to vector<2x16x8xf32>
    %29 = vector.extract_strided_slice %24 {offsets = [0, 0, 32], sizes = [2, 16, 8], strides = [1, 1, 1]} : vector<2x16x96xf32> to vector<2x16x8xf32>
    %30 = vector.extract_strided_slice %24 {offsets = [0, 0, 64], sizes = [2, 16, 8], strides = [1, 1, 1]} : vector<2x16x96xf32> to vector<2x16x8xf32>
    "tpu.trace_start"() <{level = 10 : i32, message = "bqd,bkd->bqk"}> : () -> ()
    %cst_22 = arith.constant dense<0.000000e+00> : vector<2x16x16xf32>
    %31 = tpu.matmul %28, %29, %cst_22 {dimension_numbers = #tpu.dot_dimension_numbers<[2], [2], [1], [1], [0, 0, 0, 1, 1, 1], [0], [0]>} : vector<2x16x8xf32>, vector<2x16x8xf32>, vector<2x16x16xf32> -> vector<2x16x16xf32>
    "tpu.trace_stop"() : () -> ()
    %cst_23 = arith.constant 0.353553385 : f32
    %32 = vector.broadcast %cst_23 : f32 to vector<2x16x16xf32>
    %33 = arith.mulf %31, %32 : vector<2x16x16xf32>
    %cst_24 = arith.constant dense<0xFF800000> : vector<2x16xf32>
    %34 = vector.multi_reduction <maximumf>, %33, %cst_24 [2] : vector<2x16x16xf32> to vector<2x16xf32>
    %35 = vector.shape_cast %34 : vector<2x16xf32> to vector<2x16x1xf32>
    %36 = vector.broadcast %35 : vector<2x16x1xf32> to vector<2x16x16xf32>
    %37 = arith.subf %33, %36 : vector<2x16x16xf32>
    %38 = math.exp %37 : vector<2x16x16xf32>
    %cst_25 = arith.constant dense<0.000000e+00> : vector<2x16xf32>
    %39 = vector.multi_reduction <add>, %38, %cst_25 [2] : vector<2x16x16xf32> to vector<2x16xf32>
    %40 = vector.shape_cast %39 : vector<2x16xf32> to vector<2x16x1xf32>
    %41 = tpu.reciprocal %40 {approx = true} : vector<2x16x1xf32> -> vector<2x16x1xf32>
    %42 = vector.broadcast %41 : vector<2x16x1xf32> to vector<2x16x16xf32>
    %43 = arith.mulf %38, %42 : vector<2x16x16xf32>
    "tpu.trace_start"() <{level = 10 : i32, message = "bqk,bkd->bqd"}> : () -> ()
    %cst_26 = arith.constant dense<0.000000e+00> : vector<2x16x8xf32>
    %44 = tpu.matmul %43, %30, %cst_26 {dimension_numbers = #tpu.dot_dimension_numbers<[2], [1], [1], [2], [0, 0, 0, 1, 1, 2], [0], [0]>} : vector<2x16x16xf32>, vector<2x16x8xf32>, vector<2x16x8xf32> -> vector<2x16x8xf32>
    "tpu.trace_stop"() : () -> ()
    %45 = vector.shape_cast %44 : vector<2x16x8xf32> to vector<32x8xf32>
    %46 = vector.extract_strided_slice %26 {offsets = [0, 0], sizes = [8, 32], strides = [1, 1]} : vector<32x32xf32> to vector<8x32xf32>
    %cst_27 = arith.constant dense<0.000000e+00> : vector<32x32xf32>
    %47 = tpu.matmul %45, %46, %cst_27 {dimension_numbers = #tpu.dot_dimension_numbers<[1], [0], [0], [1], [0, 0, 1, 1], [], []>} : vector<32x8xf32>, vector<8x32xf32>, vector<32x32xf32> -> vector<32x32xf32>
    %48 = arith.addf %27, %47 : vector<32x32xf32>
    %49 = vector.extract_strided_slice %24 {offsets = [0, 0, 8], sizes = [2, 16, 8], strides = [1, 1, 1]} : vector<2x16x96xf32> to vector<2x16x8xf32>
    %50 = vector.extract_strided_slice %24 {offsets = [0, 0, 40], sizes = [2, 16, 8], strides = [1, 1, 1]} : vector<2x16x96xf32> to vector<2x16x8xf32>
    %51 = vector.extract_strided_slice %24 {offsets = [0, 0, 72], sizes = [2, 16, 8], strides = [1, 1, 1]} : vector<2x16x96xf32> to vector<2x16x8xf32>
    "tpu.trace_start"() <{level = 10 : i32, message = "bqd,bkd->bqk"}> : () -> ()
    %cst_28 = arith.constant dense<0.000000e+00> : vector<2x16x16xf32>
    %52 = tpu.matmul %49, %50, %cst_28 {dimension_numbers = #tpu.dot_dimension_numbers<[2], [2], [1], [1], [0, 0, 0, 1, 1, 1], [0], [0]>} : vector<2x16x8xf32>, vector<2x16x8xf32>, vector<2x16x16xf32> -> vector<2x16x16xf32>
    "tpu.trace_stop"() : () -> ()
    %cst_29 = arith.constant 0.353553385 : f32
    %53 = vector.broadcast %cst_29 : f32 to vector<2x16x16xf32>
    %54 = arith.mulf %52, %53 : vector<2x16x16xf32>
    %cst_30 = arith.constant dense<0xFF800000> : vector<2x16xf32>
    %55 = vector.multi_reduction <maximumf>, %54, %cst_30 [2] : vector<2x16x16xf32> to vector<2x16xf32>
    %56 = vector.shape_cast %55 : vector<2x16xf32> to vector<2x16x1xf32>
    %57 = vector.broadcast %56 : vector<2x16x1xf32> to vector<2x16x16xf32>
    %58 = arith.subf %54, %57 : vector<2x16x16xf32>
    %59 = math.exp %58 : vector<2x16x16xf32>
    %cst_31 = arith.constant dense<0.000000e+00> : vector<2x16xf32>
    %60 = vector.multi_reduction <add>, %59, %cst_31 [2] : vector<2x16x16xf32> to vector<2x16xf32>
    %61 = vector.shape_cast %60 : vector<2x16xf32> to vector<2x16x1xf32>
    %62 = tpu.reciprocal %61 {approx = true} : vector<2x16x1xf32> -> vector<2x16x1xf32>
    %63 = vector.broadcast %62 : vector<2x16x1xf32> to vector<2x16x16xf32>
    %64 = arith.mulf %59, %63 : vector<2x16x16xf32>
    "tpu.trace_start"() <{level = 10 : i32, message = "bqk,bkd->bqd"}> : () -> ()
    %cst_32 = arith.constant dense<0.000000e+00> : vector<2x16x8xf32>
    %65 = tpu.matmul %64, %51, %cst_32 {dimension_numbers = #tpu.dot_dimension_numbers<[2], [1], [1], [2], [0, 0, 0, 1, 1, 2], [0], [0]>} : vector<2x16x16xf32>, vector<2x16x8xf32>, vector<2x16x8xf32> -> vector<2x16x8xf32>
    "tpu.trace_stop"() : () -> ()
    %66 = vector.shape_cast %65 : vector<2x16x8xf32> to vector<32x8xf32>
    %67 = vector.extract_strided_slice %26 {offsets = [8, 0], sizes = [8, 32], strides = [1, 1]} : vector<32x32xf32> to vector<8x32xf32>
    %cst_33 = arith.constant dense<0.000000e+00> : vector<32x32xf32>
    %68 = tpu.matmul %66, %67, %cst_33 {dimension_numbers = #tpu.dot_dimension_numbers<[1], [0], [0], [1], [0, 0, 1, 1], [], []>} : vector<32x8xf32>, vector<8x32xf32>, vector<32x32xf32> -> vector<32x32xf32>
    %69 = arith.addf %48, %68 : vector<32x32xf32>
    %70 = vector.extract_strided_slice %24 {offsets = [0, 0, 16], sizes = [2, 16, 8], strides = [1, 1, 1]} : vector<2x16x96xf32> to vector<2x16x8xf32>
    %71 = vector.extract_strided_slice %24 {offsets = [0, 0, 48], sizes = [2, 16, 8], strides = [1, 1, 1]} : vector<2x16x96xf32> to vector<2x16x8xf32>
    %72 = vector.extract_strided_slice %24 {offsets = [0, 0, 80], sizes = [2, 16, 8], strides = [1, 1, 1]} : vector<2x16x96xf32> to vector<2x16x8xf32>
    "tpu.trace_start"() <{level = 10 : i32, message = "bqd,bkd->bqk"}> : () -> ()
    %cst_34 = arith.constant dense<0.000000e+00> : vector<2x16x16xf32>
    %73 = tpu.matmul %70, %71, %cst_34 {dimension_numbers = #tpu.dot_dimension_numbers<[2], [2], [1], [1], [0, 0, 0, 1, 1, 1], [0], [0]>} : vector<2x16x8xf32>, vector<2x16x8xf32>, vector<2x16x16xf32> -> vector<2x16x16xf32>
    "tpu.trace_stop"() : () -> ()
    %cst_35 = arith.constant 0.353553385 : f32
    %74 = vector.broadcast %cst_35 : f32 to vector<2x16x16xf32>
    %75 = arith.mulf %73, %74 : vector<2x16x16xf32>
    %cst_36 = arith.constant dense<0xFF800000> : vector<2x16xf32>
    %76 = vector.multi_reduction <maximumf>, %75, %cst_36 [2] : vector<2x16x16xf32> to vector<2x16xf32>
    %77 = vector.shape_cast %76 : vector<2x16xf32> to vector<2x16x1xf32>
    %78 = vector.broadcast %77 : vector<2x16x1xf32> to vector<2x16x16xf32>
    %79 = arith.subf %75, %78 : vector<2x16x16xf32>
    %80 = math.exp %79 : vector<2x16x16xf32>
    %cst_37 = arith.constant dense<0.000000e+00> : vector<2x16xf32>
    %81 = vector.multi_reduction <add>, %80, %cst_37 [2] : vector<2x16x16xf32> to vector<2x16xf32>
    %82 = vector.shape_cast %81 : vector<2x16xf32> to vector<2x16x1xf32>
    %83 = tpu.reciprocal %82 {approx = true} : vector<2x16x1xf32> -> vector<2x16x1xf32>
    %84 = vector.broadcast %83 : vector<2x16x1xf32> to vector<2x16x16xf32>
    %85 = arith.mulf %80, %84 : vector<2x16x16xf32>
    "tpu.trace_start"() <{level = 10 : i32, message = "bqk,bkd->bqd"}> : () -> ()
    %cst_38 = arith.constant dense<0.000000e+00> : vector<2x16x8xf32>
    %86 = tpu.matmul %85, %72, %cst_38 {dimension_numbers = #tpu.dot_dimension_numbers<[2], [1], [1], [2], [0, 0, 0, 1, 1, 2], [0], [0]>} : vector<2x16x16xf32>, vector<2x16x8xf32>, vector<2x16x8xf32> -> vector<2x16x8xf32>
    "tpu.trace_stop"() : () -> ()
    %87 = vector.shape_cast %86 : vector<2x16x8xf32> to vector<32x8xf32>
    %88 = vector.extract_strided_slice %26 {offsets = [16, 0], sizes = [8, 32], strides = [1, 1]} : vector<32x32xf32> to vector<8x32xf32>
    %cst_39 = arith.constant dense<0.000000e+00> : vector<32x32xf32>
    %89 = tpu.matmul %87, %88, %cst_39 {dimension_numbers = #tpu.dot_dimension_numbers<[1], [0], [0], [1], [0, 0, 1, 1], [], []>} : vector<32x8xf32>, vector<8x32xf32>, vector<32x32xf32> -> vector<32x32xf32>
    %90 = arith.addf %69, %89 : vector<32x32xf32>
    %91 = vector.extract_strided_slice %24 {offsets = [0, 0, 24], sizes = [2, 16, 8], strides = [1, 1, 1]} : vector<2x16x96xf32> to vector<2x16x8xf32>
    %92 = vector.extract_strided_slice %24 {offsets = [0, 0, 56], sizes = [2, 16, 8], strides = [1, 1, 1]} : vector<2x16x96xf32> to vector<2x16x8xf32>
    %93 = vector.extract_strided_slice %24 {offsets = [0, 0, 88], sizes = [2, 16, 8], strides = [1, 1, 1]} : vector<2x16x96xf32> to vector<2x16x8xf32>
    "tpu.trace_start"() <{level = 10 : i32, message = "bqd,bkd->bqk"}> : () -> ()
    %cst_40 = arith.constant dense<0.000000e+00> : vector<2x16x16xf32>
    %94 = tpu.matmul %91, %92, %cst_40 {dimension_numbers = #tpu.dot_dimension_numbers<[2], [2], [1], [1], [0, 0, 0, 1, 1, 1], [0], [0]>} : vector<2x16x8xf32>, vector<2x16x8xf32>, vector<2x16x16xf32> -> vector<2x16x16xf32>
    "tpu.trace_stop"() : () -> ()
    %cst_41 = arith.constant 0.353553385 : f32
    %95 = vector.broadcast %cst_41 : f32 to vector<2x16x16xf32>
    %96 = arith.mulf %94, %95 : vector<2x16x16xf32>
    %cst_42 = arith.constant dense<0xFF800000> : vector<2x16xf32>
    %97 = vector.multi_reduction <maximumf>, %96, %cst_42 [2] : vector<2x16x16xf32> to vector<2x16xf32>
    %98 = vector.shape_cast %97 : vector<2x16xf32> to vector<2x16x1xf32>
    %99 = vector.broadcast %98 : vector<2x16x1xf32> to vector<2x16x16xf32>
    %100 = arith.subf %96, %99 : vector<2x16x16xf32>
    %101 = math.exp %100 : vector<2x16x16xf32>
    %cst_43 = arith.constant dense<0.000000e+00> : vector<2x16xf32>
    %102 = vector.multi_reduction <add>, %101, %cst_43 [2] : vector<2x16x16xf32> to vector<2x16xf32>
    %103 = vector.shape_cast %102 : vector<2x16xf32> to vector<2x16x1xf32>
    %104 = tpu.reciprocal %103 {approx = true} : vector<2x16x1xf32> -> vector<2x16x1xf32>
    %105 = vector.broadcast %104 : vector<2x16x1xf32> to vector<2x16x16xf32>
    %106 = arith.mulf %101, %105 : vector<2x16x16xf32>
    "tpu.trace_start"() <{level = 10 : i32, message = "bqk,bkd->bqd"}> : () -> ()
    %cst_44 = arith.constant dense<0.000000e+00> : vector<2x16x8xf32>
    %107 = tpu.matmul %106, %93, %cst_44 {dimension_numbers = #tpu.dot_dimension_numbers<[2], [1], [1], [2], [0, 0, 0, 1, 1, 2], [0], [0]>} : vector<2x16x16xf32>, vector<2x16x8xf32>, vector<2x16x8xf32> -> vector<2x16x8xf32>
    "tpu.trace_stop"() : () -> ()
    %108 = vector.shape_cast %107 : vector<2x16x8xf32> to vector<32x8xf32>
    %109 = vector.extract_strided_slice %26 {offsets = [24, 0], sizes = [8, 32], strides = [1, 1]} : vector<32x32xf32> to vector<8x32xf32>
    %cst_45 = arith.constant dense<0.000000e+00> : vector<32x32xf32>
    %110 = tpu.matmul %108, %109, %cst_45 {dimension_numbers = #tpu.dot_dimension_numbers<[1], [0], [0], [1], [0, 0, 1, 1], [], []>} : vector<32x8xf32>, vector<8x32xf32>, vector<32x32xf32> -> vector<32x32xf32>
    %111 = arith.addf %90, %110 : vector<32x32xf32>
    %c0_46 = arith.constant 0 : index
    %c0_47 = arith.constant 0 : index
    %c0_48 = arith.constant 0 : index
    %112 = vector.load %arg7[%c0_46, %c0_47, %c0_48] : memref<2x1x32xf32, #tpu.memory_space<vmem>>, vector<1x1x32xf32>
    %113 = vector.shape_cast %112 : vector<1x1x32xf32> to vector<1x32xf32>
    %114 = vector.broadcast %113 : vector<1x32xf32> to vector<32x32xf32>
    %115 = arith.addf %111, %114 : vector<32x32xf32>
    %116 = arith.addf %16, %115 : vector<32x32xf32>
    %c0_49 = arith.constant 0 : index
    %c0_50 = arith.constant 0 : index
    %c0_51 = arith.constant 0 : index
    %117 = vector.load %arg12[%c0_49, %c0_50, %c0_51] : memref<2x1x32xf32, #tpu.memory_space<vmem>>, vector<1x1x32xf32>
    %118 = vector.shape_cast %117 : vector<1x1x32xf32> to vector<1x32xf32>
    %c0_52 = arith.constant 0 : index
    %c0_53 = arith.constant 0 : index
    %c0_54 = arith.constant 0 : index
    %119 = vector.load %arg13[%c0_52, %c0_53, %c0_54] : memref<2x1x32xf32, #tpu.memory_space<vmem>>, vector<1x1x32xf32>
    %120 = vector.shape_cast %119 : vector<1x1x32xf32> to vector<1x32xf32>
    %cst_55 = arith.constant dense<0.000000e+00> : vector<32xf32>
    %121 = vector.multi_reduction <add>, %116, %cst_55 [1] : vector<32x32xf32> to vector<32xf32>
    %122 = vector.shape_cast %121 : vector<32xf32> to vector<32x1xf32>
    %cst_56 = arith.constant 3.200000e+01 : f32
    %123 = vector.broadcast %cst_56 : f32 to vector<32x1xf32>
    %124 = arith.divf %122, %123 : vector<32x1xf32>
    %125 = vector.broadcast %124 : vector<32x1xf32> to vector<32x32xf32>
    %126 = arith.subf %116, %125 : vector<32x32xf32>
    %127 = arith.mulf %126, %126 : vector<32x32xf32>
    %cst_57 = arith.constant dense<0.000000e+00> : vector<32xf32>
    %128 = vector.multi_reduction <add>, %127, %cst_57 [1] : vector<32x32xf32> to vector<32xf32>
    %129 = vector.shape_cast %128 : vector<32xf32> to vector<32x1xf32>
    %cst_58 = arith.constant 3.200000e+01 : f32
    %130 = vector.broadcast %cst_58 : f32 to vector<32x1xf32>
    %131 = arith.divf %129, %130 : vector<32x1xf32>
    %132 = vector.broadcast %124 : vector<32x1xf32> to vector<32x32xf32>
    %133 = arith.subf %116, %132 : vector<32x32xf32>
    %cst_59 = arith.constant 9.99999974E-6 : f32
    %134 = vector.broadcast %cst_59 : f32 to vector<32x1xf32>
    %135 = arith.addf %131, %134 : vector<32x1xf32>
    %136 = math.rsqrt %135 : vector<32x1xf32>
    %137 = vector.broadcast %136 : vector<32x1xf32> to vector<32x32xf32>
    %138 = arith.mulf %133, %137 : vector<32x32xf32>
    %139 = vector.broadcast %118 : vector<1x32xf32> to vector<32x32xf32>
    %140 = arith.mulf %138, %139 : vector<32x32xf32>
    %141 = vector.broadcast %120 : vector<1x32xf32> to vector<32x32xf32>
    %142 = arith.addf %140, %141 : vector<32x32xf32>
    %c0_60 = arith.constant 0 : index
    %c0_61 = arith.constant 0 : index
    %c0_62 = arith.constant 0 : index
    %143 = vector.load %arg8[%c0_60, %c0_61, %c0_62] : memref<2x32x64xf32, #tpu.memory_space<vmem>>, vector<1x32x64xf32>
    %144 = vector.shape_cast %143 : vector<1x32x64xf32> to vector<32x64xf32>
    %cst_63 = arith.constant dense<0.000000e+00> : vector<32x64xf32>
    %145 = tpu.matmul %142, %144, %cst_63 {dimension_numbers = #tpu.dot_dimension_numbers<[1], [0], [0], [1], [0, 0, 1, 1], [], []>} : vector<32x32xf32>, vector<32x64xf32>, vector<32x64xf32> -> vector<32x64xf32>
    %c0_64 = arith.constant 0 : index
    %c0_65 = arith.constant 0 : index
    %c0_66 = arith.constant 0 : index
    %146 = vector.load %arg9[%c0_64, %c0_65, %c0_66] : memref<2x1x64xf32, #tpu.memory_space<vmem>>, vector<1x1x64xf32>
    %147 = vector.shape_cast %146 : vector<1x1x64xf32> to vector<1x64xf32>
    %148 = vector.broadcast %147 : vector<1x64xf32> to vector<32x64xf32>
    %149 = arith.addf %145, %148 : vector<32x64xf32>
    %cst_67 = arith.constant 0.000000e+00 : f32
    %150 = vector.broadcast %cst_67 : f32 to vector<32x64xf32>
    %151 = arith.maximumf %149, %150 : vector<32x64xf32>
    %c0_68 = arith.constant 0 : index
    %c0_69 = arith.constant 0 : index
    %c0_70 = arith.constant 0 : index
    %152 = vector.load %arg10[%c0_68, %c0_69, %c0_70] : memref<2x64x32xf32, #tpu.memory_space<vmem>>, vector<1x64x32xf32>
    %153 = vector.shape_cast %152 : vector<1x64x32xf32> to vector<64x32xf32>
    %cst_71 = arith.constant dense<0.000000e+00> : vector<32x32xf32>
    %154 = tpu.matmul %151, %153, %cst_71 {dimension_numbers = #tpu.dot_dimension_numbers<[1], [0], [0], [1], [0, 0, 1, 1], [], []>} : vector<32x64xf32>, vector<64x32xf32>, vector<32x32xf32> -> vector<32x32xf32>
    %c0_72 = arith.constant 0 : index
    %c0_73 = arith.constant 0 : index
    %c0_74 = arith.constant 0 : index
    %155 = vector.load %arg11[%c0_72, %c0_73, %c0_74] : memref<2x1x32xf32, #tpu.memory_space<vmem>>, vector<1x1x32xf32>
    %156 = vector.shape_cast %155 : vector<1x1x32xf32> to vector<1x32xf32>
    %157 = vector.broadcast %156 : vector<1x32xf32> to vector<32x32xf32>
    %158 = arith.addf %154, %157 : vector<32x32xf32>
    %159 = arith.addf %142, %158 : vector<32x32xf32>
    %c0_75 = arith.constant 0 : index
    %c0_76 = arith.constant 0 : index
    %c0_77 = arith.constant 0 : index
    %160 = vector.load %arg14[%c0_75, %c0_76, %c0_77] : memref<2x1x32xf32, #tpu.memory_space<vmem>>, vector<1x1x32xf32>
    %161 = vector.shape_cast %160 : vector<1x1x32xf32> to vector<1x32xf32>
    %c0_78 = arith.constant 0 : index
    %c0_79 = arith.constant 0 : index
    %c0_80 = arith.constant 0 : index
    %162 = vector.load %arg15[%c0_78, %c0_79, %c0_80] : memref<2x1x32xf32, #tpu.memory_space<vmem>>, vector<1x1x32xf32>
    %163 = vector.shape_cast %162 : vector<1x1x32xf32> to vector<1x32xf32>
    %cst_81 = arith.constant dense<0.000000e+00> : vector<32xf32>
    %164 = vector.multi_reduction <add>, %159, %cst_81 [1] : vector<32x32xf32> to vector<32xf32>
    %165 = vector.shape_cast %164 : vector<32xf32> to vector<32x1xf32>
    %cst_82 = arith.constant 3.200000e+01 : f32
    %166 = vector.broadcast %cst_82 : f32 to vector<32x1xf32>
    %167 = arith.divf %165, %166 : vector<32x1xf32>
    %168 = vector.broadcast %167 : vector<32x1xf32> to vector<32x32xf32>
    %169 = arith.subf %159, %168 : vector<32x32xf32>
    %170 = arith.mulf %169, %169 : vector<32x32xf32>
    %cst_83 = arith.constant dense<0.000000e+00> : vector<32xf32>
    %171 = vector.multi_reduction <add>, %170, %cst_83 [1] : vector<32x32xf32> to vector<32xf32>
    %172 = vector.shape_cast %171 : vector<32xf32> to vector<32x1xf32>
    %cst_84 = arith.constant 3.200000e+01 : f32
    %173 = vector.broadcast %cst_84 : f32 to vector<32x1xf32>
    %174 = arith.divf %172, %173 : vector<32x1xf32>
    %175 = vector.broadcast %167 : vector<32x1xf32> to vector<32x32xf32>
    %176 = arith.subf %159, %175 : vector<32x32xf32>
    %cst_85 = arith.constant 9.99999974E-6 : f32
    %177 = vector.broadcast %cst_85 : f32 to vector<32x1xf32>
    %178 = arith.addf %174, %177 : vector<32x1xf32>
    %179 = math.rsqrt %178 : vector<32x1xf32>
    %180 = vector.broadcast %179 : vector<32x1xf32> to vector<32x32xf32>
    %181 = arith.mulf %176, %180 : vector<32x32xf32>
    %182 = vector.broadcast %161 : vector<1x32xf32> to vector<32x32xf32>
    %183 = arith.mulf %181, %182 : vector<32x32xf32>
    %184 = vector.broadcast %163 : vector<1x32xf32> to vector<32x32xf32>
    %185 = arith.addf %183, %184 : vector<32x32xf32>
    %c1 = arith.constant 1 : index
    %c0_86 = arith.constant 0 : index
    %c0_87 = arith.constant 0 : index
    %186 = vector.load %arg4[%c1, %c0_86, %c0_87] : memref<2x32x96xf32, #tpu.memory_space<vmem>>, vector<1x32x96xf32>
    %187 = vector.shape_cast %186 : vector<1x32x96xf32> to vector<32x96xf32>
    %cst_88 = arith.constant dense<0.000000e+00> : vector<32x96xf32>
    %188 = tpu.matmul %185, %187, %cst_88 {dimension_numbers = #tpu.dot_dimension_numbers<[1], [0], [0], [1], [0, 0, 1, 1], [], []>} : vector<32x32xf32>, vector<32x96xf32>, vector<32x96xf32> -> vector<32x96xf32>
    %c1_89 = arith.constant 1 : index
    %c0_90 = arith.constant 0 : index
    %c0_91 = arith.constant 0 : index
    %189 = vector.load %arg5[%c1_89, %c0_90, %c0_91] : memref<2x1x96xf32, #tpu.memory_space<vmem>>, vector<1x1x96xf32>
    %190 = vector.shape_cast %189 : vector<1x1x96xf32> to vector<1x96xf32>
    %191 = vector.broadcast %190 : vector<1x96xf32> to vector<32x96xf32>
    %192 = arith.addf %188, %191 : vector<32x96xf32>
    %193 = vector.shape_cast %192 : vector<32x96xf32> to vector<2x16x96xf32>
    %c1_92 = arith.constant 1 : index
    %c0_93 = arith.constant 0 : index
    %c0_94 = arith.constant 0 : index
    %194 = vector.load %arg6[%c1_92, %c0_93, %c0_94] : memref<2x32x32xf32, #tpu.memory_space<vmem>>, vector<1x32x32xf32>
    %195 = vector.shape_cast %194 : vector<1x32x32xf32> to vector<32x32xf32>
    %cst_95 = arith.constant 0.000000e+00 : f32
    %196 = vector.broadcast %cst_95 : f32 to vector<32x32xf32>
    %197 = vector.extract_strided_slice %193 {offsets = [0, 0, 0], sizes = [2, 16, 8], strides = [1, 1, 1]} : vector<2x16x96xf32> to vector<2x16x8xf32>
    %198 = vector.extract_strided_slice %193 {offsets = [0, 0, 32], sizes = [2, 16, 8], strides = [1, 1, 1]} : vector<2x16x96xf32> to vector<2x16x8xf32>
    %199 = vector.extract_strided_slice %193 {offsets = [0, 0, 64], sizes = [2, 16, 8], strides = [1, 1, 1]} : vector<2x16x96xf32> to vector<2x16x8xf32>
    "tpu.trace_start"() <{level = 10 : i32, message = "bqd,bkd->bqk"}> : () -> ()
    %cst_96 = arith.constant dense<0.000000e+00> : vector<2x16x16xf32>
    %200 = tpu.matmul %197, %198, %cst_96 {dimension_numbers = #tpu.dot_dimension_numbers<[2], [2], [1], [1], [0, 0, 0, 1, 1, 1], [0], [0]>} : vector<2x16x8xf32>, vector<2x16x8xf32>, vector<2x16x16xf32> -> vector<2x16x16xf32>
    "tpu.trace_stop"() : () -> ()
    %cst_97 = arith.constant 0.353553385 : f32
    %201 = vector.broadcast %cst_97 : f32 to vector<2x16x16xf32>
    %202 = arith.mulf %200, %201 : vector<2x16x16xf32>
    %cst_98 = arith.constant dense<0xFF800000> : vector<2x16xf32>
    %203 = vector.multi_reduction <maximumf>, %202, %cst_98 [2] : vector<2x16x16xf32> to vector<2x16xf32>
    %204 = vector.shape_cast %203 : vector<2x16xf32> to vector<2x16x1xf32>
    %205 = vector.broadcast %204 : vector<2x16x1xf32> to vector<2x16x16xf32>
    %206 = arith.subf %202, %205 : vector<2x16x16xf32>
    %207 = math.exp %206 : vector<2x16x16xf32>
    %cst_99 = arith.constant dense<0.000000e+00> : vector<2x16xf32>
    %208 = vector.multi_reduction <add>, %207, %cst_99 [2] : vector<2x16x16xf32> to vector<2x16xf32>
    %209 = vector.shape_cast %208 : vector<2x16xf32> to vector<2x16x1xf32>
    %210 = tpu.reciprocal %209 {approx = true} : vector<2x16x1xf32> -> vector<2x16x1xf32>
    %211 = vector.broadcast %210 : vector<2x16x1xf32> to vector<2x16x16xf32>
    %212 = arith.mulf %207, %211 : vector<2x16x16xf32>
    "tpu.trace_start"() <{level = 10 : i32, message = "bqk,bkd->bqd"}> : () -> ()
    %cst_100 = arith.constant dense<0.000000e+00> : vector<2x16x8xf32>
    %213 = tpu.matmul %212, %199, %cst_100 {dimension_numbers = #tpu.dot_dimension_numbers<[2], [1], [1], [2], [0, 0, 0, 1, 1, 2], [0], [0]>} : vector<2x16x16xf32>, vector<2x16x8xf32>, vector<2x16x8xf32> -> vector<2x16x8xf32>
    "tpu.trace_stop"() : () -> ()
    %214 = vector.shape_cast %213 : vector<2x16x8xf32> to vector<32x8xf32>
    %215 = vector.extract_strided_slice %195 {offsets = [0, 0], sizes = [8, 32], strides = [1, 1]} : vector<32x32xf32> to vector<8x32xf32>
    %cst_101 = arith.constant dense<0.000000e+00> : vector<32x32xf32>
    %216 = tpu.matmul %214, %215, %cst_101 {dimension_numbers = #tpu.dot_dimension_numbers<[1], [0], [0], [1], [0, 0, 1, 1], [], []>} : vector<32x8xf32>, vector<8x32xf32>, vector<32x32xf32> -> vector<32x32xf32>
    %217 = arith.addf %196, %216 : vector<32x32xf32>
    %218 = vector.extract_strided_slice %193 {offsets = [0, 0, 8], sizes = [2, 16, 8], strides = [1, 1, 1]} : vector<2x16x96xf32> to vector<2x16x8xf32>
    %219 = vector.extract_strided_slice %193 {offsets = [0, 0, 40], sizes = [2, 16, 8], strides = [1, 1, 1]} : vector<2x16x96xf32> to vector<2x16x8xf32>
    %220 = vector.extract_strided_slice %193 {offsets = [0, 0, 72], sizes = [2, 16, 8], strides = [1, 1, 1]} : vector<2x16x96xf32> to vector<2x16x8xf32>
    "tpu.trace_start"() <{level = 10 : i32, message = "bqd,bkd->bqk"}> : () -> ()
    %cst_102 = arith.constant dense<0.000000e+00> : vector<2x16x16xf32>
    %221 = tpu.matmul %218, %219, %cst_102 {dimension_numbers = #tpu.dot_dimension_numbers<[2], [2], [1], [1], [0, 0, 0, 1, 1, 1], [0], [0]>} : vector<2x16x8xf32>, vector<2x16x8xf32>, vector<2x16x16xf32> -> vector<2x16x16xf32>
    "tpu.trace_stop"() : () -> ()
    %cst_103 = arith.constant 0.353553385 : f32
    %222 = vector.broadcast %cst_103 : f32 to vector<2x16x16xf32>
    %223 = arith.mulf %221, %222 : vector<2x16x16xf32>
    %cst_104 = arith.constant dense<0xFF800000> : vector<2x16xf32>
    %224 = vector.multi_reduction <maximumf>, %223, %cst_104 [2] : vector<2x16x16xf32> to vector<2x16xf32>
    %225 = vector.shape_cast %224 : vector<2x16xf32> to vector<2x16x1xf32>
    %226 = vector.broadcast %225 : vector<2x16x1xf32> to vector<2x16x16xf32>
    %227 = arith.subf %223, %226 : vector<2x16x16xf32>
    %228 = math.exp %227 : vector<2x16x16xf32>
    %cst_105 = arith.constant dense<0.000000e+00> : vector<2x16xf32>
    %229 = vector.multi_reduction <add>, %228, %cst_105 [2] : vector<2x16x16xf32> to vector<2x16xf32>
    %230 = vector.shape_cast %229 : vector<2x16xf32> to vector<2x16x1xf32>
    %231 = tpu.reciprocal %230 {approx = true} : vector<2x16x1xf32> -> vector<2x16x1xf32>
    %232 = vector.broadcast %231 : vector<2x16x1xf32> to vector<2x16x16xf32>
    %233 = arith.mulf %228, %232 : vector<2x16x16xf32>
    "tpu.trace_start"() <{level = 10 : i32, message = "bqk,bkd->bqd"}> : () -> ()
    %cst_106 = arith.constant dense<0.000000e+00> : vector<2x16x8xf32>
    %234 = tpu.matmul %233, %220, %cst_106 {dimension_numbers = #tpu.dot_dimension_numbers<[2], [1], [1], [2], [0, 0, 0, 1, 1, 2], [0], [0]>} : vector<2x16x16xf32>, vector<2x16x8xf32>, vector<2x16x8xf32> -> vector<2x16x8xf32>
    "tpu.trace_stop"() : () -> ()
    %235 = vector.shape_cast %234 : vector<2x16x8xf32> to vector<32x8xf32>
    %236 = vector.extract_strided_slice %195 {offsets = [8, 0], sizes = [8, 32], strides = [1, 1]} : vector<32x32xf32> to vector<8x32xf32>
    %cst_107 = arith.constant dense<0.000000e+00> : vector<32x32xf32>
    %237 = tpu.matmul %235, %236, %cst_107 {dimension_numbers = #tpu.dot_dimension_numbers<[1], [0], [0], [1], [0, 0, 1, 1], [], []>} : vector<32x8xf32>, vector<8x32xf32>, vector<32x32xf32> -> vector<32x32xf32>
    %238 = arith.addf %217, %237 : vector<32x32xf32>
    %239 = vector.extract_strided_slice %193 {offsets = [0, 0, 16], sizes = [2, 16, 8], strides = [1, 1, 1]} : vector<2x16x96xf32> to vector<2x16x8xf32>
    %240 = vector.extract_strided_slice %193 {offsets = [0, 0, 48], sizes = [2, 16, 8], strides = [1, 1, 1]} : vector<2x16x96xf32> to vector<2x16x8xf32>
    %241 = vector.extract_strided_slice %193 {offsets = [0, 0, 80], sizes = [2, 16, 8], strides = [1, 1, 1]} : vector<2x16x96xf32> to vector<2x16x8xf32>
    "tpu.trace_start"() <{level = 10 : i32, message = "bqd,bkd->bqk"}> : () -> ()
    %cst_108 = arith.constant dense<0.000000e+00> : vector<2x16x16xf32>
    %242 = tpu.matmul %239, %240, %cst_108 {dimension_numbers = #tpu.dot_dimension_numbers<[2], [2], [1], [1], [0, 0, 0, 1, 1, 1], [0], [0]>} : vector<2x16x8xf32>, vector<2x16x8xf32>, vector<2x16x16xf32> -> vector<2x16x16xf32>
    "tpu.trace_stop"() : () -> ()
    %cst_109 = arith.constant 0.353553385 : f32
    %243 = vector.broadcast %cst_109 : f32 to vector<2x16x16xf32>
    %244 = arith.mulf %242, %243 : vector<2x16x16xf32>
    %cst_110 = arith.constant dense<0xFF800000> : vector<2x16xf32>
    %245 = vector.multi_reduction <maximumf>, %244, %cst_110 [2] : vector<2x16x16xf32> to vector<2x16xf32>
    %246 = vector.shape_cast %245 : vector<2x16xf32> to vector<2x16x1xf32>
    %247 = vector.broadcast %246 : vector<2x16x1xf32> to vector<2x16x16xf32>
    %248 = arith.subf %244, %247 : vector<2x16x16xf32>
    %249 = math.exp %248 : vector<2x16x16xf32>
    %cst_111 = arith.constant dense<0.000000e+00> : vector<2x16xf32>
    %250 = vector.multi_reduction <add>, %249, %cst_111 [2] : vector<2x16x16xf32> to vector<2x16xf32>
    %251 = vector.shape_cast %250 : vector<2x16xf32> to vector<2x16x1xf32>
    %252 = tpu.reciprocal %251 {approx = true} : vector<2x16x1xf32> -> vector<2x16x1xf32>
    %253 = vector.broadcast %252 : vector<2x16x1xf32> to vector<2x16x16xf32>
    %254 = arith.mulf %249, %253 : vector<2x16x16xf32>
    "tpu.trace_start"() <{level = 10 : i32, message = "bqk,bkd->bqd"}> : () -> ()
    %cst_112 = arith.constant dense<0.000000e+00> : vector<2x16x8xf32>
    %255 = tpu.matmul %254, %241, %cst_112 {dimension_numbers = #tpu.dot_dimension_numbers<[2], [1], [1], [2], [0, 0, 0, 1, 1, 2], [0], [0]>} : vector<2x16x16xf32>, vector<2x16x8xf32>, vector<2x16x8xf32> -> vector<2x16x8xf32>
    "tpu.trace_stop"() : () -> ()
    %256 = vector.shape_cast %255 : vector<2x16x8xf32> to vector<32x8xf32>
    %257 = vector.extract_strided_slice %195 {offsets = [16, 0], sizes = [8, 32], strides = [1, 1]} : vector<32x32xf32> to vector<8x32xf32>
    %cst_113 = arith.constant dense<0.000000e+00> : vector<32x32xf32>
    %258 = tpu.matmul %256, %257, %cst_113 {dimension_numbers = #tpu.dot_dimension_numbers<[1], [0], [0], [1], [0, 0, 1, 1], [], []>} : vector<32x8xf32>, vector<8x32xf32>, vector<32x32xf32> -> vector<32x32xf32>
    %259 = arith.addf %238, %258 : vector<32x32xf32>
    %260 = vector.extract_strided_slice %193 {offsets = [0, 0, 24], sizes = [2, 16, 8], strides = [1, 1, 1]} : vector<2x16x96xf32> to vector<2x16x8xf32>
    %261 = vector.extract_strided_slice %193 {offsets = [0, 0, 56], sizes = [2, 16, 8], strides = [1, 1, 1]} : vector<2x16x96xf32> to vector<2x16x8xf32>
    %262 = vector.extract_strided_slice %193 {offsets = [0, 0, 88], sizes = [2, 16, 8], strides = [1, 1, 1]} : vector<2x16x96xf32> to vector<2x16x8xf32>
    "tpu.trace_start"() <{level = 10 : i32, message = "bqd,bkd->bqk"}> : () -> ()
    %cst_114 = arith.constant dense<0.000000e+00> : vector<2x16x16xf32>
    %263 = tpu.matmul %260, %261, %cst_114 {dimension_numbers = #tpu.dot_dimension_numbers<[2], [2], [1], [1], [0, 0, 0, 1, 1, 1], [0], [0]>} : vector<2x16x8xf32>, vector<2x16x8xf32>, vector<2x16x16xf32> -> vector<2x16x16xf32>
    "tpu.trace_stop"() : () -> ()
    %cst_115 = arith.constant 0.353553385 : f32
    %264 = vector.broadcast %cst_115 : f32 to vector<2x16x16xf32>
    %265 = arith.mulf %263, %264 : vector<2x16x16xf32>
    %cst_116 = arith.constant dense<0xFF800000> : vector<2x16xf32>
    %266 = vector.multi_reduction <maximumf>, %265, %cst_116 [2] : vector<2x16x16xf32> to vector<2x16xf32>
    %267 = vector.shape_cast %266 : vector<2x16xf32> to vector<2x16x1xf32>
    %268 = vector.broadcast %267 : vector<2x16x1xf32> to vector<2x16x16xf32>
    %269 = arith.subf %265, %268 : vector<2x16x16xf32>
    %270 = math.exp %269 : vector<2x16x16xf32>
    %cst_117 = arith.constant dense<0.000000e+00> : vector<2x16xf32>
    %271 = vector.multi_reduction <add>, %270, %cst_117 [2] : vector<2x16x16xf32> to vector<2x16xf32>
    %272 = vector.shape_cast %271 : vector<2x16xf32> to vector<2x16x1xf32>
    %273 = tpu.reciprocal %272 {approx = true} : vector<2x16x1xf32> -> vector<2x16x1xf32>
    %274 = vector.broadcast %273 : vector<2x16x1xf32> to vector<2x16x16xf32>
    %275 = arith.mulf %270, %274 : vector<2x16x16xf32>
    "tpu.trace_start"() <{level = 10 : i32, message = "bqk,bkd->bqd"}> : () -> ()
    %cst_118 = arith.constant dense<0.000000e+00> : vector<2x16x8xf32>
    %276 = tpu.matmul %275, %262, %cst_118 {dimension_numbers = #tpu.dot_dimension_numbers<[2], [1], [1], [2], [0, 0, 0, 1, 1, 2], [0], [0]>} : vector<2x16x16xf32>, vector<2x16x8xf32>, vector<2x16x8xf32> -> vector<2x16x8xf32>
    "tpu.trace_stop"() : () -> ()
    %277 = vector.shape_cast %276 : vector<2x16x8xf32> to vector<32x8xf32>
    %278 = vector.extract_strided_slice %195 {offsets = [24, 0], sizes = [8, 32], strides = [1, 1]} : vector<32x32xf32> to vector<8x32xf32>
    %cst_119 = arith.constant dense<0.000000e+00> : vector<32x32xf32>
    %279 = tpu.matmul %277, %278, %cst_119 {dimension_numbers = #tpu.dot_dimension_numbers<[1], [0], [0], [1], [0, 0, 1, 1], [], []>} : vector<32x8xf32>, vector<8x32xf32>, vector<32x32xf32> -> vector<32x32xf32>
    %280 = arith.addf %259, %279 : vector<32x32xf32>
    %c1_120 = arith.constant 1 : index
    %c0_121 = arith.constant 0 : index
    %c0_122 = arith.constant 0 : index
    %281 = vector.load %arg7[%c1_120, %c0_121, %c0_122] : memref<2x1x32xf32, #tpu.memory_space<vmem>>, vector<1x1x32xf32>
    %282 = vector.shape_cast %281 : vector<1x1x32xf32> to vector<1x32xf32>
    %283 = vector.broadcast %282 : vector<1x32xf32> to vector<32x32xf32>
    %284 = arith.addf %280, %283 : vector<32x32xf32>
    %285 = arith.addf %185, %284 : vector<32x32xf32>
    %c1_123 = arith.constant 1 : index
    %c0_124 = arith.constant 0 : index
    %c0_125 = arith.constant 0 : index
    %286 = vector.load %arg12[%c1_123, %c0_124, %c0_125] : memref<2x1x32xf32, #tpu.memory_space<vmem>>, vector<1x1x32xf32>
    %287 = vector.shape_cast %286 : vector<1x1x32xf32> to vector<1x32xf32>
    %c1_126 = arith.constant 1 : index
    %c0_127 = arith.constant 0 : index
    %c0_128 = arith.constant 0 : index
    %288 = vector.load %arg13[%c1_126, %c0_127, %c0_128] : memref<2x1x32xf32, #tpu.memory_space<vmem>>, vector<1x1x32xf32>
    %289 = vector.shape_cast %288 : vector<1x1x32xf32> to vector<1x32xf32>
    %cst_129 = arith.constant dense<0.000000e+00> : vector<32xf32>
    %290 = vector.multi_reduction <add>, %285, %cst_129 [1] : vector<32x32xf32> to vector<32xf32>
    %291 = vector.shape_cast %290 : vector<32xf32> to vector<32x1xf32>
    %cst_130 = arith.constant 3.200000e+01 : f32
    %292 = vector.broadcast %cst_130 : f32 to vector<32x1xf32>
    %293 = arith.divf %291, %292 : vector<32x1xf32>
    %294 = vector.broadcast %293 : vector<32x1xf32> to vector<32x32xf32>
    %295 = arith.subf %285, %294 : vector<32x32xf32>
    %296 = arith.mulf %295, %295 : vector<32x32xf32>
    %cst_131 = arith.constant dense<0.000000e+00> : vector<32xf32>
    %297 = vector.multi_reduction <add>, %296, %cst_131 [1] : vector<32x32xf32> to vector<32xf32>
    %298 = vector.shape_cast %297 : vector<32xf32> to vector<32x1xf32>
    %cst_132 = arith.constant 3.200000e+01 : f32
    %299 = vector.broadcast %cst_132 : f32 to vector<32x1xf32>
    %300 = arith.divf %298, %299 : vector<32x1xf32>
    %301 = vector.broadcast %293 : vector<32x1xf32> to vector<32x32xf32>
    %302 = arith.subf %285, %301 : vector<32x32xf32>
    %cst_133 = arith.constant 9.99999974E-6 : f32
    %303 = vector.broadcast %cst_133 : f32 to vector<32x1xf32>
    %304 = arith.addf %300, %303 : vector<32x1xf32>
    %305 = math.rsqrt %304 : vector<32x1xf32>
    %306 = vector.broadcast %305 : vector<32x1xf32> to vector<32x32xf32>
    %307 = arith.mulf %302, %306 : vector<32x32xf32>
    %308 = vector.broadcast %287 : vector<1x32xf32> to vector<32x32xf32>
    %309 = arith.mulf %307, %308 : vector<32x32xf32>
    %310 = vector.broadcast %289 : vector<1x32xf32> to vector<32x32xf32>
    %311 = arith.addf %309, %310 : vector<32x32xf32>
    %c1_134 = arith.constant 1 : index
    %c0_135 = arith.constant 0 : index
    %c0_136 = arith.constant 0 : index
    %312 = vector.load %arg8[%c1_134, %c0_135, %c0_136] : memref<2x32x64xf32, #tpu.memory_space<vmem>>, vector<1x32x64xf32>
    %313 = vector.shape_cast %312 : vector<1x32x64xf32> to vector<32x64xf32>
    %cst_137 = arith.constant dense<0.000000e+00> : vector<32x64xf32>
    %314 = tpu.matmul %311, %313, %cst_137 {dimension_numbers = #tpu.dot_dimension_numbers<[1], [0], [0], [1], [0, 0, 1, 1], [], []>} : vector<32x32xf32>, vector<32x64xf32>, vector<32x64xf32> -> vector<32x64xf32>
    %c1_138 = arith.constant 1 : index
    %c0_139 = arith.constant 0 : index
    %c0_140 = arith.constant 0 : index
    %315 = vector.load %arg9[%c1_138, %c0_139, %c0_140] : memref<2x1x64xf32, #tpu.memory_space<vmem>>, vector<1x1x64xf32>
    %316 = vector.shape_cast %315 : vector<1x1x64xf32> to vector<1x64xf32>
    %317 = vector.broadcast %316 : vector<1x64xf32> to vector<32x64xf32>
    %318 = arith.addf %314, %317 : vector<32x64xf32>
    %cst_141 = arith.constant 0.000000e+00 : f32
    %319 = vector.broadcast %cst_141 : f32 to vector<32x64xf32>
    %320 = arith.maximumf %318, %319 : vector<32x64xf32>
    %c1_142 = arith.constant 1 : index
    %c0_143 = arith.constant 0 : index
    %c0_144 = arith.constant 0 : index
    %321 = vector.load %arg10[%c1_142, %c0_143, %c0_144] : memref<2x64x32xf32, #tpu.memory_space<vmem>>, vector<1x64x32xf32>
    %322 = vector.shape_cast %321 : vector<1x64x32xf32> to vector<64x32xf32>
    %cst_145 = arith.constant dense<0.000000e+00> : vector<32x32xf32>
    %323 = tpu.matmul %320, %322, %cst_145 {dimension_numbers = #tpu.dot_dimension_numbers<[1], [0], [0], [1], [0, 0, 1, 1], [], []>} : vector<32x64xf32>, vector<64x32xf32>, vector<32x32xf32> -> vector<32x32xf32>
    %c1_146 = arith.constant 1 : index
    %c0_147 = arith.constant 0 : index
    %c0_148 = arith.constant 0 : index
    %324 = vector.load %arg11[%c1_146, %c0_147, %c0_148] : memref<2x1x32xf32, #tpu.memory_space<vmem>>, vector<1x1x32xf32>
    %325 = vector.shape_cast %324 : vector<1x1x32xf32> to vector<1x32xf32>
    %326 = vector.broadcast %325 : vector<1x32xf32> to vector<32x32xf32>
    %327 = arith.addf %323, %326 : vector<32x32xf32>
    %328 = arith.addf %311, %327 : vector<32x32xf32>
    %c1_149 = arith.constant 1 : index
    %c0_150 = arith.constant 0 : index
    %c0_151 = arith.constant 0 : index
    %329 = vector.load %arg14[%c1_149, %c0_150, %c0_151] : memref<2x1x32xf32, #tpu.memory_space<vmem>>, vector<1x1x32xf32>
    %330 = vector.shape_cast %329 : vector<1x1x32xf32> to vector<1x32xf32>
    %c1_152 = arith.constant 1 : index
    %c0_153 = arith.constant 0 : index
    %c0_154 = arith.constant 0 : index
    %331 = vector.load %arg15[%c1_152, %c0_153, %c0_154] : memref<2x1x32xf32, #tpu.memory_space<vmem>>, vector<1x1x32xf32>
    %332 = vector.shape_cast %331 : vector<1x1x32xf32> to vector<1x32xf32>
    %cst_155 = arith.constant dense<0.000000e+00> : vector<32xf32>
    %333 = vector.multi_reduction <add>, %328, %cst_155 [1] : vector<32x32xf32> to vector<32xf32>
    %334 = vector.shape_cast %333 : vector<32xf32> to vector<32x1xf32>
    %cst_156 = arith.constant 3.200000e+01 : f32
    %335 = vector.broadcast %cst_156 : f32 to vector<32x1xf32>
    %336 = arith.divf %334, %335 : vector<32x1xf32>
    %337 = vector.broadcast %336 : vector<32x1xf32> to vector<32x32xf32>
    %338 = arith.subf %328, %337 : vector<32x32xf32>
    %339 = arith.mulf %338, %338 : vector<32x32xf32>
    %cst_157 = arith.constant dense<0.000000e+00> : vector<32xf32>
    %340 = vector.multi_reduction <add>, %339, %cst_157 [1] : vector<32x32xf32> to vector<32xf32>
    %341 = vector.shape_cast %340 : vector<32xf32> to vector<32x1xf32>
    %cst_158 = arith.constant 3.200000e+01 : f32
    %342 = vector.broadcast %cst_158 : f32 to vector<32x1xf32>
    %343 = arith.divf %341, %342 : vector<32x1xf32>
    %344 = vector.broadcast %336 : vector<32x1xf32> to vector<32x32xf32>
    %345 = arith.subf %328, %344 : vector<32x32xf32>
    %cst_159 = arith.constant 9.99999974E-6 : f32
    %346 = vector.broadcast %cst_159 : f32 to vector<32x1xf32>
    %347 = arith.addf %343, %346 : vector<32x1xf32>
    %348 = math.rsqrt %347 : vector<32x1xf32>
    %349 = vector.broadcast %348 : vector<32x1xf32> to vector<32x32xf32>
    %350 = arith.mulf %345, %349 : vector<32x32xf32>
    %351 = vector.broadcast %330 : vector<1x32xf32> to vector<32x32xf32>
    %352 = arith.mulf %350, %351 : vector<32x32xf32>
    %353 = vector.broadcast %332 : vector<1x32xf32> to vector<32x32xf32>
    %354 = arith.addf %352, %353 : vector<32x32xf32>
    %355 = vector.shape_cast %354 : vector<32x32xf32> to vector<2x16x32xf32>
    %cst_160 = arith.constant dense<0.000000e+00> : vector<2x32xf32>
    %356 = vector.multi_reduction <add>, %355, %cst_160 [1] : vector<2x16x32xf32> to vector<2x32xf32>
    %cst_161 = arith.constant 1.600000e+01 : f32
    %357 = vector.broadcast %cst_161 : f32 to vector<2x32xf32>
    %358 = arith.divf %356, %357 : vector<2x32xf32>
    %c0_162 = arith.constant 0 : index
    %c0_163 = arith.constant 0 : index
    %359 = vector.load %arg16[%c0_162, %c0_163] : memref<32x16xf32, #tpu.memory_space<vmem>>, vector<32x16xf32>
    %cst_164 = arith.constant dense<0.000000e+00> : vector<2x16xf32>
    %360 = tpu.matmul %358, %359, %cst_164 {dimension_numbers = #tpu.dot_dimension_numbers<[1], [0], [0], [1], [0, 0, 1, 1], [], []>} : vector<2x32xf32>, vector<32x16xf32>, vector<2x16xf32> -> vector<2x16xf32>
    %c0_165 = arith.constant 0 : index
    %c0_166 = arith.constant 0 : index
    %361 = vector.load %arg17[%c0_165, %c0_166] : memref<1x16xf32, #tpu.memory_space<vmem>>, vector<1x16xf32>
    %362 = vector.broadcast %361 : vector<1x16xf32> to vector<2x16xf32>
    %363 = arith.addf %360, %362 : vector<2x16xf32>
    %c0_167 = arith.constant 0 : index
    %c0_168 = arith.constant 0 : index
    %364 = vector.load %arg18[%c0_167, %c0_168] : memref<16x5xf32, #tpu.memory_space<vmem>>, vector<16x5xf32>
    %cst_169 = arith.constant dense<0.000000e+00> : vector<2x5xf32>
    %365 = tpu.matmul %363, %364, %cst_169 {dimension_numbers = #tpu.dot_dimension_numbers<[1], [0], [0], [1], [0, 0, 1, 1], [], []>} : vector<2x16xf32>, vector<16x5xf32>, vector<2x5xf32> -> vector<2x5xf32>
    %c0_170 = arith.constant 0 : index
    %c0_171 = arith.constant 0 : index
    %366 = vector.load %arg19[%c0_170, %c0_171] : memref<1x5xf32, #tpu.memory_space<vmem>>, vector<1x5xf32>
    %367 = vector.broadcast %366 : vector<1x5xf32> to vector<2x5xf32>
    %368 = arith.addf %365, %367 : vector<2x5xf32>
    %c0_172 = arith.constant 0 : index
    %c0_173 = arith.constant 0 : index
    %369 = vector.load %arg20[%c0_172, %c0_173] : memref<2x5xf32, #tpu.memory_space<vmem>>, vector<2x5xf32>
    tpu.vector_store %arg20[%c0_172, %c0_173], %368 {strides = array<i32>} : memref<2x5xf32, #tpu.memory_space<vmem>>, vector<2x5xf32>,
    return
  }
}

</mosaic_0001>

<bundles_post_ra>
// kernel: forward.1
= control target key start
LH: loop header
LB: loop body
LE: loop exit
PB: predicated region body
PF: predicated region fallthrough
CT: control target
= control target key end

     0   :  { %s8549_s0 = inlined_call_operand.vmem [shape: f32[2,128,9], index: 0, kind: input, shape index: {}]   ;;  %s8550_s1 = inlined_call_operand.vmem [shape: f32[9,32], index: 1, kind: input, shape index: {}]   ;;  %s8551_s2 = inlined_call_operand.vmem [shape: f32[1,32], index: 2, kind: input, shape index: {}]   ;;  %s8552_s3 = inlined_call_operand.vmem [shape: f32[1,32], index: 3, kind: input, shape index: {}]   ;;  %s8553_s4 = inlined_call_operand.vmem [shape: f32[2,32,96], index: 4, kind: input, shape index: {}]   ;;  %s8554_s5 = inlined_call_operand.vmem [shape: f32[2,1,96], index: 5, kind: input, shape index: {}]   ;;  %s8555_s6 = inlined_call_operand.vmem [shape: f32[2,32,32], index: 6, kind: input, shape index: {}]   ;;  %s8556_s7 = inlined_call_operand.vmem [shape: f32[2,1,32], index: 7, kind: input, shape index: {}]   ;;  %s8557_s8 = inlined_call_operand.vmem [shape: f32[2,32,64], index: 8, kind: input, shape index: {}]   ;;  %s8558_s9 = inlined_call_operand.vmem [shape: f32[2,1,64], index: 9, kind: input, shape index: {}]   ;;  %s8559_s10 = inlined_call_operand.vmem [shape: f32[2,64,32], index: 10, kind: input, shape index: {}]   ;;  %s8560_s11 = inlined_call_operand.vmem [shape: f32[2,1,32], index: 11, kind: input, shape index: {}]   ;;  %s8561_s12 = inlined_call_operand.vmem [shape: f32[2,1,32], index: 12, kind: input, shape index: {}]   ;;  %s8562_s13 = inlined_call_operand.vmem [shape: f32[2,1,32], index: 13, kind: input, shape index: {}]   ;;  %s8563_s14 = inlined_call_operand.vmem [shape: f32[2,1,32], index: 14, kind: input, shape index: {}]   ;;  %s8564_s15 = inlined_call_operand.vmem [shape: f32[2,1,32], index: 15, kind: input, shape index: {}]   ;;  %s8565_s16 = inlined_call_operand.vmem [shape: f32[32,16], index: 16, kind: input, shape index: {}]   ;;  %s8566_s17 = inlined_call_operand.vmem [shape: f32[1,16], index: 17, kind: input, shape index: {}]   ;;  %s8567_s18 = inlined_call_operand.vmem [shape: f32[16,5], index: 18, kind: input, shape index: {}]   ;;  %s8568_s19 = inlined_call_operand.vmem [shape: f32[1,5], index: 19, kind: input, shape index: {}]   ;;  %s8569_s20 = inlined_call_operand.hbm [shape: f32[2,5], index: 20, kind: output, shape index: {}]  }
   0x1   :  { %8587 = sst [smem:[#allocation5_spill]] %s8549_s0 }
   0x2   :  { %8588 = sst [smem:[#allocation6_spill]] %s8550_s1 }
   0x3   :  { %8589 = sst [smem:[#allocation7_spill]] %s8551_s2 }
   0x4   :  { %8590 = sst [smem:[#allocation8_spill]] %s8552_s3 }
   0x5   :  { %8591 = sst [smem:[#allocation9_spill]] %s8553_s4 }
   0x6   :  { %s8592_s23 = sld [smem:[#allocation6_spill]]  ;;  %vm197_vm0 = vcmask 1040384   ;;  %s8593_s26 = sld [smem:[#allocation5_spill]]  ;;  %vm7428_vm1 = vmmov 1   ;;  %vm100_vm3 = vcmask 72704  }
   0x7   :  { %vm6806_vm2 = vmpackc.low %vm197_vm0, %vm7428_vm1 }
   0xc   :  { %v98_v0 = vld [vmem:[%s8592_s23] sm:$0xff]  ;;  %v99_v1 = vld [vmem:[%s8592_s23 + $0x8] sm:$0x1]  ;;  %v68_v5 = vld [vmem:[%s8593_s26 + $0x10] sm:$0xff] }
   0xd   :  { %v66_v2 = vld [vmem:[%s8593_s26] sm:$0xff]  ;;  %v6805_v3 = vpack.c.bf16 %v99_v1, %v98_v0  ;;  %v67_v4 = vld [vmem:[%s8593_s26 + $0x8] sm:$0xff]  ;;  %v69_v6 = vld [vmem:[%s8593_s26 + $0x18] sm:$0xff] }
   0xe   :  { %6351 = vmatprep.mubr.msk.f32.mxu0 %vm100_vm3, %v66_v2  ;;  %v70_v7 = vld [vmem:[%s8593_s26 + $0x20] sm:$0xff] }
   0xf   :  { %6807 = vmatprep.subr.msk.bf16.mxu0 %vm6806_vm2, %v6805_v3 }
  0x10   :  { %6810 = vmatpush3.bf16.msk.msra.mxu0 %vm6806_vm2, %v6805_v3 }
  0x13   :  { %6352 = vmatmul.mubr.msk.f32.vlgmr.msra.gmra.mrb[0].mxu0 %vm100_vm3, %v67_v4 }
  0x14   :  { %6354 = vmatprep.mubr.msk.f32.mxu0 %vm100_vm3, %v68_v5 }
  0x17   :  { %6355 = vmatmul.mubr.msk.f32.gmra.mrb[2].mxu0 %vm100_vm3, %v69_v6 }
  0x18   :  { %25 = vsyncpa [#allocation3], 0  ;;  %6357 = vmatprep.mubr.msk.f32.mxu0 %vm100_vm3, %v70_v7  ;;  %v71_v8 = vld [vmem:[%s8593_s26 + $0x28] sm:$0xff]  ;;  %v72_v9 = vld [vmem:[%s8593_s26 + $0x30] sm:$0xff]  ;;  %s8594_s22 = sld [smem:[#allocation9_spill]]  ;;  %s8595_s4 = sld [smem:[#allocation7_spill]] }
  0x19   :  { %v73_v10 = vld [vmem:[%s8593_s26 + $0x38] sm:$0xff]  ;;  %v74_v11 = vld [vmem:[%s8593_s26 + $0x40] sm:$0xff]  ;;  %v75_v12 = vld [vmem:[%s8593_s26 + $0x48] sm:$0xff]  ;;  %s8596_s0 = sld [smem:[#allocation8_spill]]  ;;  %vm536_vm4 = vcmask 261120   ;;  %vm720_vm5 = vcmask 64512  }
  0x1a   :  { %v76_v13 = vld [vmem:[%s8593_s26 + $0x50] sm:$0xff]  ;;  %v77_v14 = vld [vmem:[%s8593_s26 + $0x58] sm:$0xff]  ;;  %v78_v15 = vld [vmem:[%s8593_s26 + $0x60] sm:$0xff]  ;;  %s7429_s23 = smov 96   ;;  %vm897_vm7 = vcmask 130048   ;;  %s7430_s24 = smov 64  }
  0x1b   :  { %6358 = vmatmul.mubr.msk.f32.gmra.mrb[4].mxu0 %vm100_vm3, %v71_v8  ;;  %v79_v16 = vld [vmem:[%s8593_s26 + $0x68] sm:$0xff]  ;;  %v80_v17 = vld [vmem:[%s8593_s26 + $0x70] sm:$0xff]  ;;  %v81_v18 = vld [vmem:[%s8593_s26 + $0x78] sm:$0xff]  ;;  %s7431_s2 = smov 88   ;;  %s7432_s25 = smov 120   ;;  %vm2941_vm8 = vcmask 523264  }
  0x1c   :  { %6360 = vmatprep.mubr.msk.f32.mxu0 %vm100_vm3, %v72_v9  ;;  %v82_v19 = vld [vmem:[%s8593_s26 + $0x80] sm:$0xff]  ;;  %v83_v20 = vld [vmem:[%s8593_s26 + $0x88] sm:$0xff]  ;;  %v84_v21 = vld [vmem:[%s8593_s26 + $0x90] sm:$0xff]  ;;  %s8583_s3 = smov 80   ;;  %s8581_s27 = smov 112   ;;  %vm7441_vm9 = vmmov 0  }
  0x1d   :  { %v85_v22 = vld [vmem:[%s8593_s26 + $0x98] sm:$0xff]  ;;  %v86_v23 = vld [vmem:[%s8593_s26 + $0xa0] sm:$0xff]  ;;  %v87_v24 = vld [vmem:[%s8593_s26 + $0xa8] sm:$0xff]  ;;  %s8579_s28 = smov 48   ;;  %s8575_s1 = smov 104   ;;  %vm5674_vm10 = vcmask 1041409  }
  0x1e   :  { %v88_v25 = vld [vmem:[%s8593_s26 + $0xb0] sm:$0xff]  ;;  %v89_v26 = vld [vmem:[%s8593_s26 + $0xb8] sm:$0xff]  ;;  %v90_v27 = vld [vmem:[%s8593_s26 + $0xc0] sm:$0xff]  ;;  %s8604_s21 = smov 104   ;;  %vm5830_vm11 = vcmask 33792  }
  0x1f   :  { %6361 = vmatmul.mubr.msk.f32.gmra.mrb[6].mxu0 %vm100_vm3, %v73_v10  ;;  %v91_v28 = vld [vmem:[%s8593_s26 + $0xc8] sm:$0xff]  ;;  %v92_v29 = vld [vmem:[%s8593_s26 + $0xd0] sm:$0xff]  ;;  %v93_v30 = vld [vmem:[%s8593_s26 + $0xd8] sm:$0xff] }
  0x20   :  { %6363 = vmatprep.mubr.msk.f32.mxu0 %vm100_vm3, %v74_v11  ;;  %v94_v31 = vld [vmem:[%s8593_s26 + $0xe0] sm:$0xff]  ;;  %v95_v32 = vld [vmem:[%s8593_s26 + $0xe8] sm:$0xff]  ;;  %v96_v33 = vld [vmem:[%s8593_s26 + $0xf0] sm:$0xff] }
  0x21   :  { %v97_v34 = vld [vmem:[%s8593_s26 + $0xf8] sm:$0xff]  ;;  %v602_v35 = vld [vmem:[%s8594_s22] sm:$0xff]  ;;  %v603_v36 = vld [vmem:[%s8594_s22 + $0x8] sm:$0xff]  ;;  %s8585_s26 = smov 56  }
  0x22   :  { %v6811_v37 = vpack.c.bf16 %v603_v36, %v602_v35  ;;  %v604_v38 = vld [vmem:[%s8594_s22 + $0x10] sm:$0xff]  ;;  %v605_v39 = vld [vmem:[%s8594_s22 + $0x18] sm:$0xff]  ;;  %v7698_v41 = vld [vmem:[%s8595_s4] ss:$0 sm:$0xff]  ;;  %s8577_s4 = smov 72  }
  0x23   :  { %6364 = vmatmul.mubr.msk.f32.gmra.mrb[8].mxu0 %vm100_vm3, %v75_v12  ;;  %v6815_v40 = vpack.c.bf16 %v605_v39, %v604_v38  ;;  %v7703_v43 = vld [vmem:[%s8596_s0] ss:$0 sm:$0xff]  ;;  %vm7844_vm6 = vmpackc.low %vm720_vm5, %vm720_vm5  ;;  %s8573_s0 = smov 40  }
  0x24   :  { %6366 = vmatprep.mubr.msk.f32.mxu0 %vm100_vm3, %v76_v13  ;;  %6812 = vmatprep.subr.bf16.mxu1 %v6811_v37 }
  0x25   :  { %6814 = vmatpush3.bf16.msra.mxu1 %v6811_v37 }
  0x26   :  { %6816 = vmatprep.subr.bf16.mxu1 %v6815_v40 }
  0x27   :  { %6367 = vmatmul.mubr.msk.f32.gmra.mrb[10].mxu0 %vm100_vm3, %v77_v14 }
  0x28   :  { %6369 = vmatprep.mubr.msk.f32.mxu0 %vm100_vm3, %v78_v15 }
  0x29   :  { %6818 = vmatpush3.bf16.msra.mxu1 %v6815_v40 }
  0x2b   :  { %6370 = vmatmul.mubr.msk.f32.gmra.mrb[12].mxu0 %vm100_vm3, %v79_v16 }
  0x2c   :  { %6372 = vmatprep.mubr.msk.f32.mxu0 %vm100_vm3, %v80_v17 }
  0x2f   :  { %6373 = vmatmul.mubr.msk.f32.gmra.mrb[14].mxu0 %vm100_vm3, %v81_v18 }
  0x30   :  { %6375 = vmatprep.mubr.msk.f32.mxu0 %vm100_vm3, %v82_v19 }
  0x33   :  { %6376 = vmatmul.mubr.msk.f32.gmra.mrb[16].mxu0 %vm100_vm3, %v83_v20 }
  0x34   :  { %6378 = vmatprep.mubr.msk.f32.mxu0 %vm100_vm3, %v84_v21 }
  0x37   :  { %6379 = vmatmul.mubr.msk.f32.gmra.mrb[18].mxu0 %vm100_vm3, %v85_v22 }
  0x38   :  { %6381 = vmatprep.mubr.msk.f32.mxu0 %vm100_vm3, %v86_v23 }
  0x3b   :  { %6382 = vmatmul.mubr.msk.f32.gmra.mrb[20].mxu0 %vm100_vm3, %v87_v24 }
  0x3c   :  { %6384 = vmatprep.mubr.msk.f32.mxu0 %vm100_vm3, %v88_v25 }
  0x3f   :  { %6385 = vmatmul.mubr.msk.f32.gmra.mrb[22].mxu0 %vm100_vm3, %v89_v26 }
  0x40   :  { %6387 = vmatprep.mubr.msk.f32.mxu0 %vm100_vm3, %v90_v27 }
  0x43   :  { %6388 = vmatmul.mubr.msk.f32.gmra.mrb[24].mxu0 %vm100_vm3, %v91_v28 }
  0x44   :  { %6390 = vmatprep.mubr.msk.f32.mxu0 %vm100_vm3, %v92_v29 }
  0x47   :  { %6391 = vmatmul.mubr.msk.f32.gmra.mrb[26].mxu0 %vm100_vm3, %v93_v30 }
  0x48   :  { %6393 = vmatprep.mubr.msk.f32.mxu0 %vm100_vm3, %v94_v31 }
  0x4b   :  { %6394 = vmatmul.mubr.msk.f32.gmra.mrb[28].mxu0 %vm100_vm3, %v95_v32 }
  0x4c   :  { %6396 = vmatprep.mubr.msk.f32.mxu0 %vm100_vm3, %v96_v33 }
  0x4f   :  { %6397 = vmatmul.mubr.msk.f32.gmra.mrb[30].mxu0 %vm100_vm3, %v97_v34 }
  0xe6   :  { %v6353_v42 = vpop.f32.mrb[0].mxu0 }
  0xe7   :  { %v434_v44 = vmul.f32 %v6353_v42, %v7698_v41  ;;  %v267_v45 = vpop.f32.mrb[1].mxu0 }
  0xe8   :  { %v433_v46 = vmul.f32 %v7698_v41, %v267_v45 }
  0xe9   :  { %v473_v47 = vadd.f32 %v7703_v43, %v434_v44 }
  0xea   :  { %v472_v48 = vadd.f32 %v7703_v43, %v433_v46  ;;  %v6356_v49 = vpop.f32.mrb[2].mxu0 }
  0xeb   :  { %v436_v50 = vmul.f32 %v6356_v49, %v7698_v41  ;;  %v277_v51 = vpop.f32.mrb[3].mxu0  ;;  %v505_v53 = vmax.f32 %v473_v47, 0.0 }
  0xec   :  { %v435_v52 = vmul.f32 %v7698_v41, %v277_v51  ;;  %v504_v55 = vmax.f32 %v472_v48, 0.0 }
  0xed   :  { %v475_v54 = vadd.f32 %v7703_v43, %v436_v50  ;;  %v552_v63 = vsel %vm536_vm4, %v505_v53, 0.0 }
  0xee   :  { %v474_v56 = vadd.f32 %v7703_v43, %v435_v52  ;;  %v6359_v57 = vpop.f32.mrb[4].mxu0  ;;  %v537_v2 = vsel %vm536_vm4, %v504_v55, 0.0 }
  0xef   :  { %v507_v58 = vmax.f32 %v475_v54, 0.0  ;;  %v438_v59 = vmul.f32 %v6359_v57, %v7698_v41  ;;  %v287_v60 = vpop.f32.mrb[5].mxu0 }
  0xf0   :  { %v506_v61 = vmax.f32 %v474_v56, 0.0  ;;  %v437_v62 = vmul.f32 %v7698_v41, %v287_v60 }
  0xf1   :  { %v553_v0 = vsel %vm536_vm4, %v507_v58, 0.0  ;;  %v477_v1 = vadd.f32 %v7703_v43, %v438_v59 }
  0xf2   :  { %v554_v3 = vadd.f32 %v553_v0, %v552_v63  ;;  %v538_v4 = vsel %vm536_vm4, %v506_v61, 0.0  ;;  %v476_v5 = vadd.f32 %v7703_v43, %v437_v62  ;;  %v6362_v6 = vpop.f32.mrb[6].mxu0 }
  0xf3   :  { %v539_v7 = vadd.f32 %v538_v4, %v537_v2  ;;  %v509_v8 = vmax.f32 %v477_v1, 0.0  ;;  %v440_v9 = vmul.f32 %v6362_v6, %v7698_v41  ;;  %v297_v10 = vpop.f32.mrb[7].mxu0 }
  0xf4   :  { %v508_v11 = vmax.f32 %v476_v5, 0.0  ;;  %v439_v12 = vmul.f32 %v7698_v41, %v297_v10 }
  0xf5   :  { %v555_v13 = vsel %vm536_vm4, %v509_v8, 0.0  ;;  %v479_v14 = vadd.f32 %v7703_v43, %v440_v9 }
  0xf6   :  { %v556_v15 = vadd.f32 %v555_v13, %v554_v3  ;;  %v540_v16 = vsel %vm536_vm4, %v508_v11, 0.0  ;;  %v478_v17 = vadd.f32 %v7703_v43, %v439_v12  ;;  %v6365_v18 = vpop.f32.mrb[8].mxu0 }
  0xf7   :  { %v541_v19 = vadd.f32 %v540_v16, %v539_v7  ;;  %v511_v20 = vmax.f32 %v479_v14, 0.0  ;;  %v442_v21 = vmul.f32 %v6365_v18, %v7698_v41  ;;  %v307_v22 = vpop.f32.mrb[9].mxu0 }
  0xf8   :  { %v510_v23 = vmax.f32 %v478_v17, 0.0  ;;  %v441_v24 = vmul.f32 %v7698_v41, %v307_v22 }
  0xf9   :  { %v557_v25 = vsel %vm536_vm4, %v511_v20, 0.0  ;;  %v481_v26 = vadd.f32 %v7703_v43, %v442_v21 }
  0xfa   :  { %v558_v27 = vadd.f32 %v557_v25, %v556_v15  ;;  %v542_v28 = vsel %vm536_vm4, %v510_v23, 0.0  ;;  %v480_v29 = vadd.f32 %v7703_v43, %v441_v24  ;;  %v6368_v30 = vpop.f32.mrb[10].mxu0 }
  0xfb   :  { %v543_v31 = vadd.f32 %v542_v28, %v541_v19  ;;  %v513_v32 = vmax.f32 %v481_v26, 0.0  ;;  %v444_v33 = vmul.f32 %v6368_v30, %v7698_v41  ;;  %v317_v34 = vpop.f32.mrb[11].mxu0 }
  0xfc   :  { %v512_v35 = vmax.f32 %v480_v29, 0.0  ;;  %v443_v36 = vmul.f32 %v7698_v41, %v317_v34 }
  0xfd   :  { %v559_v37 = vsel %vm536_vm4, %v513_v32, 0.0  ;;  %v483_v38 = vadd.f32 %v7703_v43, %v444_v33 }
  0xfe   :  { %v560_v39 = vadd.f32 %v559_v37, %v558_v27  ;;  %v544_v40 = vsel %vm536_vm4, %v512_v35, 0.0  ;;  %v482_v42 = vadd.f32 %v7703_v43, %v443_v36  ;;  %v6371_v44 = vpop.f32.mrb[12].mxu0 }
  0xff   :  { %v545_v45 = vadd.f32 %v544_v40, %v543_v31  ;;  %v515_v46 = vmax.f32 %v483_v38, 0.0  ;;  %v446_v47 = vmul.f32 %v6371_v44, %v7698_v41  ;;  %v327_v48 = vpop.f32.mrb[13].mxu0 }
 0x100   :  { %v514_v49 = vmax.f32 %v482_v42, 0.0  ;;  %v445_v50 = vmul.f32 %v7698_v41, %v327_v48 }
 0x101   :  { %v561_v51 = vsel %vm536_vm4, %v515_v46, 0.0  ;;  %v485_v52 = vadd.f32 %v7703_v43, %v446_v47 }
 0x102   :  { %v562_v53 = vadd.f32 %v561_v51, %v560_v39  ;;  %v546_v54 = vsel %vm536_vm4, %v514_v49, 0.0  ;;  %v484_v55 = vadd.f32 %v7703_v43, %v445_v50  ;;  %v6374_v56 = vpop.f32.mrb[14].mxu0 }
 0x103   :  { %v517_v57 = vmax.f32 %v485_v52, 0.0  ;;  %v448_v58 = vmul.f32 %v6374_v56, %v7698_v41  ;;  %v337_v59 = vpop.f32.mrb[15].mxu0  ;;  %v547_v60 = vadd.f32 %v546_v54, %v545_v45 }
 0x104   :  { %v516_v61 = vmax.f32 %v484_v55, 0.0  ;;  %v447_v62 = vmul.f32 %v7698_v41, %v337_v59 }
 0x105   :  { %v563_v63 = vsel %vm536_vm4, %v517_v57, 0.0  ;;  %v487_v0 = vadd.f32 %v7703_v43, %v448_v58 }
 0x106   :  { %v564_v1 = vadd.f32 %v563_v63, %v562_v53  ;;  %v486_v2 = vadd.f32 %v7703_v43, %v447_v62  ;;  %v548_v3 = vsel %vm536_vm4, %v516_v61, 0.0  ;;  %v6377_v4 = vpop.f32.mrb[16].mxu0 }
 0x107   :  { %v519_v5 = vmax.f32 %v487_v0, 0.0  ;;  %v549_v6 = vadd.f32 %v548_v3, %v547_v60  ;;  %v450_v7 = vmul.f32 %v6377_v4, %v7698_v41  ;;  %v347_v8 = vpop.f32.mrb[17].mxu0 }
 0x108   :  { %v518_v9 = vmax.f32 %v486_v2, 0.0  ;;  %v449_v10 = vmul.f32 %v7698_v41, %v347_v8 }
 0x109   :  { %v565_v11 = vsel %vm536_vm4, %v519_v5, 0.0  ;;  %v489_v12 = vadd.f32 %v7703_v43, %v450_v7 }
 0x10a   :  { %v566_v13 = vadd.f32 %v565_v11, %v564_v1  ;;  %v550_v14 = vsel %vm536_vm4, %v518_v9, 0.0  ;;  %v488_v15 = vadd.f32 %v7703_v43, %v449_v10  ;;  %v6380_v16 = vpop.f32.mrb[18].mxu0 }
 0x10b   :  { %v551_v17 = vadd.f32 %v550_v14, %v549_v6  ;;  %v521_v18 = vmax.f32 %v489_v12, 0.0  ;;  %v452_v19 = vmul.f32 %v6380_v16, %v7698_v41  ;;  %v357_v20 = vpop.f32.mrb[19].mxu0 }
 0x10c   :  { %v520_v21 = vmax.f32 %v488_v15, 0.0  ;;  %v451_v22 = vmul.f32 %v7698_v41, %v357_v20  ;;  %v7762_v25 = vmul.f32 0.125, %v566_v13 }
 0x10d   :  { %v7759_v23 = vmul.f32 0.125, %v551_v17  ;;  %v491_v24 = vadd.f32 %v7703_v43, %v452_v19  ;;  %v582_v28 = vsel %vm536_vm4, %v521_v18, 0.0 }
 0x10e   :  { %v490_v26 = vadd.f32 %v7703_v43, %v451_v22  ;;  %v6383_v27 = vpop.f32.mrb[20].mxu0  ;;  %v567_v32 = vsel %vm536_vm4, %v520_v21, 0.0 }
 0x10f   :  { %6407 = vmatprep.mubr.msk.f32.mxu1 %vm536_vm4, %v7759_v23  ;;  %v523_v29 = vmax.f32 %v491_v24, 0.0  ;;  %v454_v30 = vmul.f32 %v6383_v27, %v7698_v41  ;;  %v367_v31 = vpop.f32.mrb[21].mxu0 }
 0x110   :  { %6408 = vmatmul.mubr.msk.f32.vlgmr.msra.gmra.mrb[0].mxu1 %vm536_vm4, %v7762_v25  ;;  %v522_v33 = vmax.f32 %v490_v26, 0.0  ;;  %v453_v34 = vmul.f32 %v7698_v41, %v367_v31 }
 0x111   :  { %v583_v35 = vsel %vm536_vm4, %v523_v29, 0.0  ;;  %v493_v36 = vadd.f32 %v7703_v43, %v454_v30 }
 0x112   :  { %v584_v37 = vadd.f32 %v583_v35, %v582_v28  ;;  %v568_v38 = vsel %vm536_vm4, %v522_v33, 0.0  ;;  %v492_v39 = vadd.f32 %v7703_v43, %v453_v34  ;;  %v6386_v40 = vpop.f32.mrb[22].mxu0 }
 0x113   :  { %v569_v42 = vadd.f32 %v568_v38, %v567_v32  ;;  %v525_v44 = vmax.f32 %v493_v36, 0.0  ;;  %v456_v45 = vmul.f32 %v6386_v40, %v7698_v41  ;;  %v377_v46 = vpop.f32.mrb[23].mxu0 }
 0x114   :  { %v524_v47 = vmax.f32 %v492_v39, 0.0  ;;  %v455_v48 = vmul.f32 %v7698_v41, %v377_v46 }
 0x115   :  { %v585_v49 = vsel %vm536_vm4, %v525_v44, 0.0  ;;  %v495_v50 = vadd.f32 %v7703_v43, %v456_v45 }
 0x116   :  { %v586_v51 = vadd.f32 %v585_v49, %v584_v37  ;;  %v570_v52 = vsel %vm536_vm4, %v524_v47, 0.0  ;;  %v494_v53 = vadd.f32 %v7703_v43, %v455_v48  ;;  %v6389_v54 = vpop.f32.mrb[24].mxu0 }
 0x117   :  { %v571_v55 = vadd.f32 %v570_v52, %v569_v42  ;;  %v527_v56 = vmax.f32 %v495_v50, 0.0  ;;  %v458_v57 = vmul.f32 %v6389_v54, %v7698_v41  ;;  %v387_v58 = vpop.f32.mrb[25].mxu0 }
 0x118   :  { %v526_v59 = vmax.f32 %v494_v53, 0.0  ;;  %v457_v60 = vmul.f32 %v7698_v41, %v387_v58 }
 0x119   :  { %v587_v61 = vsel %vm536_vm4, %v527_v56, 0.0  ;;  %v497_v62 = vadd.f32 %v7703_v43, %v458_v57 }
 0x11a   :  { %v588_v63 = vadd.f32 %v587_v61, %v586_v51  ;;  %v572_v0 = vsel %vm536_vm4, %v526_v59, 0.0  ;;  %v496_v1 = vadd.f32 %v7703_v43, %v457_v60  ;;  %v6392_v2 = vpop.f32.mrb[26].mxu0 }
 0x11b   :  { %v573_v3 = vadd.f32 %v572_v0, %v571_v55  ;;  %v529_v4 = vmax.f32 %v497_v62, 0.0  ;;  %v460_v5 = vmul.f32 %v6392_v2, %v7698_v41  ;;  %v397_v6 = vpop.f32.mrb[27].mxu0 }
 0x11c   :  { %v528_v7 = vmax.f32 %v496_v1, 0.0  ;;  %v459_v8 = vmul.f32 %v7698_v41, %v397_v6 }
 0x11d   :  { %v589_v9 = vsel %vm536_vm4, %v529_v4, 0.0  ;;  %v499_v10 = vadd.f32 %v7703_v43, %v460_v5 }
 0x11e   :  { %v590_v11 = vadd.f32 %v589_v9, %v588_v63  ;;  %v574_v12 = vsel %vm536_vm4, %v528_v7, 0.0  ;;  %v498_v13 = vadd.f32 %v7703_v43, %v459_v8  ;;  %v6395_v14 = vpop.f32.mrb[28].mxu0 }
 0x11f   :  { %v575_v15 = vadd.f32 %v574_v12, %v573_v3  ;;  %v531_v16 = vmax.f32 %v499_v10, 0.0  ;;  %v462_v17 = vmul.f32 %v6395_v14, %v7698_v41  ;;  %v407_v18 = vpop.f32.mrb[29].mxu0 }
 0x120   :  { %v530_v19 = vmax.f32 %v498_v13, 0.0  ;;  %v461_v20 = vmul.f32 %v7698_v41, %v407_v18 }
 0x121   :  { %v591_v21 = vsel %vm536_vm4, %v531_v16, 0.0  ;;  %v501_v22 = vadd.f32 %v7703_v43, %v462_v17 }
 0x122   :  { %v592_v24 = vadd.f32 %v591_v21, %v590_v11  ;;  %v576_v26 = vsel %vm536_vm4, %v530_v19, 0.0  ;;  %v500_v27 = vadd.f32 %v7703_v43, %v461_v20  ;;  %v6398_v28 = vpop.f32.mrb[30].mxu0 }
 0x123   :  { %v577_v29 = vadd.f32 %v576_v26, %v575_v15  ;;  %v533_v30 = vmax.f32 %v501_v22, 0.0  ;;  %v464_v31 = vmul.f32 %v6398_v28, %v7698_v41  ;;  %v417_v32 = vpop.f32.mrb[31].mxu0 }
 0x124   :  { %v532_v33 = vmax.f32 %v500_v27, 0.0  ;;  %v463_v34 = vmul.f32 %v7698_v41, %v417_v32 }
 0x125   :  { %v593_v35 = vsel %vm536_vm4, %v533_v30, 0.0  ;;  %v503_v36 = vadd.f32 %v7703_v43, %v464_v31 }
 0x126   :  { %v594_v37 = vadd.f32 %v593_v35, %v592_v24  ;;  %v578_v38 = vsel %vm536_vm4, %v532_v33, 0.0  ;;  %v502_v39 = vadd.f32 %v7703_v43, %v463_v34  ;;  %v5881_v43 = vld [vmem:[%s8554_s5] ss:$0 sm:$0xff] }
 0x127   :  { %v579_v40 = vadd.f32 %v578_v38, %v577_v29  ;;  %v535_v42 = vmax.f32 %v503_v36, 0.0 }
 0x128   :  { %v534_v44 = vmax.f32 %v502_v39, 0.0 }
 0x129   :  { %v595_v45 = vsel %vm536_vm4, %v535_v42, 0.0 }
 0x12a   :  { %v596_v46 = vadd.f32 %v595_v45, %v594_v37  ;;  %v580_v47 = vsel %vm536_vm4, %v534_v44, 0.0 }
 0x12b   :  { %v581_v48 = vadd.f32 %v580_v47, %v579_v40 }
 0x12c   :  { %v7809_v49 = vmul.f32 0.125, %v596_v46 }
 0x12d   :  { %v7811_v41 = vmul.f32 0.125, %v581_v48 }
 0x12f   :  { %6410 = vmatprep.mubr.msk.f32.mxu1 %vm536_vm4, %v7811_v41 }
 0x130   :  { %6411 = vmatmul.mubr.msk.f32.gmra.mrb[2].mxu1 %vm536_vm4, %v7809_v49 }
 0x1e3   :  { %v6409_v50 = vpop.f32.mrb[0].mxu1 }
 0x1e4   :  { %v7820_v51 = vadd.f32 %v6409_v50, %v5881_v43  ;;  %v691_v52 = vpop.f32.mrb[1].mxu1 }
 0x1e5   :  { %v7822_v53 = vadd.f32 %v5881_v43, %v691_v52 }
 0x1e7   :  { %6417 = vmatprep.mubr.msk.f32.mxu1 %vm720_vm5, %v7822_v53  ;;  %v7828_v54 = vpack.i.bf16 %v7820_v51, %v7822_v53 }
 0x1e9   :  { %7085 = vrot.lane.b32.xlu0 %v7828_v54, %s7429_s23 }
 0x203   :  { %v6412_v55 = vpop.f32.mrb[2].mxu1 }
 0x204   :  { %v7832_v56 = vadd.f32 %v6412_v55, %v5881_v43  ;;  %v701_v57 = vpop.f32.mrb[3].mxu1 }
 0x205   :  { %v7834_v58 = vadd.f32 %v5881_v43, %v701_v57 }
 0x207   :  { %v7838_v59 = vpack.i.bf16 %v7832_v56, %v7834_v58 }
 0x209   :  { %7090 = vrot.lane.b32.xlu0 %v7838_v59, %s7429_s23 }
 0x25b   :  { %v7086_v60 = vpop.permute.xlu0 %7085 }
 0x25c   :  { %v7088_v61 = vunpack.i.h.bf16 %v7086_v60  ;;  %v7087_v62 = vunpack.i.l.bf16 %v7086_v60 }
 0x25e   :  { %v6819_v0 = vpack.c.bf16 %v7088_v61, %v7087_v62 }
 0x260   :  { %6821 = vmatprep.subr.msk.bf16.mxu1 %vm7844_vm6, %v6819_v0 }
 0x261   :  { %6824 = vmatpush3.bf16.xpose.msk.msra.mxu1 %vm7844_vm6, %v6819_v0 }
 0x268   :  { %6418 = vmatmul.mubr.msk.f32.vlgmr.msra.gmra.mrb[4].mxu1 %vm720_vm5, %v7820_v51 }
 0x269   :  { %6424 = vmatprep.mubr.msk.f32.mxu1 %vm720_vm5, %v7834_v58 }
 0x27b   :  { %v7091_v1 = vpop.permute.xlu0 %7090 }
 0x27c   :  { %v7093_v2 = vunpack.i.h.bf16 %v7091_v1  ;;  %v7092_v3 = vunpack.i.l.bf16 %v7091_v1 }
 0x27e   :  { %v6825_v4 = vpack.c.bf16 %v7093_v2, %v7092_v3 }
 0x280   :  { %6827 = vmatprep.subr.msk.bf16.mxu1 %vm7844_vm6, %v6825_v4 }
 0x281   :  { %6830 = vmatpush3.bf16.xpose.msk.msra.mxu1 %vm7844_vm6, %v6825_v4 }
 0x288   :  { %6425 = vmatmul.mubr.msk.f32.vlgmr.msra.gmra.mrb[6].mxu1 %vm720_vm5, %v7832_v56 }
 0x33b   :  { %v6419_v5 = vpop.f32.mrb[4].mxu1 }
 0x33c   :  { %v894_v6 = vmul.f32 0.35355338, %v6419_v5  ;;  %v795_v7 = vpop.f32.mrb[5].mxu1 }
 0x33d   :  { %v893_v8 = vmul.f32 0.35355338, %v795_v7 }
 0x33e   :  { %v901_v9 = vsel %vm897_vm7, %v894_v6, -inf }
 0x33f   :  { %902 = vmax.xlane.f32.xlu1 %v901_v9  ;;  %v898_v10 = vsel %vm897_vm7, %v893_v8, -inf }
 0x343   :  { %899 = vmax.xlane.f32.xlu1 %v898_v10 }
 0x35b   :  { %v6426_v11 = vpop.f32.mrb[6].mxu1 }
 0x35c   :  { %v896_v12 = vmul.f32 0.35355338, %v6426_v11  ;;  %v884_v13 = vpop.f32.mrb[7].mxu1 }
 0x35d   :  { %v895_v14 = vmul.f32 0.35355338, %v884_v13 }
 0x35e   :  { %v907_v15 = vsel %vm897_vm7, %v896_v12, -inf }
 0x35f   :  { %908 = vmax.xlane.f32.xlu1 %v907_v15  ;;  %v904_v16 = vsel %vm897_vm7, %v895_v14, -inf }
 0x360   :  { %905 = vmax.xlane.f32.xlu0 %v904_v16 }
 0x370   :  { %7095 = vrot.lane.b32.xlu1 %v7828_v54, %s7430_s24 }
 0x374   :  { %7105 = vrot.lane.b32.xlu1 %v7828_v54, %s7431_s2 }
 0x376   :  { %7100 = vrot.lane.b32.xlu0 %v7838_v59, %s7430_s24 }
 0x378   :  { %7110 = vrot.lane.b32.xlu1 %v7838_v59, %s7431_s2 }
 0x37a   :  { %1207 = vrot.lane.b32.xlu0 %v7834_v58, %s7432_s25 }
 0x37e   :  { %7115 = vrot.lane.b32.xlu0 %v7828_v54, %s8583_s3 }
 0x382   :  { %1714 = vrot.lane.b32.xlu0 %v7822_v53, %s8581_s27 }
 0x386   :  { %1805 = vrot.lane.b32.xlu0 %v7834_v58, %s8581_s27 }
 0x3cc   :  { %v903_v17 = vpop.xlane.xlu1 %902 }
 0x3cd   :  { %v911_v18 = vsub.f32 %v894_v6, %v903_v17 }
 0x3cf   :  { %v916_v19 = vmul.f32 1.442695, %v911_v18 }
 0x3d0   :  { %v900_v20 = vpop.xlane.xlu1 %899 }
 0x3d1   :  { %7244 = vpow2.f32 %v916_v19  ;;  %v910_v21 = vsub.f32 %v893_v8, %v900_v20 }
 0x3d3   :  { %v914_v22 = vmul.f32 1.442695, %v910_v21 }
 0x3d5   :  { %7246 = vpow2.f32 %v914_v22 }
 0x3db   :  { %v7245_v24 = vpop.eup %7244 }
 0x3dc   :  { %v925_v26 = vsel %vm897_vm7, %v7245_v24, 0.0 }
 0x3dd   :  { %926 = vadd.xlane.f32.xlu1 %v925_v26 }
 0x3df   :  { %v7247_v27 = vpop.eup %7246 }
 0x3e0   :  { %v922_v28 = vsel %vm897_vm7, %v7247_v27, 0.0 }
 0x3e1   :  { %923 = vadd.xlane.f32.xlu1 %v922_v28 }
 0x3ec   :  { %v909_v29 = vpop.xlane.xlu1 %908 }
 0x3ed   :  { %v906_v30 = vpop.xlane.xlu0 %905  ;;  %v913_v47 = vsub.f32 %v896_v12, %v909_v29 }
 0x3ee   :  { %v912_v43 = vsub.f32 %v895_v14, %v906_v30 }
 0x3ef   :  { %v920_v48 = vmul.f32 1.442695, %v913_v47 }
 0x3f0   :  { %v7096_v31 = vpop.permute.xlu1 %7095  ;;  %v918_v50 = vmul.f32 1.442695, %v912_v43 }
 0x3f1   :  { %v7098_v32 = vunpack.i.h.bf16 %v7096_v31  ;;  %v7097_v33 = vunpack.i.l.bf16 %v7096_v31  ;;  %v7101_v34 = vpop.permute.xlu0 %7100  ;;  %7248 = vpow2.f32 %v920_v48 }
 0x3f2   :  { %v7103_v35 = vunpack.i.h.bf16 %v7101_v34  ;;  %v7102_v36 = vunpack.i.l.bf16 %v7101_v34  ;;  %1116 = vrot.lane.b32.xlu1 %v7822_v53, %s7432_s25  ;;  %7250 = vpow2.f32 %v918_v50 }
 0x3f3   :  { %v6831_v37 = vpack.c.bf16 %v7098_v32, %v7097_v33 }
 0x3f4   :  { %v6835_v38 = vpack.c.bf16 %v7103_v35, %v7102_v36  ;;  %v7106_v61 = vpop.permute.xlu1 %7105 }
 0x3f5   :  { %6832 = vmatprep.subr.bf16.mxu1 %v6831_v37  ;;  %v7886_v39 = vpop.permute.xlu0 %1207  ;;  %v7108_v4 = vunpack.i.h.bf16 %v7106_v61  ;;  %v7107_v5 = vunpack.i.l.bf16 %v7106_v61 }
 0x3f6   :  { %6834 = vmatpush3.bf16.msra.mxu1 %v6831_v37 }
 0x3f7   :  { %6836 = vmatprep.subr.bf16.mxu1 %v6835_v38  ;;  %v6839_v8 = vpack.c.bf16 %v7108_v4, %v7107_v5 }
 0x3f8   :  { %v7111_v62 = vpop.permute.xlu1 %7110 }
 0x3f9   :  { %v7116_v40 = vpop.permute.xlu0 %7115  ;;  %v7113_v16 = vunpack.i.h.bf16 %v7111_v62  ;;  %v7112_v17 = vunpack.i.l.bf16 %v7111_v62 }
 0x3fa   :  { %v7118_v42 = vunpack.i.h.bf16 %v7116_v40  ;;  %v7117_v44 = vunpack.i.l.bf16 %v7116_v40 }
 0x3fb   :  { %v7249_v52 = vpop.eup %7248 }
 0x3fc   :  { %v6859_v45 = vpack.c.bf16 %v7118_v42, %v7117_v44  ;;  %v931_v55 = vsel %vm897_vm7, %v7249_v52, 0.0  ;;  %v7251_v57 = vpop.eup %7250 }
 0x3fd   :  { %v1715_v46 = vpop.permute.xlu0 %1714  ;;  %v928_v60 = vsel %vm897_vm7, %v7251_v57, 0.0 }
 0x3fe   :  { %6861 = vmatprep.subr.msk.bf16.mxu0 %vm7844_vm6, %v6859_v45  ;;  %6489 = vmatprep.mubr.msk.f32.mxu0 %vm720_vm5, %v1715_v46 }
 0x3ff   :  { %6864 = vmatpush3.bf16.xpose.msk.msra.mxu0 %vm7844_vm6, %v6859_v45 }
 0x401   :  { %v1806_v28 = vpop.permute.xlu0 %1805 }
 0x416   :  { %932 = vadd.xlane.f32.xlu1 %v931_v55 }
 0x41a   :  { %929 = vadd.xlane.f32.xlu1 %v928_v60 }
 0x42b   :  { %1118 = vrot.lane.b32.xlu1 %v7820_v51, %s7432_s25 }
 0x42f   :  { %1209 = vrot.lane.b32.xlu1 %v7832_v56, %s7432_s25 }
 0x433   :  { %7120 = vrot.lane.b32.xlu1 %v7838_v59, %s8583_s3 }
 0x437   :  { %1716 = vrot.lane.b32.xlu1 %v7820_v51, %s8581_s27 }
 0x43b   :  { %1807 = vrot.lane.b32.xlu1 %v7832_v56, %s8581_s27 }
 0x46a   :  { %v927_v0 = vpop.xlane.xlu1 %926 }
 0x46b   :  { %7252 = vrcp.f32 %v927_v0 }
 0x46e   :  { %v924_v1 = vpop.xlane.xlu1 %923 }
 0x46f   :  { %7254 = vrcp.f32 %v924_v1 }
 0x472   :  { %v1117_v9 = vpop.permute.xlu1 %1116 }
 0x475   :  { %v7253_v2 = vpop.eup %7252 }
 0x476   :  { %v939_v7 = vmul.f32 %v7253_v2, %v7245_v24  ;;  %v6845_v24 = vpack.c.bf16 %v7113_v16, %v7112_v17 }
 0x479   :  { %v7255_v3 = vpop.eup %7254 }
 0x47a   :  { %v938_v6 = vmul.f32 %v7255_v3, %v7247_v27 }
 0x47c   :  { %6431 = vmatprep.mubr.msk.f32.mxu1 %vm897_vm7, %v938_v6 }
 0x47d   :  { %6432 = vmatmul.mubr.msk.f32.vlgmr.msra.gmra.mrb[8].mxu1 %vm897_vm7, %v939_v7 }
 0x47e   :  { %6838 = vmatpush3.bf16.msra.mxu1 %v6835_v38 }
 0x47f   :  { %6841 = vmatprep.subr.msk.bf16.mxu1 %vm7844_vm6, %v6839_v8 }
 0x4a3   :  { %v933_v10 = vpop.xlane.xlu1 %932 }
 0x4a4   :  { %7256 = vrcp.f32 %v933_v10 }
 0x4a7   :  { %v930_v11 = vpop.xlane.xlu1 %929 }
 0x4a8   :  { %7258 = vrcp.f32 %v930_v11 }
 0x4ab   :  { %v1119_v12 = vpop.permute.xlu1 %1118 }
 0x4ae   :  { %v7257_v14 = vpop.eup %7256 }
 0x4af   :  { %v1210_v13 = vpop.permute.xlu1 %1209  ;;  %v941_v22 = vmul.f32 %v7257_v14, %v7249_v52 }
 0x4b2   :  { %v7259_v15 = vpop.eup %7258 }
 0x4b3   :  { %v7121_v18 = vpop.permute.xlu1 %7120  ;;  %v940_v19 = vmul.f32 %v7259_v15, %v7251_v57 }
 0x4b4   :  { %v7123_v20 = vunpack.i.h.bf16 %v7121_v18  ;;  %v7122_v21 = vunpack.i.l.bf16 %v7121_v18 }
 0x4b5   :  { %6438 = vmatprep.mubr.msk.f32.mxu1 %vm897_vm7, %v940_v19 }
 0x4b6   :  { %v6865_v26 = vpack.c.bf16 %v7123_v20, %v7122_v21  ;;  %6439 = vmatmul.mubr.msk.f32.vlgmr.msra.gmra.mrb[10].mxu1 %vm897_vm7, %v941_v22 }
 0x4b7   :  { %6844 = vmatpush3.bf16.xpose.msk.msra.mxu1 %vm7844_vm6, %v6839_v8  ;;  %v1717_v27 = vpop.permute.xlu1 %1716  ;;  %6445 = vmatprep.mubr.msk.f32.mxu1 %vm720_vm5, %v1117_v9 }
 0x4b8   :  { %6847 = vmatprep.subr.msk.bf16.mxu1 %vm7844_vm6, %v6845_v24  ;;  %6490 = vmatmul.mubr.msk.f32.vlgmr.msra.gmra.mrb[32].mxu0 %vm720_vm5, %v1717_v27 }
 0x4b9   :  { %6867 = vmatprep.subr.msk.bf16.mxu0 %vm7844_vm6, %v6865_v26  ;;  %6496 = vmatprep.mubr.msk.f32.mxu0 %vm720_vm5, %v1806_v28 }
 0x4ba   :  { %6870 = vmatpush3.bf16.xpose.msk.msra.mxu0 %vm7844_vm6, %v6865_v26 }
 0x4bb   :  { %v1808_v29 = vpop.permute.xlu1 %1807 }
 0x4be   :  { %6446 = vmatmul.mubr.msk.f32.vlgmr.msra.gmra.mrb[12].mxu1 %vm720_vm5, %v1119_v12 }
 0x4bf   :  { %6850 = vmatpush3.bf16.xpose.msk.msra.mxu1 %vm7844_vm6, %v6845_v24  ;;  %6452 = vmatprep.mubr.msk.f32.mxu1 %vm720_vm5, %v7886_v39 }
 0x4c1   :  { %6497 = vmatmul.mubr.msk.f32.vlgmr.msra.gmra.mrb[34].mxu0 %vm720_vm5, %v1808_v29 }
 0x4c6   :  { %6453 = vmatmul.mubr.msk.f32.vlgmr.msra.gmra.mrb[14].mxu1 %vm720_vm5, %v1210_v13 }
 0x550   :  { %v7929_v30 = vpop.f32.mrb[8].mxu1 }
 0x551   :  { %v7931_v31 = vpop.f32.mrb[9].mxu1 }
 0x589   :  { %v7933_v32 = vpop.f32.mrb[10].mxu1 }
 0x58a   :  { %v7935_v33 = vpop.f32.mrb[11].mxu1 }
 0x58b   :  { %v6491_v34 = vpop.f32.mrb[32].mxu0 }
 0x58c   :  { %v1796_v35 = vpop.f32.mrb[33].mxu0  ;;  %v1897_v16 = vmul.f32 0.35355338, %v6491_v34 }
 0x58d   :  { %v1896_v15 = vmul.f32 0.35355338, %v1796_v35 }
 0x58e   :  { %v1903_v21 = vsel %vm897_vm7, %v1897_v16, -inf }
 0x58f   :  { %v1900_v18 = vsel %vm897_vm7, %v1896_v15, -inf }
 0x591   :  { %v6447_v36 = vpop.f32.mrb[12].mxu1 }
 0x592   :  { %v1299_v37 = vmul.f32 0.35355338, %v6447_v36  ;;  %v1198_v38 = vpop.f32.mrb[13].mxu1 }
 0x593   :  { %v1298_v40 = vmul.f32 0.35355338, %v1198_v38 }
 0x594   :  { %v6498_v39 = vpop.f32.mrb[34].mxu0  ;;  %v1305_v42 = vsel %vm897_vm7, %v1299_v37, -inf }
 0x595   :  { %v1887_v44 = vpop.f32.mrb[35].mxu0  ;;  %1306 = vmax.xlane.f32.xlu1 %v1305_v42  ;;  %v1302_v45 = vsel %vm897_vm7, %v1298_v40, -inf  ;;  %v1899_v19 = vmul.f32 0.35355338, %v6498_v39 }
 0x596   :  { %1303 = vmax.xlane.f32.xlu0 %v1302_v45  ;;  %v1898_v17 = vmul.f32 0.35355338, %v1887_v44 }
 0x597   :  { %v1909_v22 = vsel %vm897_vm7, %v1899_v19, -inf }
 0x598   :  { %v1906_v20 = vsel %vm897_vm7, %v1898_v17, -inf }
 0x599   :  { %v6454_v46 = vpop.f32.mrb[14].mxu1 }
 0x59a   :  { %v1289_v47 = vpop.f32.mrb[15].mxu1  ;;  %v1301_v43 = vmul.f32 0.35355338, %v6454_v46 }
 0x59b   :  { %v1300_v48 = vmul.f32 0.35355338, %v1289_v47 }
 0x59c   :  { %v1311_v52 = vsel %vm897_vm7, %v1301_v43, -inf }
 0x59d   :  { %v1308_v50 = vsel %vm897_vm7, %v1300_v48, -inf }
 0x59e   :  { %1309 = vmax.xlane.f32.xlu0 %v1308_v50 }
 0x5a2   :  { %1312 = vmax.xlane.f32.xlu0 %v1311_v52 }
 0x622   :  { %v1307_v55 = vpop.xlane.xlu1 %1306 }
 0x623   :  { %v1315_v57 = vsub.f32 %v1299_v37, %v1307_v55  ;;  %v1304_v60 = vpop.xlane.xlu0 %1303 }
 0x624   :  { %v1314_v61 = vsub.f32 %v1298_v40, %v1304_v60 }
 0x625   :  { %v1320_v62 = vmul.f32 1.442695, %v1315_v57 }
 0x626   :  { %v1318_v0 = vmul.f32 1.442695, %v1314_v61 }
 0x627   :  { %7260 = vpow2.f32 %v1320_v62 }
 0x628   :  { %7262 = vpow2.f32 %v1318_v0 }
 0x62b   :  { %v1310_v1 = vpop.xlane.xlu0 %1309 }
 0x62c   :  { %v1316_v2 = vsub.f32 %v1300_v48, %v1310_v1 }
 0x62e   :  { %v1322_v3 = vmul.f32 1.442695, %v1316_v2 }
 0x62f   :  { %v1313_v4 = vpop.xlane.xlu0 %1312 }
 0x630   :  { %7264 = vpow2.f32 %v1322_v3  ;;  %v1317_v5 = vsub.f32 %v1301_v43, %v1313_v4 }
 0x631   :  { %v7261_v6 = vpop.eup %7260 }
 0x632   :  { %v7263_v7 = vpop.eup %7262  ;;  %v1324_v8 = vmul.f32 1.442695, %v1317_v5  ;;  %v1329_v9 = vsel %vm897_vm7, %v7261_v6, 0.0 }
 0x633   :  { %1330 = vadd.xlane.f32.xlu0 %v1329_v9  ;;  %v1326_v10 = vsel %vm897_vm7, %v7263_v7, 0.0 }
 0x634   :  { %7266 = vpow2.f32 %v1324_v8  ;;  %1327 = vadd.xlane.f32.xlu1 %v1326_v10 }
 0x63a   :  { %v7265_v11 = vpop.eup %7264 }
 0x63b   :  { %v1332_v12 = vsel %vm897_vm7, %v7265_v11, 0.0 }
 0x63c   :  { %1333 = vadd.xlane.f32.xlu1 %v1332_v12 }
 0x63e   :  { %v7267_v13 = vpop.eup %7266 }
 0x63f   :  { %v1335_v14 = vsel %vm897_vm7, %v7267_v13, 0.0 }
 0x640   :  { %1336 = vadd.xlane.f32.xlu0 %v1335_v14  ;;  %v711_v14 = vld [vmem:[%s8555_s6 + $0x8] sm:$0xff] }
 0x64d   :  { %7125 = vrot.lane.b32.xlu1 %v7828_v54, %s8585_s26 }
 0x656   :  { %7130 = vrot.lane.b32.xlu0 %v7838_v59, %s8585_s26  ;;  %s8605_s26 = smov 40  }
 0x671   :  { %1901 = vmax.xlane.f32.xlu1 %v1900_v18 }
 0x675   :  { %1907 = vmax.xlane.f32.xlu1 %v1906_v20  ;;  %1904 = vmax.xlane.f32.xlu0 %v1903_v21 }
 0x679   :  { %1910 = vmax.xlane.f32.xlu0 %v1909_v22 }
 0x6c0   :  { %v1331_v26 = vpop.xlane.xlu0 %1330 }
 0x6c1   :  { %v1328_v24 = vpop.xlane.xlu1 %1327 }
 0x6c2   :  { %7268 = vrcp.f32 %v1328_v24 }
 0x6c3   :  { %7270 = vrcp.f32 %v1331_v26 }
 0x6c9   :  { %v1334_v27 = vpop.xlane.xlu1 %1333 }
 0x6ca   :  { %7272 = vrcp.f32 %v1334_v27 }
 0x6cc   :  { %v7269_v28 = vpop.eup %7268 }
 0x6cd   :  { %v7126_v29 = vpop.permute.xlu1 %7125  ;;  %v1337_v34 = vpop.xlane.xlu0 %1336  ;;  %v1342_v35 = vmul.f32 %v7269_v28, %v7263_v7 }
 0x6ce   :  { %v7128_v36 = vunpack.i.h.bf16 %v7126_v29  ;;  %v7127_v37 = vunpack.i.l.bf16 %v7126_v29  ;;  %7274 = vrcp.f32 %v1337_v34  ;;  %v7271_v40 = vpop.eup %7270 }
 0x6cf   :  { %6459 = vmatprep.mubr.msk.f32.mxu1 %vm897_vm7, %v1342_v35  ;;  %v1343_v46 = vmul.f32 %v7271_v40, %v7261_v6 }
 0x6d0   :  { %v6851_v38 = vpack.c.bf16 %v7128_v36, %v7127_v37 }
 0x6d1   :  { %v7131_v39 = vpop.permute.xlu0 %7130 }
 0x6d2   :  { %v7133_v42 = vunpack.i.h.bf16 %v7131_v39  ;;  %v7132_v44 = vunpack.i.l.bf16 %v7131_v39  ;;  %6852 = vmatprep.subr.bf16.mxu1 %v6851_v38 }
 0x6d3   :  { %6854 = vmatpush3.bf16.msra.mxu1 %v6851_v38 }
 0x6d4   :  { %v7273_v45 = vpop.eup %7272  ;;  %v6855_v47 = vpack.c.bf16 %v7133_v42, %v7132_v44 }
 0x6d5   :  { %v1344_v48 = vmul.f32 %v7273_v45, %v7265_v11  ;;  %v712_v45 = vld [vmem:[%s8555_s6 + $0x10] sm:$0xff] }
 0x6d6   :  { %6460 = vmatmul.mubr.msk.f32.vlgmr.msra.gmra.mrb[16].mxu1 %vm897_vm7, %v1343_v46  ;;  %6856 = vmatprep.subr.bf16.mxu1 %v6855_v47 }
 0x6d7   :  { %6858 = vmatpush3.bf16.msra.mxu1 %v6855_v47  ;;  %6466 = vmatprep.mubr.msk.f32.mxu1 %vm897_vm7, %v1344_v48 }
 0x6d8   :  { %v7275_v43 = vpop.eup %7274  ;;  %6469 = vmatprep.subr.mxu1 %v711_v14 }
 0x6d9   :  { %v1345_v50 = vmul.f32 %v7275_v43, %v7267_v13 }
 0x6db   :  { %6467 = vmatmul.mubr.msk.f32.vlgmr.msra.gmra.mrb[18].mxu1 %vm897_vm7, %v1345_v50 }
 0x6dc   :  { %6470 = vmatpush3.msra.mxu1 %v711_v14 }
 0x6fe   :  { %v1902_v52 = vpop.xlane.xlu1 %1901 }
 0x6ff   :  { %v1912_v55 = vsub.f32 %v1896_v15, %v1902_v52  ;;  %v710_v15 = vld [vmem:[%s8555_s6] sm:$0xff] }
 0x700   :  { %6477 = vmatprep.subr.mxu1 %v710_v15 }
 0x701   :  { %v1916_v57 = vmul.f32 1.442695, %v1912_v55 }
 0x702   :  { %v1908_v60 = vpop.xlane.xlu1 %1907  ;;  %v1905_v61 = vpop.xlane.xlu0 %1904 }
 0x703   :  { %7276 = vpow2.f32 %v1916_v57  ;;  %v1914_v62 = vsub.f32 %v1898_v17, %v1908_v60  ;;  %v1913_v0 = vsub.f32 %v1897_v16, %v1905_v61 }
 0x705   :  { %v1920_v1 = vmul.f32 1.442695, %v1914_v62  ;;  %v1918_v2 = vmul.f32 1.442695, %v1913_v0 }
 0x706   :  { %v1911_v3 = vpop.xlane.xlu0 %1910 }
 0x707   :  { %7278 = vpow2.f32 %v1920_v1  ;;  %v1915_v4 = vsub.f32 %v1899_v19, %v1911_v3 }
 0x708   :  { %7280 = vpow2.f32 %v1918_v2 }
 0x709   :  { %v1922_v5 = vmul.f32 1.442695, %v1915_v4 }
 0x70b   :  { %7282 = vpow2.f32 %v1922_v5 }
 0x70d   :  { %v7957_v6 = vpop.eup %7276 }
 0x70e   :  { %v1924_v7 = vsel %vm897_vm7, %v7957_v6, 0.0 }
 0x70f   :  { %1925 = vadd.xlane.f32.xlu1 %v1924_v7 }
 0x711   :  { %v7279_v8 = vpop.eup %7278 }
 0x712   :  { %v7961_v9 = vpop.eup %7280  ;;  %v1930_v10 = vsel %vm897_vm7, %v7279_v8, 0.0 }
 0x713   :  { %1931 = vadd.xlane.f32.xlu1 %v1930_v10  ;;  %v1927_v11 = vsel %vm897_vm7, %v7961_v9, 0.0 }
 0x714   :  { %1928 = vadd.xlane.f32.xlu0 %v1927_v11 }
 0x715   :  { %v7283_v12 = vpop.eup %7282 }
 0x716   :  { %v1933_v13 = vsel %vm897_vm7, %v7283_v12, 0.0 }
 0x718   :  { %1934 = vadd.xlane.f32.xlu0 %v1933_v13 }
 0x724   :  { %7135 = vrot.lane.b32.xlu1 %v7828_v54, %s8579_s28 }
 0x728   :  { %7145 = vrot.lane.b32.xlu1 %v7828_v54, %s8577_s4 }
 0x72c   :  { %2219 = vrot.lane.b32.xlu1 %v7822_v53, %s8575_s1 }
 0x72e   :  { %7140 = vrot.lane.b32.xlu0 %v7838_v59, %s8579_s28 }
 0x730   :  { %2221 = vrot.lane.b32.xlu1 %v7820_v51, %s8575_s1 }
 0x732   :  { %7150 = vrot.lane.b32.xlu0 %v7838_v59, %s8577_s4 }
 0x734   :  { %2312 = vrot.lane.b32.xlu1 %v7832_v56, %s8575_s1 }
 0x736   :  { %2310 = vrot.lane.b32.xlu0 %v7834_v58, %s8575_s1  ;;  %s8602_s1 = smov 48  }
 0x79c   :  { %v1926_v16 = vpop.xlane.xlu1 %1925 }
 0x7a0   :  { %v1932_v17 = vpop.xlane.xlu1 %1931 }
 0x7a1   :  { %7284 = vrcp.f32 %v1932_v17  ;;  %v1929_v53 = vpop.xlane.xlu0 %1928 }
 0x7a4   :  { %v7136_v18 = vpop.permute.xlu1 %7135 }
 0x7a5   :  { %v1935_v19 = vpop.xlane.xlu0 %1934  ;;  %v7138_v20 = vunpack.i.h.bf16 %v7136_v18  ;;  %v7137_v21 = vunpack.i.l.bf16 %v7136_v18 }
 0x7a6   :  { %7286 = vrcp.f32 %v1935_v19 }
 0x7a7   :  { %7288 = vrcp.f32 %v1926_v16  ;;  %v6871_v35 = vpack.c.bf16 %v7138_v20, %v7137_v21 }
 0x7a8   :  { %v7146_v22 = vpop.permute.xlu1 %7145  ;;  %7290 = vrcp.f32 %v1929_v53 }
 0x7a9   :  { %v7141_v51 = vpop.permute.xlu0 %7140  ;;  %v6461_v24 = vpop.f32.mrb[16].mxu1  ;;  %v7148_v26 = vunpack.i.h.bf16 %v7146_v22  ;;  %v7147_v27 = vunpack.i.l.bf16 %v7146_v22 }
 0x7aa   :  { %v7143_v28 = vunpack.i.h.bf16 %v7141_v51  ;;  %v7142_v29 = vunpack.i.l.bf16 %v7141_v51  ;;  %v1424_v56 = vpop.f32.mrb[17].mxu1 }
 0x7ab   :  { %v7285_v34 = vpop.eup %7284  ;;  %6471 = vmatprep.mubr.msk.f32.mxu1 %vm720_vm5, %v1424_v56  ;;  %v6879_v37 = vpack.c.bf16 %v7148_v26, %v7147_v27 }
 0x7ac   :  { %v6875_v58 = vpack.c.bf16 %v7143_v28, %v7142_v29  ;;  %6472 = vmatmul.mubr.msk.f32.vlgmr.msra.gmra.mrb[20].mxu1 %vm720_vm5, %v6461_v24  ;;  %v1942_v36 = vmul.f32 %v7285_v34, %v7279_v8  ;;  %v2220_v44 = vpop.permute.xlu1 %2219 }
 0x7ad   :  { %6478 = vmatpush3.msra.mxu1 %v710_v15  ;;  %v7151_v47 = vpop.permute.xlu0 %7150 }
 0x7ae   :  { %6872 = vmatprep.subr.bf16.mxu1 %v6871_v35  ;;  %6876 = vmatprep.subr.bf16.mxu0 %v6875_v58  ;;  %v6468_v38 = vpop.f32.mrb[18].mxu1  ;;  %v7153_v43 = vunpack.i.h.bf16 %v7151_v47  ;;  %v7152_v50 = vunpack.i.l.bf16 %v7151_v47 }
 0x7af   :  { %6878 = vmatpush3.bf16.msra.mxu0 %v6875_v58  ;;  %6510 = vmatprep.mubr.msk.f32.mxu0 %vm897_vm7, %v1942_v36  ;;  %v1511_v40 = vpop.f32.mrb[19].mxu1 }
 0x7b0   :  { %v7287_v39 = vpop.eup %7286  ;;  %6881 = vmatprep.subr.msk.bf16.mxu0 %vm7844_vm6, %v6879_v37  ;;  %6474 = vmatprep.mubr.msk.f32.mxu1 %vm720_vm5, %v1511_v40  ;;  %v6885_v52 = vpack.c.bf16 %v7153_v43, %v7152_v50 }
 0x7b1   :  { %6475 = vmatmul.mubr.msk.f32.gmra.mrb[22].mxu1 %vm720_vm5, %v6468_v38  ;;  %v1943_v42 = vmul.f32 %v7287_v39, %v7283_v12  ;;  %v7289_v46 = vpop.eup %7288  ;;  %v2311_v4 = vpop.permute.xlu0 %2310 }
 0x7b2   :  { %6479 = vmatprep.mubr.msk.f32.mxu1 %vm720_vm5, %v7931_v31  ;;  %v7291_v31 = vpop.eup %7290  ;;  %v1940_v48 = vmul.f32 %v7289_v46, %v7957_v6 }
 0x7b3   :  { %6511 = vmatmul.mubr.msk.f32.vlgmr.msra.gmra.mrb[36].mxu0 %vm897_vm7, %v1943_v42 }
 0x7b4   :  { %6525 = vmatprep.mubr.msk.f32.mxu0 %vm720_vm5, %v2220_v44 }
 0x7b5   :  { %6480 = vmatmul.mubr.msk.f32.vlgmr.msra.gmra.mrb[20].mxu1 %vm720_vm5, %v7929_v30  ;;  %v1941_v30 = vmul.f32 %v7291_v31, %v7961_v9 }
 0x7b6   :  { %6874 = vmatpush3.bf16.msra.mxu1 %v6871_v35  ;;  %6482 = vmatprep.mubr.msk.f32.mxu1 %vm720_vm5, %v7935_v33  ;;  %v2222_v33 = vpop.permute.xlu1 %2221 }
 0x7b7   :  { %6513 = vmatprep.subr.mxu1 %v712_v45 }
 0x7b8   :  { %6884 = vmatpush3.bf16.xpose.msk.msra.mxu0 %vm7844_vm6, %v6879_v37 }
 0x7b9   :  { %6483 = vmatmul.mubr.msk.f32.gmra.mrb[22].mxu1 %vm720_vm5, %v7933_v32 }
 0x7ba   :  { %6503 = vmatprep.mubr.msk.f32.mxu1 %vm897_vm7, %v1940_v48  ;;  %v2313_v5 = vpop.permute.xlu1 %2312 }
 0x7bd   :  { %6504 = vmatmul.mubr.msk.f32.vlgmr.msra.gmra.mrb[24].mxu1 %vm897_vm7, %v1941_v30 }
 0x7be   :  { %6514 = vmatpush3.msra.mxu1 %v712_v45 }
 0x7bf   :  { %6526 = vmatmul.mubr.msk.f32.vlgmr.msra.gmra.mrb[38].mxu0 %vm720_vm5, %v2222_v33  ;;  %6887 = vmatprep.subr.msk.bf16.mxu1 %vm7844_vm6, %v6885_v52  ;;  %v713_v33 = vld [vmem:[%s8555_s6 + $0x18] sm:$0xff] }
 0x886   :  { %v6512_v55 = vpop.f32.mrb[36].mxu0 }
 0x887   :  { %v2109_v57 = vpop.f32.mrb[37].mxu0 }
 0x890   :  { %v6505_v60 = vpop.f32.mrb[24].mxu1 }
 0x891   :  { %v2022_v61 = vpop.f32.mrb[25].mxu1 }
 0x892   :  { %v6527_v62 = vpop.f32.mrb[38].mxu0  ;;  %6515 = vmatprep.mubr.msk.f32.mxu1 %vm720_vm5, %v2022_v61 }
 0x893   :  { %v2402_v32 = vmul.f32 0.35355338, %v6527_v62  ;;  %v2301_v0 = vpop.f32.mrb[39].mxu0  ;;  %6516 = vmatmul.mubr.msk.f32.vlgmr.msra.gmra.mrb[20].mxu1 %vm720_vm5, %v6505_v60  ;;  %v5950_v62 = vld [vmem:[%s8556_s7] ss:$0 sm:$0xff] }
 0x894   :  { %v2401_v1 = vmul.f32 0.35355338, %v2301_v0  ;;  %6890 = vmatpush3.bf16.xpose.msk.msra.mxu1 %vm7844_vm6, %v6885_v52  ;;  %6518 = vmatprep.mubr.msk.f32.mxu1 %vm720_vm5, %v2109_v57 }
 0x895   :  { %v2408_v2 = vsel %vm897_vm7, %v2402_v32, -inf }
 0x896   :  { %2409 = vmax.xlane.f32.xlu1 %v2408_v2  ;;  %v2405_v3 = vsel %vm897_vm7, %v2401_v1, -inf }
 0x897   :  { %2406 = vmax.xlane.f32.xlu0 %v2405_v3  ;;  %6519 = vmatmul.mubr.msk.f32.gmra.mrb[22].mxu1 %vm720_vm5, %v6512_v55 }
 0x898   :  { %6532 = vmatprep.mubr.msk.f32.mxu1 %vm720_vm5, %v2311_v4 }
 0x89b   :  { %6533 = vmatmul.mubr.msk.f32.vlgmr.msra.gmra.mrb[26].mxu1 %vm720_vm5, %v2313_v5 }
 0x923   :  { %v2410_v11 = vpop.xlane.xlu1 %2409 }
 0x924   :  { %v2407_v6 = vpop.xlane.xlu0 %2406  ;;  %v2418_v12 = vsub.f32 %v2402_v32, %v2410_v11 }
 0x925   :  { %v2417_v7 = vsub.f32 %v2401_v1, %v2407_v6 }
 0x926   :  { %v2423_v13 = vmul.f32 1.442695, %v2418_v12 }
 0x927   :  { %v2421_v8 = vmul.f32 1.442695, %v2417_v7 }
 0x929   :  { %7292 = vpow2.f32 %v2421_v8 }
 0x92a   :  { %7294 = vpow2.f32 %v2423_v13 }
 0x933   :  { %v7293_v9 = vpop.eup %7292 }
 0x934   :  { %v2429_v10 = vsel %vm897_vm7, %v7293_v9, 0.0  ;;  %v7295_v19 = vpop.eup %7294 }
 0x935   :  { %2430 = vadd.xlane.f32.xlu1 %v2429_v10  ;;  %v2432_v20 = vsel %vm897_vm7, %v7295_v19, 0.0 }
 0x96e   :  { %v6534_v14 = vpop.f32.mrb[26].mxu1 }
 0x96f   :  { %v2392_v15 = vpop.f32.mrb[27].mxu1  ;;  %v2404_v17 = vmul.f32 0.35355338, %v6534_v14 }
 0x970   :  { %v2403_v16 = vmul.f32 0.35355338, %v2392_v15 }
 0x971   :  { %v2414_v18 = vsel %vm897_vm7, %v2404_v17, -inf }
 0x972   :  { %v2411_v53 = vsel %vm897_vm7, %v2403_v16, -inf }
 0x973   :  { %2412 = vmax.xlane.f32.xlu0 %v2411_v53 }
 0x977   :  { %2415 = vmax.xlane.f32.xlu0 %v2414_v18 }
 0x97b   :  { %2433 = vadd.xlane.f32.xlu0 %v2432_v20 }
 0x9c2   :  { %v2431_v21 = vpop.xlane.xlu1 %2430 }
 0x9c3   :  { %7296 = vrcp.f32 %v2431_v21 }
 0x9cd   :  { %v7297_v22 = vpop.eup %7296 }
 0x9ce   :  { %v2445_v51 = vmul.f32 %v7297_v22, %v7293_v9 }
 0x9d0   :  { %6539 = vmatprep.mubr.msk.f32.mxu0 %vm897_vm7, %v2445_v51 }
 0xa00   :  { %v2413_v24 = vpop.xlane.xlu0 %2412 }
 0xa01   :  { %v2419_v26 = vsub.f32 %v2403_v16, %v2413_v24 }
 0xa03   :  { %v2425_v27 = vmul.f32 1.442695, %v2419_v26 }
 0xa04   :  { %v2416_v28 = vpop.xlane.xlu0 %2415 }
 0xa05   :  { %7298 = vpow2.f32 %v2425_v27  ;;  %v2420_v29 = vsub.f32 %v2404_v17, %v2416_v28 }
 0xa07   :  { %v2427_v56 = vmul.f32 1.442695, %v2420_v29 }
 0xa08   :  { %v2434_v37 = vpop.xlane.xlu0 %2433 }
 0xa09   :  { %7300 = vpow2.f32 %v2427_v56 }
 0xa0a   :  { %7302 = vrcp.f32 %v2434_v37  ;;  %v2817_v37 = vld [vmem:[%s8557_s8 + $0x18] sm:$0xff] }
 0xa0f   :  { %v7299_v34 = vpop.eup %7298 }
 0xa10   :  { %v2435_v58 = vsel %vm897_vm7, %v7299_v34, 0.0 }
 0xa11   :  { %2436 = vadd.xlane.f32.xlu1 %v2435_v58  ;;  %v2815_v58 = vld [vmem:[%s8557_s8 + $0x8] sm:$0xff] }
 0xa13   :  { %v7301_v35 = vpop.eup %7300 }
 0xa14   :  { %v2438_v36 = vsel %vm897_vm7, %v7301_v35, 0.0  ;;  %v7303_v46 = vpop.eup %7302 }
 0xa15   :  { %2439 = vadd.xlane.f32.xlu0 %v2438_v36  ;;  %v2446_v43 = vmul.f32 %v7303_v46, %v7295_v19  ;;  %v2816_v36 = vld [vmem:[%s8557_s8 + $0x10] sm:$0xff] }
 0xa22   :  { %7155 = vrot.lane.b32.xlu1 %v7828_v54, %s8573_s0 }
 0xa2b   :  { %7160 = vrot.lane.b32.xlu0 %v7838_v59, %s8573_s0  ;;  %s8603_s0 = smov 72  }
 0xa9e   :  { %v2437_v38 = vpop.xlane.xlu1 %2436 }
 0xa9f   :  { %7304 = vrcp.f32 %v2437_v38  ;;  %v6903_v38 = vpack.c.bf16 %v2817_v37, %v2816_v36 }
 0xaa2   :  { %v7156_v40 = vpop.permute.xlu1 %7155  ;;  %v2440_v39 = vpop.xlane.xlu0 %2439 }
 0xaa3   :  { %v7158_v42 = vunpack.i.h.bf16 %v7156_v40  ;;  %v7157_v44 = vunpack.i.l.bf16 %v7156_v40  ;;  %7306 = vrcp.f32 %v2440_v39  ;;  %v2926_v40 = vld [vmem:[%s8559_s10] sm:$0xff]  ;;  %v2927_v39 = vld [vmem:[%s8559_s10 + $0x8] sm:$0xff] }
 0xaa5   :  { %v6891_v45 = vpack.c.bf16 %v7158_v42, %v7157_v44  ;;  %v2928_v42 = vld [vmem:[%s8559_s10 + $0x10] sm:$0xff]  ;;  %v6907_v44 = vpack.c.bf16 %v2927_v39, %v2926_v40 }
 0xaa6   :  { %v7161_v47 = vpop.permute.xlu0 %7160 }
 0xaa7   :  { %v7163_v31 = vunpack.i.h.bf16 %v7161_v47  ;;  %v7162_v48 = vunpack.i.l.bf16 %v7161_v47  ;;  %6892 = vmatprep.subr.bf16.mxu0 %v6891_v45  ;;  %v2930_v47 = vld [vmem:[%s8559_s10 + $0x20] sm:$0xff] }
 0xaa8   :  { %6894 = vmatpush3.bf16.msra.mxu0 %v6891_v45  ;;  %v2929_v45 = vld [vmem:[%s8559_s10 + $0x18] sm:$0xff] }
 0xaa9   :  { %v7305_v54 = vpop.eup %7304  ;;  %v6895_v50 = vpack.c.bf16 %v7163_v31, %v7162_v48  ;;  %v6911_v46 = vpack.c.bf16 %v2929_v45, %v2928_v42  ;;  %v2931_v31 = vld [vmem:[%s8559_s10 + $0x28] sm:$0xff] }
 0xaaa   :  { %v2447_v59 = vmul.f32 %v7305_v54, %v7299_v34  ;;  %v2814_v34 = vld [vmem:[%s8557_s8] sm:$0xff]  ;;  %v6915_v48 = vpack.c.bf16 %v2931_v31, %v2930_v47 }
 0xaab   :  { %6540 = vmatmul.mubr.msk.f32.vlgmr.msra.gmra.mrb[40].mxu0 %vm897_vm7, %v2446_v43  ;;  %6896 = vmatprep.subr.bf16.mxu1 %v6895_v50 }
 0xaac   :  { %6898 = vmatpush3.bf16.msra.mxu1 %v6895_v50  ;;  %6546 = vmatprep.mubr.msk.f32.mxu1 %vm897_vm7, %v2447_v59 }
 0xaad   :  { %v7307_v30 = vpop.eup %7306  ;;  %6549 = vmatprep.subr.mxu1 %v713_v33 }
 0xaae   :  { %v2448_v52 = vmul.f32 %v7307_v30, %v7301_v35  ;;  %v6899_v35 = vpack.c.bf16 %v2815_v58, %v2814_v34 }
 0xab0   :  { %6547 = vmatmul.mubr.msk.f32.vlgmr.msra.gmra.mrb[28].mxu1 %vm897_vm7, %v2448_v52  ;;  %6900 = vmatprep.subr.bf16.mxu0 %v6899_v35 }
 0xab1   :  { %6550 = vmatpush3.msra.mxu1 %v713_v33  ;;  %6902 = vmatpush3.bf16.msra.mxu0 %v6899_v35 }
 0xab2   :  { %6904 = vmatprep.subr.bf16.mxu0 %v6903_v38  ;;  %6908 = vmatprep.subr.bf16.mxu1 %v6907_v44 }
 0xab5   :  { %6906 = vmatpush3.bf16.msra.mxu0 %v6903_v38 }
 0xb7e   :  { %v6541_v55 = vpop.f32.mrb[40].mxu0 }
 0xb7f   :  { %v2527_v57 = vpop.f32.mrb[41].mxu0 }
 0xb80   :  { %6551 = vmatprep.mubr.msk.f32.mxu1 %vm720_vm5, %v2527_v57 }
 0xb81   :  { %6552 = vmatmul.mubr.msk.f32.vlgmr.msra.gmra.mrb[20].mxu1 %vm720_vm5, %v6541_v55 }
 0xb82   :  { %6910 = vmatpush3.bf16.msra.mxu1 %v6907_v44 }
 0xb83   :  { %v6548_v60 = vpop.f32.mrb[28].mxu1  ;;  %6912 = vmatprep.subr.bf16.mxu1 %v6911_v46 }
 0xb84   :  { %v2614_v61 = vpop.f32.mrb[29].mxu1 }
 0xb85   :  { %6554 = vmatprep.mubr.msk.f32.mxu1 %vm720_vm5, %v2614_v61 }
 0xb86   :  { %6555 = vmatmul.mubr.msk.f32.gmra.mrb[22].mxu1 %vm720_vm5, %v6548_v60 }
 0xb87   :  { %6914 = vmatpush3.bf16.msra.mxu1 %v6911_v46 }
 0xb88   :  { %6916 = vmatprep.subr.bf16.mxu1 %v6915_v48 }
 0xb8b   :  { %6918 = vmatpush3.bf16.msra.mxu1 %v6915_v48 }
 0xc54   :  { %v6553_v32 = vpop.f32.mrb[20].mxu1 }
 0xc55   :  { %v2732_v0 = vadd.f32 %v6553_v32, %v5950_v62  ;;  %v2701_v1 = vpop.f32.mrb[21].mxu1 }
 0xc56   :  { %v2731_v2 = vadd.f32 %v5950_v62, %v2701_v1 }
 0xc57   :  { %v2736_v3 = vadd.f32 %v2732_v0, %v7762_v25  ;;  %v5951_v0 = vld [vmem:[%s8561_s12] ss:$0 sm:$0xff] }
 0xc58   :  { %v2735_v4 = vadd.f32 %v2731_v2, %v7759_v23 }
 0xc59   :  { %v6556_v5 = vpop.f32.mrb[22].mxu1  ;;  %v2744_v6 = vsel %vm536_vm4, %v2736_v3, 0.0 }
 0xc5a   :  { %v2734_v7 = vadd.f32 %v6556_v5, %v5950_v62  ;;  %2745 = vadd.xlane.f32.xlu0 %v2744_v6  ;;  %v2711_v8 = vpop.f32.mrb[23].mxu1  ;;  %v2741_v9 = vsel %vm536_vm4, %v2735_v4, 0.0 }
 0xc5b   :  { %v2733_v10 = vadd.f32 %v5950_v62, %v2711_v8  ;;  %2742 = vadd.xlane.f32.xlu1 %v2741_v9 }
 0xc5c   :  { %v2738_v11 = vadd.f32 %v2734_v7, %v7809_v49 }
 0xc5d   :  { %v2737_v12 = vadd.f32 %v2733_v10, %v7811_v41 }
 0xc5e   :  { %v2750_v13 = vsel %vm536_vm4, %v2738_v11, 0.0 }
 0xc5f   :  { %2751 = vadd.xlane.f32.xlu0 %v2750_v13  ;;  %v2747_v25 = vsel %vm536_vm4, %v2737_v12, 0.0 }
 0xc60   :  { %2748 = vadd.xlane.f32.xlu1 %v2747_v25 }
 0xce7   :  { %v2746_v23 = vpop.xlane.xlu0 %2745 }
 0xce8   :  { %v2755_v14 = vmul.f32 0.03125, %v2746_v23  ;;  %v2743_v15 = vpop.xlane.xlu1 %2742 }
 0xce9   :  { %v2754_v16 = vmul.f32 0.03125, %v2743_v15  ;;  %v2932_v15 = vld [vmem:[%s8559_s10 + $0x30] sm:$0xff] }
 0xcea   :  { %v8060_v17 = vsub.f32 %v2736_v3, %v2755_v14 }
 0xceb   :  { %v8062_v53 = vsub.f32 %v2735_v4, %v2754_v16  ;;  %v5952_v4 = vld [vmem:[%s8562_s13] ss:$0 sm:$0xff]  ;;  %v2933_v16 = vld [vmem:[%s8559_s10 + $0x38] sm:$0xff] }
 0xcec   :  { %v2752_v18 = vpop.xlane.xlu0 %2751  ;;  %v2763_v49 = vmul.f32 %v8060_v17, %v8060_v17 }
 0xced   :  { %v2757_v19 = vmul.f32 0.03125, %v2752_v18  ;;  %v2749_v41 = vpop.xlane.xlu1 %2748  ;;  %v2762_v20 = vmul.f32 %v8062_v53, %v8062_v53 }
 0xcee   :  { %v2756_v21 = vmul.f32 0.03125, %v2749_v41  ;;  %v2769_v22 = vsel %vm536_vm4, %v2763_v49, 0.0 }
 0xcef   :  { %v8069_v51 = vsub.f32 %v2738_v11, %v2757_v19  ;;  %2770 = vadd.xlane.f32.xlu0 %v2769_v22  ;;  %v2766_v24 = vsel %vm536_vm4, %v2762_v20, 0.0 }
 0xcf0   :  { %v2760_v26 = vsub.f32 %v2737_v12, %v2756_v21  ;;  %2767 = vadd.xlane.f32.xlu1 %v2766_v24 }
 0xcf1   :  { %v2765_v27 = vmul.f32 %v8069_v51, %v8069_v51 }
 0xcf2   :  { %v2764_v28 = vmul.f32 %v2760_v26, %v2760_v26 }
 0xcf3   :  { %v2775_v29 = vsel %vm536_vm4, %v2765_v27, 0.0 }
 0xcf4   :  { %2776 = vadd.xlane.f32.xlu0 %v2775_v29  ;;  %v2772_v56 = vsel %vm536_vm4, %v2764_v28, 0.0  ;;  %v5958_v29 = vld [vmem:[%s8560_s11] ss:$0 sm:$0xff] }
 0xcf5   :  { %2773 = vadd.xlane.f32.xlu1 %v2772_v56 }
 0xd7c   :  { %v2771_v54 = vpop.xlane.xlu0 %2770 }
 0xd7d   :  { %v2779_v43 = vmul.f32 0.03125, %v2771_v54  ;;  %v2768_v50 = vpop.xlane.xlu1 %2767 }
 0xd7e   :  { %v2778_v59 = vmul.f32 0.03125, %v2768_v50 }
 0xd7f   :  { %v2783_v30 = vadd.f32 1e-05, %v2779_v43 }
 0xd80   :  { %v2782_v52 = vadd.f32 1e-05, %v2778_v59 }
 0xd81   :  { %7308 = vrsqrt.f32 %v2783_v30  ;;  %v2777_v33 = vpop.xlane.xlu0 %2776 }
 0xd82   :  { %7310 = vrsqrt.f32 %v2782_v52  ;;  %v2781_v55 = vmul.f32 0.03125, %v2777_v33  ;;  %v2774_v57 = vpop.xlane.xlu1 %2773 }
 0xd83   :  { %v2780_v60 = vmul.f32 0.03125, %v2774_v57 }
 0xd84   :  { %v2785_v61 = vadd.f32 1e-05, %v2781_v55 }
 0xd85   :  { %v2784_v62 = vadd.f32 1e-05, %v2780_v60 }
 0xd86   :  { %7312 = vrsqrt.f32 %v2785_v61 }
 0xd87   :  { %7314 = vrsqrt.f32 %v2784_v62 }
 0xd8b   :  { %v7309_v32 = vpop.eup %7308 }
 0xd8c   :  { %v7311_v1 = vpop.eup %7310  ;;  %v2791_v2 = vmul.f32 %v7309_v32, %v8060_v17  ;;  %v6919_v17 = vpack.c.bf16 %v2933_v16, %v2932_v15 }
 0xd8d   :  { %v2790_v3 = vmul.f32 %v7311_v1, %v8062_v53  ;;  %v5953_v53 = vld [vmem:[%s8558_s9] ss:$0 sm:$0xff] }
 0xd8e   :  { %v2801_v5 = vmul.f32 %v5951_v0, %v2791_v2  ;;  %6920 = vmatprep.subr.bf16.mxu1 %v6919_v17 }
 0xd8f   :  { %v2800_v6 = vmul.f32 %v5951_v0, %v2790_v3  ;;  %6922 = vmatpush3.bf16.msra.mxu1 %v6919_v17 }
 0xd90   :  { %v7313_v7 = vpop.eup %7312  ;;  %v2811_v11 = vadd.f32 %v5952_v4, %v2801_v5 }
 0xd91   :  { %v7315_v8 = vpop.eup %7314  ;;  %v2810_v9 = vadd.f32 %v5952_v4, %v2800_v6  ;;  %v2793_v10 = vmul.f32 %v7313_v7, %v8069_v51  ;;  %v5965_v7 = vld [vmem:[%s8594_s22 + $0x20] sm:$0xff] }
 0xd92   :  { %v2792_v12 = vmul.f32 %v7315_v8, %v2760_v26  ;;  %v5966_v8 = vld [vmem:[%s8594_s22 + $0x28] sm:$0xff] }
 0xd93   :  { %6565 = vmatprep.mubr.msk.f32.mxu0 %vm536_vm4, %v2810_v9  ;;  %v2803_v13 = vmul.f32 %v5951_v0, %v2793_v10  ;;  %v5967_v10 = vld [vmem:[%s8594_s22 + $0x30] sm:$0xff] }
 0xd94   :  { %6566 = vmatmul.mubr.msk.f32.vlgmr.msra.gmra.mrb[42].mxu0 %vm536_vm4, %v2811_v11  ;;  %v2802_v25 = vmul.f32 %v5951_v0, %v2792_v12 }
 0xd95   :  { %v2813_v14 = vadd.f32 %v5952_v4, %v2803_v13 }
 0xd96   :  { %v2812_v23 = vadd.f32 %v5952_v4, %v2802_v25 }
 0xd98   :  { %6568 = vmatprep.mubr.msk.f32.mxu0 %vm536_vm4, %v2812_v23 }
 0xd99   :  { %6569 = vmatmul.mubr.msk.f32.gmra.mrb[44].mxu0 %vm536_vm4, %v2813_v14 }
 0xe67   :  { %v6567_v18 = vpop.f32.mrb[42].mxu0 }
 0xe68   :  { %v2909_v49 = vadd.f32 %v6567_v18, %v5953_v53  ;;  %v2903_v19 = vpop.f32.mrb[43].mxu0 }
 0xe69   :  { %v2904_v41 = vadd.f32 %v5953_v53, %v2903_v19 }
 0xe6a   :  { %v2923_v21 = vmax.f32 %v2909_v49, 0.0 }
 0xe6b   :  { %v2922_v20 = vmax.f32 %v2904_v41, 0.0 }
 0xe6c   :  { %v6570_v22 = vpop.f32.mrb[44].mxu0 }
 0xe6d   :  { %v2919_v51 = vadd.f32 %v6570_v22, %v5953_v53  ;;  %v2913_v24 = vpop.f32.mrb[45].mxu0  ;;  %6587 = vmatprep.mubr.msk.f32.mxu1 %vm2941_vm8, %v2922_v20 }
 0xe6e   :  { %v2914_v26 = vadd.f32 %v5953_v53, %v2913_v24  ;;  %6588 = vmatmul.mubr.msk.f32.vlgmr.msra.gmra.mrb[30].mxu1 %vm2941_vm8, %v2923_v21  ;;  %v5963_v21 = vld [vmem:[%s8563_s14] ss:$0 sm:$0xff] }
 0xe6f   :  { %v2925_v28 = vmax.f32 %v2919_v51, 0.0 }
 0xe70   :  { %v2924_v27 = vmax.f32 %v2914_v26, 0.0  ;;  %v5964_v26 = vld [vmem:[%s8564_s15] ss:$0 sm:$0xff] }
 0xe72   :  { %6590 = vmatprep.mubr.msk.f32.mxu1 %vm2941_vm8, %v2924_v27 }
 0xe73   :  { %6591 = vmatmul.mubr.msk.f32.gmra.mrb[32].mxu1 %vm2941_vm8, %v2925_v28 }
 0xf41   :  { %v6589_v56 = vpop.f32.mrb[30].mxu1 }
 0xf42   :  { %v3026_v34 = vadd.f32 %v6589_v56, %v5958_v29  ;;  %v3020_v58 = vpop.f32.mrb[31].mxu1 }
 0xf43   :  { %v3021_v35 = vadd.f32 %v5958_v29, %v3020_v58 }
 0xf44   :  { %v3040_v36 = vadd.f32 %v3026_v34, %v2811_v11  ;;  %v5968_v11 = vld [vmem:[%s8594_s22 + $0x38] sm:$0xff] }
 0xf45   :  { %v3039_v37 = vadd.f32 %v3021_v35, %v2810_v9  ;;  %v6923_v9 = vpack.c.bf16 %v5966_v8, %v5965_v7  ;;  %v6927_v12 = vpack.c.bf16 %v5968_v11, %v5967_v10 }
 0xf46   :  { %v6592_v38 = vpop.f32.mrb[32].mxu1  ;;  %v3048_v40 = vsel %vm536_vm4, %v3040_v36, 0.0 }
 0xf47   :  { %v3036_v39 = vadd.f32 %v6592_v38, %v5958_v29  ;;  %3049 = vadd.xlane.f32.xlu0 %v3048_v40  ;;  %v3030_v42 = vpop.f32.mrb[33].mxu1  ;;  %v3045_v44 = vsel %vm536_vm4, %v3039_v37, 0.0  ;;  %6924 = vmatprep.subr.bf16.mxu0 %v6923_v9 }
 0xf48   :  { %v3031_v45 = vadd.f32 %v5958_v29, %v3030_v42  ;;  %3046 = vadd.xlane.f32.xlu1 %v3045_v44  ;;  %6926 = vmatpush3.bf16.msra.mxu0 %v6923_v9  ;;  %v5970_v42 = vld [vmem:[%s8554_s5 + $0x1] ss:$0 sm:$0xff]  ;;  %s8599_s5 = smov 56  }
 0xf49   :  { %v3042_v46 = vadd.f32 %v3036_v39, %v2813_v14  ;;  %6928 = vmatprep.subr.bf16.mxu0 %v6927_v12 }
 0xf4a   :  { %v3041_v47 = vadd.f32 %v3031_v45, %v2812_v23 }
 0xf4b   :  { %v3054_v31 = vsel %vm536_vm4, %v3042_v46, 0.0 }
 0xf4c   :  { %3055 = vadd.xlane.f32.xlu0 %v3054_v31  ;;  %v3051_v48 = vsel %vm536_vm4, %v3041_v47, 0.0  ;;  %6930 = vmatpush3.bf16.msra.mxu0 %v6927_v12 }
 0xf4d   :  { %3052 = vadd.xlane.f32.xlu1 %v3051_v48 }
 0xfd4   :  { %v3050_v54 = vpop.xlane.xlu0 %3049 }
 0xfd5   :  { %v3058_v43 = vmul.f32 0.03125, %v3050_v54  ;;  %v3047_v50 = vpop.xlane.xlu1 %3046 }
 0xfd6   :  { %v3057_v59 = vmul.f32 0.03125, %v3047_v50 }
 0xfd7   :  { %v3062_v30 = vsub.f32 %v3040_v36, %v3058_v43 }
 0xfd8   :  { %v3061_v52 = vsub.f32 %v3039_v37, %v3057_v59 }
 0xfd9   :  { %v3056_v33 = vpop.xlane.xlu0 %3055  ;;  %v3066_v55 = vmul.f32 %v3062_v30, %v3062_v30 }
 0xfda   :  { %v3060_v57 = vmul.f32 0.03125, %v3056_v33  ;;  %v3053_v60 = vpop.xlane.xlu1 %3052  ;;  %v3065_v61 = vmul.f32 %v3061_v52, %v3061_v52 }
 0xfdb   :  { %v3059_v62 = vmul.f32 0.03125, %v3053_v60  ;;  %v3072_v32 = vsel %vm536_vm4, %v3066_v55, 0.0 }
 0xfdc   :  { %v3064_v0 = vsub.f32 %v3042_v46, %v3060_v57  ;;  %3073 = vadd.xlane.f32.xlu0 %v3072_v32  ;;  %v3069_v1 = vsel %vm536_vm4, %v3065_v61, 0.0 }
 0xfdd   :  { %v3063_v2 = vsub.f32 %v3041_v47, %v3059_v62  ;;  %3070 = vadd.xlane.f32.xlu1 %v3069_v1 }
 0xfde   :  { %v3068_v3 = vmul.f32 %v3064_v0, %v3064_v0 }
 0xfdf   :  { %v3067_v4 = vmul.f32 %v3063_v2, %v3063_v2 }
 0xfe0   :  { %v3078_v5 = vsel %vm536_vm4, %v3068_v3, 0.0 }
 0xfe1   :  { %3079 = vadd.xlane.f32.xlu0 %v3078_v5  ;;  %v3075_v6 = vsel %vm536_vm4, %v3067_v4, 0.0 }
 0xfe2   :  { %3076 = vadd.xlane.f32.xlu1 %v3075_v6 }
0x1069   :  { %v3074_v13 = vpop.xlane.xlu0 %3073 }
0x106a   :  { %v3082_v25 = vmul.f32 0.03125, %v3074_v13  ;;  %v3071_v23 = vpop.xlane.xlu1 %3070 }
0x106b   :  { %v3081_v14 = vmul.f32 0.03125, %v3071_v23 }
0x106c   :  { %v3086_v15 = vadd.f32 1e-05, %v3082_v25 }
0x106d   :  { %v3085_v16 = vadd.f32 1e-05, %v3081_v14 }
0x106e   :  { %7316 = vrsqrt.f32 %v3086_v15  ;;  %v3080_v17 = vpop.xlane.xlu0 %3079 }
0x106f   :  { %7318 = vrsqrt.f32 %v3085_v16  ;;  %v3084_v53 = vmul.f32 0.03125, %v3080_v17  ;;  %v3077_v18 = vpop.xlane.xlu1 %3076 }
0x1070   :  { %v3083_v49 = vmul.f32 0.03125, %v3077_v18 }
0x1071   :  { %v3088_v19 = vadd.f32 1e-05, %v3084_v53 }
0x1072   :  { %v3087_v41 = vadd.f32 1e-05, %v3083_v49 }
0x1073   :  { %7320 = vrsqrt.f32 %v3088_v19 }
0x1074   :  { %7322 = vrsqrt.f32 %v3087_v41 }
0x1078   :  { %v7317_v20 = vpop.eup %7316 }
0x1079   :  { %v7319_v22 = vpop.eup %7318  ;;  %v3094_v51 = vmul.f32 %v7317_v20, %v3062_v30 }
0x107a   :  { %v3093_v24 = vmul.f32 %v7319_v22, %v3061_v52 }
0x107b   :  { %v3104_v27 = vmul.f32 %v5963_v21, %v3094_v51 }
0x107c   :  { %v3103_v28 = vmul.f32 %v5963_v21, %v3093_v24 }
0x107d   :  { %v7321_v29 = vpop.eup %7320  ;;  %v8163_v35 = vadd.f32 %v5964_v26, %v3104_v27 }
0x107e   :  { %v7323_v56 = vpop.eup %7322  ;;  %v8161_v34 = vadd.f32 %v5964_v26, %v3103_v28  ;;  %v3096_v58 = vmul.f32 %v7321_v29, %v3064_v0 }
0x107f   :  { %v3095_v36 = vmul.f32 %v7323_v56, %v3063_v2 }
0x1080   :  { %6601 = vmatprep.mubr.msk.f32.mxu0 %vm536_vm4, %v8161_v34  ;;  %v3106_v37 = vmul.f32 %v5963_v21, %v3096_v58 }
0x1081   :  { %6602 = vmatmul.mubr.msk.f32.vlgmr.msra.gmra.mrb[46].mxu0 %vm536_vm4, %v8163_v35  ;;  %v3105_v38 = vmul.f32 %v5963_v21, %v3095_v36 }
0x1082   :  { %v8171_v39 = vadd.f32 %v5964_v26, %v3106_v37 }
0x1083   :  { %v8169_v40 = vadd.f32 %v5964_v26, %v3105_v38 }
0x1085   :  { %6604 = vmatprep.mubr.msk.f32.mxu0 %vm536_vm4, %v8169_v40 }
0x1086   :  { %6605 = vmatmul.mubr.msk.f32.gmra.mrb[48].mxu0 %vm536_vm4, %v8171_v39 }
0x1154   :  { %v6603_v44 = vpop.f32.mrb[46].mxu0 }
0x1155   :  { %v8180_v45 = vadd.f32 %v6603_v44, %v5970_v42  ;;  %v3208_v46 = vpop.f32.mrb[47].mxu0 }
0x1156   :  { %v8182_v47 = vadd.f32 %v5970_v42, %v3208_v46 }
0x1158   :  { %6611 = vmatprep.mubr.msk.f32.mxu0 %vm720_vm5, %v8182_v47  ;;  %v8188_v31 = vpack.i.bf16 %v8180_v45, %v8182_v47 }
0x1159   :  { %v6606_v48 = vpop.f32.mrb[48].mxu0 }
0x115a   :  { %v8190_v54 = vadd.f32 %v6606_v48, %v5970_v42  ;;  %7165 = vrot.lane.b32.xlu1 %v8188_v31, %s7429_s23  ;;  %v3218_v43 = vpop.f32.mrb[49].mxu0 }
0x115b   :  { %v8194_v50 = vadd.f32 %v5970_v42, %v3218_v43 }
0x115d   :  { %6618 = vmatprep.mubr.msk.f32.mxu1 %vm720_vm5, %v8194_v50  ;;  %v8200_v59 = vpack.i.bf16 %v8190_v54, %v8194_v50 }
0x115f   :  { %7170 = vrot.lane.b32.xlu0 %v8200_v59, %s7429_s23  ;;  %s8600_s23 = smov 80  }
0x11cc   :  { %v7166_v30 = vpop.permute.xlu1 %7165 }
0x11cd   :  { %v7168_v52 = vunpack.i.h.bf16 %v7166_v30  ;;  %v7167_v33 = vunpack.i.l.bf16 %v7166_v30 }
0x11cf   :  { %v6931_v55 = vpack.c.bf16 %v7168_v52, %v7167_v33 }
0x11d1   :  { %v7171_v57 = vpop.permute.xlu0 %7170  ;;  %6933 = vmatprep.subr.msk.bf16.mxu0 %vm7844_vm6, %v6931_v55 }
0x11d2   :  { %v7173_v60 = vunpack.i.h.bf16 %v7171_v57  ;;  %v7172_v61 = vunpack.i.l.bf16 %v7171_v57  ;;  %6936 = vmatpush3.bf16.xpose.msk.msra.mxu0 %vm7844_vm6, %v6931_v55 }
0x11d4   :  { %v6937_v62 = vpack.c.bf16 %v7173_v60, %v7172_v61 }
0x11d6   :  { %6939 = vmatprep.subr.msk.bf16.mxu1 %vm7844_vm6, %v6937_v62 }
0x11d7   :  { %6942 = vmatpush3.bf16.xpose.msk.msra.mxu1 %vm7844_vm6, %v6937_v62 }
0x11d9   :  { %6612 = vmatmul.mubr.msk.f32.vlgmr.msra.gmra.mrb[50].mxu0 %vm720_vm5, %v8180_v45 }
0x11de   :  { %6619 = vmatmul.mubr.msk.f32.vlgmr.msra.gmra.mrb[34].mxu1 %vm720_vm5, %v8190_v54 }
0x12ac   :  { %v6613_v32 = vpop.f32.mrb[50].mxu0 }
0x12ad   :  { %v3411_v0 = vmul.f32 0.35355338, %v6613_v32  ;;  %v3312_v1 = vpop.f32.mrb[51].mxu0 }
0x12ae   :  { %v3410_v2 = vmul.f32 0.35355338, %v3312_v1 }
0x12af   :  { %v3417_v3 = vsel %vm897_vm7, %v3411_v0, -inf }
0x12b0   :  { %3418 = vmax.xlane.f32.xlu0 %v3417_v3  ;;  %v3414_v4 = vsel %vm897_vm7, %v3410_v2, -inf }
0x12b1   :  { %v6620_v5 = vpop.f32.mrb[34].mxu1  ;;  %3415 = vmax.xlane.f32.xlu1 %v3414_v4 }
0x12b2   :  { %v3413_v6 = vmul.f32 0.35355338, %v6620_v5  ;;  %v3401_v7 = vpop.f32.mrb[35].mxu1 }
0x12b3   :  { %v3412_v8 = vmul.f32 0.35355338, %v3401_v7 }
0x12b4   :  { %v3423_v9 = vsel %vm897_vm7, %v3413_v6, -inf }
0x12b5   :  { %3424 = vmax.xlane.f32.xlu0 %v3423_v9  ;;  %v3420_v10 = vsel %vm897_vm7, %v3412_v8, -inf }
0x12b6   :  { %3421 = vmax.xlane.f32.xlu1 %v3420_v10 }
0x133d   :  { %v3419_v11 = vpop.xlane.xlu0 %3418 }
0x133e   :  { %v3427_v12 = vsub.f32 %v3411_v0, %v3419_v11  ;;  %v3416_v13 = vpop.xlane.xlu1 %3415 }
0x133f   :  { %v3426_v25 = vsub.f32 %v3410_v2, %v3416_v13 }
0x1340   :  { %v3432_v23 = vmul.f32 1.442695, %v3427_v12 }
0x1341   :  { %v3430_v14 = vmul.f32 1.442695, %v3426_v25 }
0x1342   :  { %7324 = vpow2.f32 %v3432_v23  ;;  %v3425_v15 = vpop.xlane.xlu0 %3424 }
0x1343   :  { %7326 = vpow2.f32 %v3430_v14  ;;  %v3429_v16 = vsub.f32 %v3413_v6, %v3425_v15  ;;  %v3422_v21 = vpop.xlane.xlu1 %3421 }
0x1344   :  { %v3428_v22 = vsub.f32 %v3412_v8, %v3422_v21 }
0x1345   :  { %v3436_v17 = vmul.f32 1.442695, %v3429_v16 }
0x1346   :  { %v3434_v51 = vmul.f32 1.442695, %v3428_v22 }
0x1347   :  { %7328 = vpow2.f32 %v3436_v17 }
0x1348   :  { %7330 = vpow2.f32 %v3434_v51 }
0x134c   :  { %v7325_v53 = vpop.eup %7324 }
0x134d   :  { %v7327_v18 = vpop.eup %7326  ;;  %v3441_v49 = vsel %vm897_vm7, %v7325_v53, 0.0 }
0x134e   :  { %3442 = vadd.xlane.f32.xlu0 %v3441_v49  ;;  %v3438_v19 = vsel %vm897_vm7, %v7327_v18, 0.0 }
0x134f   :  { %3439 = vadd.xlane.f32.xlu1 %v3438_v19 }
0x1351   :  { %v7329_v41 = vpop.eup %7328 }
0x1352   :  { %v3447_v20 = vsel %vm897_vm7, %v7329_v41, 0.0  ;;  %v7331_v24 = vpop.eup %7330 }
0x1353   :  { %3448 = vadd.xlane.f32.xlu0 %v3447_v20  ;;  %v3444_v26 = vsel %vm897_vm7, %v7331_v24, 0.0 }
0x1360   :  { %7175 = vrot.lane.b32.xlu1 %v8188_v31, %s7430_s24 }
0x1364   :  { %7185 = vrot.lane.b32.xlu1 %v8200_v59, %s7431_s2 }
0x1369   :  { %7180 = vrot.lane.b32.xlu0 %v8200_v59, %s7430_s24  ;;  %s8601_s24 = smov 112  }
0x136d   :  { %3725 = vrot.lane.b32.xlu0 %v8190_v54, %s7432_s25 }
0x1371   :  { %3632 = vrot.lane.b32.xlu0 %v8182_v47, %s7432_s25 }
0x1388   :  { %3445 = vadd.xlane.f32.xlu1 %v3444_v26 }
0x1399   :  { %3723 = vrot.lane.b32.xlu1 %v8194_v50, %s7432_s25 }
0x139d   :  { %7190 = vrot.lane.b32.xlu1 %v8188_v31, %s7431_s2 }
0x13a1   :  { %3634 = vrot.lane.b32.xlu1 %v8180_v45, %s7432_s25 }
0x13db   :  { %v3443_v27 = vpop.xlane.xlu0 %3442 }
0x13dc   :  { %7332 = vrcp.f32 %v3443_v27  ;;  %v3440_v28 = vpop.xlane.xlu1 %3439 }
0x13dd   :  { %7334 = vrcp.f32 %v3440_v28 }
0x13e0   :  { %v3449_v29 = vpop.xlane.xlu0 %3448  ;;  %v7176_v56 = vpop.permute.xlu1 %7175 }
0x13e1   :  { %v7178_v58 = vunpack.i.h.bf16 %v7176_v56  ;;  %v7177_v36 = vunpack.i.l.bf16 %v7176_v56  ;;  %7336 = vrcp.f32 %v3449_v29 }
0x13e3   :  { %v6943_v37 = vpack.c.bf16 %v7178_v58, %v7177_v36 }
0x13e4   :  { %v7181_v38 = vpop.permute.xlu0 %7180  ;;  %v7186_v42 = vpop.permute.xlu1 %7185 }
0x13e5   :  { %v7183_v44 = vunpack.i.h.bf16 %v7181_v38  ;;  %v7182_v46 = vunpack.i.l.bf16 %v7181_v38  ;;  %6944 = vmatprep.subr.bf16.mxu0 %v6943_v37  ;;  %v7188_v52 = vunpack.i.h.bf16 %v7186_v42  ;;  %v7187_v33 = vunpack.i.l.bf16 %v7186_v42 }
0x13e6   :  { %v7333_v48 = vpop.eup %7332  ;;  %6946 = vmatpush3.bf16.msra.mxu0 %v6943_v37 }
0x13e7   :  { %v7335_v43 = vpop.eup %7334  ;;  %v6947_v30 = vpack.c.bf16 %v7183_v44, %v7182_v46  ;;  %v3455_v60 = vmul.f32 %v7333_v48, %v7325_v53  ;;  %v6957_v61 = vpack.c.bf16 %v7188_v52, %v7187_v33 }
0x13e8   :  { %v3726_v55 = vpop.permute.xlu0 %3725  ;;  %v3454_v57 = vmul.f32 %v7335_v43, %v7327_v18 }
0x13e9   :  { %6948 = vmatprep.subr.bf16.mxu0 %v6947_v30 }
0x13ea   :  { %6625 = vmatprep.mubr.msk.f32.mxu0 %vm897_vm7, %v3454_v57 }
0x13eb   :  { %6626 = vmatmul.mubr.msk.f32.vlgmr.msra.gmra.mrb[52].mxu0 %vm897_vm7, %v3455_v60  ;;  %v7337_v4 = vpop.eup %7336 }
0x13ec   :  { %6950 = vmatpush3.bf16.msra.mxu0 %v6947_v30  ;;  %v3633_v62 = vpop.permute.xlu0 %3632  ;;  %v3457_v8 = vmul.f32 %v7337_v4, %v7329_v41 }
0x13ed   :  { %6959 = vmatprep.subr.msk.bf16.mxu0 %vm7844_vm6, %v6957_v61  ;;  %6639 = vmatprep.mubr.msk.f32.mxu1 %vm720_vm5, %v3633_v62 }
0x1415   :  { %v3446_v32 = vpop.xlane.xlu1 %3445 }
0x1416   :  { %7338 = vrcp.f32 %v3446_v32 }
0x1419   :  { %v3724_v0 = vpop.permute.xlu1 %3723 }
0x141d   :  { %v7191_v1 = vpop.permute.xlu1 %7190 }
0x141e   :  { %v7193_v2 = vunpack.i.h.bf16 %v7191_v1  ;;  %v7192_v3 = vunpack.i.l.bf16 %v7191_v1 }
0x1420   :  { %v7339_v5 = vpop.eup %7338  ;;  %v6951_v6 = vpack.c.bf16 %v7193_v2, %v7192_v3 }
0x1421   :  { %v3456_v7 = vmul.f32 %v7339_v5, %v7331_v24  ;;  %v3635_v9 = vpop.permute.xlu1 %3634 }
0x1422   :  { %6953 = vmatprep.subr.msk.bf16.mxu1 %vm7844_vm6, %v6951_v6 }
0x1423   :  { %6632 = vmatprep.mubr.msk.f32.mxu0 %vm897_vm7, %v3456_v7  ;;  %6956 = vmatpush3.bf16.xpose.msk.msra.mxu1 %vm7844_vm6, %v6951_v6 }
0x1424   :  { %6633 = vmatmul.mubr.msk.f32.vlgmr.msra.gmra.mrb[54].mxu0 %vm897_vm7, %v3457_v8 }
0x1425   :  { %6962 = vmatpush3.bf16.xpose.msk.msra.mxu0 %vm7844_vm6, %v6957_v61  ;;  %6646 = vmatprep.mubr.msk.f32.mxu0 %vm720_vm5, %v3724_v0 }
0x142a   :  { %6640 = vmatmul.mubr.msk.f32.vlgmr.msra.gmra.mrb[36].mxu1 %vm720_vm5, %v3635_v9 }
0x142c   :  { %6647 = vmatmul.mubr.msk.f32.vlgmr.msra.gmra.mrb[56].mxu0 %vm720_vm5, %v3726_v55 }
0x14be   :  { %v8256_v10 = vpop.f32.mrb[52].mxu0 }
0x14bf   :  { %v8258_v11 = vpop.f32.mrb[53].mxu0 }
0x14f7   :  { %v8260_v12 = vpop.f32.mrb[54].mxu0 }
0x14f8   :  { %v8262_v13 = vpop.f32.mrb[55].mxu0 }
0x14fd   :  { %v6641_v25 = vpop.f32.mrb[36].mxu1 }
0x14fe   :  { %v3714_v23 = vpop.f32.mrb[37].mxu1  ;;  %v3815_v30 = vmul.f32 0.35355338, %v6641_v25 }
0x14ff   :  { %v6648_v14 = vpop.f32.mrb[56].mxu0  ;;  %v3814_v49 = vmul.f32 0.35355338, %v3714_v23 }
0x1500   :  { %v3817_v15 = vmul.f32 0.35355338, %v6648_v14  ;;  %v3805_v16 = vpop.f32.mrb[57].mxu0  ;;  %v3821_v52 = vsel %vm897_vm7, %v3815_v30, -inf }
0x1501   :  { %v3816_v17 = vmul.f32 0.35355338, %v3805_v16  ;;  %v3818_v19 = vsel %vm897_vm7, %v3814_v49, -inf }
0x1502   :  { %v3827_v53 = vsel %vm897_vm7, %v3817_v15, -inf }
0x1503   :  { %3828 = vmax.xlane.f32.xlu1 %v3827_v53  ;;  %v3824_v18 = vsel %vm897_vm7, %v3816_v17, -inf }
0x1504   :  { %3825 = vmax.xlane.f32.xlu0 %v3824_v18 }
0x1514   :  { %7195 = vrot.lane.b32.xlu1 %v8200_v59, %s8599_s5 }
0x1518   :  { %7205 = vrot.lane.b32.xlu1 %v8200_v59, %s8600_s23 }
0x151c   :  { %4230 = vrot.lane.b32.xlu1 %v8182_v47, %s8601_s24 }
0x1520   :  { %4321 = vrot.lane.b32.xlu1 %v8194_v50, %s8601_s24 }
0x1544   :  { %3819 = vmax.xlane.f32.xlu1 %v3818_v19 }
0x1590   :  { %v3829_v41 = vpop.xlane.xlu1 %3828 }
0x1591   :  { %v3833_v20 = vsub.f32 %v3817_v15, %v3829_v41  ;;  %v3826_v21 = vpop.xlane.xlu0 %3825 }
0x1592   :  { %v3832_v22 = vsub.f32 %v3816_v17, %v3826_v21 }
0x1593   :  { %v3840_v51 = vmul.f32 1.442695, %v3833_v20 }
0x1594   :  { %v3838_v24 = vmul.f32 1.442695, %v3832_v22  ;;  %v7196_v26 = vpop.permute.xlu1 %7195 }
0x1595   :  { %7340 = vpow2.f32 %v3840_v51  ;;  %v7198_v27 = vunpack.i.h.bf16 %v7196_v26  ;;  %v7197_v28 = vunpack.i.l.bf16 %v7196_v26 }
0x1596   :  { %7342 = vpow2.f32 %v3838_v24 }
0x1597   :  { %v6967_v29 = vpack.c.bf16 %v7198_v27, %v7197_v28 }
0x1598   :  { %v7206_v38 = vpop.permute.xlu1 %7205 }
0x1599   :  { %6968 = vmatprep.subr.bf16.mxu0 %v6967_v29  ;;  %v7208_v3 = vunpack.i.h.bf16 %v7206_v38  ;;  %v7207_v4 = vunpack.i.l.bf16 %v7206_v38 }
0x159a   :  { %6970 = vmatpush3.bf16.msra.mxu0 %v6967_v29 }
0x159b   :  { %v6977_v7 = vpack.c.bf16 %v7208_v3, %v7207_v4 }
0x159c   :  { %v4231_v42 = vpop.permute.xlu1 %4230 }
0x159f   :  { %v7341_v56 = vpop.eup %7340 }
0x15a0   :  { %v3851_v58 = vsel %vm897_vm7, %v7341_v56, 0.0  ;;  %v7343_v36 = vpop.eup %7342  ;;  %v4322_v44 = vpop.permute.xlu1 %4321 }
0x15a1   :  { %3852 = vadd.xlane.f32.xlu0 %v3851_v58  ;;  %v3848_v37 = vsel %vm897_vm7, %v7343_v36, 0.0 }
0x15a5   :  { %3849 = vadd.xlane.f32.xlu0 %v3848_v37 }
0x15bb   :  { %7200 = vrot.lane.b32.xlu0 %v8188_v31, %s8600_s23 }
0x15bf   :  { %4232 = vrot.lane.b32.xlu0 %v8180_v45, %s8601_s24 }
0x15c3   :  { %4323 = vrot.lane.b32.xlu0 %v8190_v54, %s8601_s24 }
0x15d1   :  { %v3820_v46 = vpop.xlane.xlu1 %3819 }
0x15d2   :  { %v3830_v48 = vsub.f32 %v3814_v49, %v3820_v46 }
0x15d4   :  { %v3834_v43 = vmul.f32 1.442695, %v3830_v48 }
0x15d6   :  { %7344 = vpow2.f32 %v3834_v43  ;;  %v5976_v43 = vld [vmem:[%s8555_s6 + $0x28] sm:$0xff] }
0x15e0   :  { %v7345_v33 = vpop.eup %7344 }
0x15e1   :  { %v3842_v55 = vsel %vm897_vm7, %v7345_v33, 0.0 }
0x15e2   :  { %3822 = vmax.xlane.f32.xlu0 %v3821_v52 }
0x15e6   :  { %3843 = vadd.xlane.f32.xlu0 %v3842_v55 }
0x15fc   :  { %7210 = vrot.lane.b32.xlu0 %v8188_v31, %s8599_s5 }
0x162e   :  { %v3853_v57 = vpop.xlane.xlu0 %3852 }
0x162f   :  { %7346 = vrcp.f32 %v3853_v57 }
0x1632   :  { %v3850_v60 = vpop.xlane.xlu0 %3849 }
0x1633   :  { %7348 = vrcp.f32 %v3850_v60 }
0x1636   :  { %v7201_v61 = vpop.permute.xlu0 %7200 }
0x1637   :  { %v7203_v62 = vunpack.i.h.bf16 %v7201_v61  ;;  %v7202_v32 = vunpack.i.l.bf16 %v7201_v61 }
0x1639   :  { %v6971_v0 = vpack.c.bf16 %v7203_v62, %v7202_v32  ;;  %v7347_v1 = vpop.eup %7346 }
0x163a   :  { %v3861_v6 = vmul.f32 %v7347_v1, %v7341_v56  ;;  %v4233_v8 = vpop.permute.xlu0 %4232 }
0x163b   :  { %6973 = vmatprep.subr.msk.bf16.mxu0 %vm7844_vm6, %v6971_v0 }
0x163d   :  { %v7349_v2 = vpop.eup %7348 }
0x163e   :  { %v3860_v5 = vmul.f32 %v7349_v2, %v7343_v36  ;;  %v4324_v9 = vpop.permute.xlu0 %4323 }
0x1640   :  { %6660 = vmatprep.mubr.msk.f32.mxu0 %vm897_vm7, %v3860_v5 }
0x1641   :  { %6661 = vmatmul.mubr.msk.f32.vlgmr.msra.gmra.mrb[58].mxu0 %vm897_vm7, %v3861_v6 }
0x1642   :  { %6976 = vmatpush3.bf16.xpose.msk.msra.mxu0 %vm7844_vm6, %v6971_v0  ;;  %6683 = vmatprep.mubr.msk.f32.mxu0 %vm720_vm5, %v4231_v42 }
0x1643   :  { %6979 = vmatprep.subr.msk.bf16.mxu0 %vm7844_vm6, %v6977_v7 }
0x1649   :  { %6684 = vmatmul.mubr.msk.f32.vlgmr.msra.gmra.mrb[60].mxu0 %vm720_vm5, %v4233_v8 }
0x164a   :  { %6982 = vmatpush3.bf16.xpose.msk.msra.mxu0 %vm7844_vm6, %v6977_v7  ;;  %6690 = vmatprep.mubr.msk.f32.mxu0 %vm720_vm5, %v4322_v44 }
0x1651   :  { %6691 = vmatmul.mubr.msk.f32.vlgmr.msra.gmra.mrb[62].mxu0 %vm720_vm5, %v4324_v9 }
0x166f   :  { %v3823_v25 = vpop.xlane.xlu0 %3822 }
0x1670   :  { %v3831_v23 = vsub.f32 %v3815_v30, %v3823_v25  ;;  %v5975_v30 = vld [vmem:[%s8555_s6 + $0x20] sm:$0xff] }
0x1672   :  { %v3836_v14 = vmul.f32 1.442695, %v3831_v23 }
0x1673   :  { %v3844_v15 = vpop.xlane.xlu0 %3843 }
0x1674   :  { %7350 = vpow2.f32 %v3836_v14 }
0x1675   :  { %7352 = vrcp.f32 %v3844_v15 }
0x1677   :  { %v7211_v16 = vpop.permute.xlu0 %7210 }
0x1678   :  { %v7213_v17 = vunpack.i.h.bf16 %v7211_v16  ;;  %v7212_v53 = vunpack.i.l.bf16 %v7211_v16 }
0x167a   :  { %v6963_v18 = vpack.c.bf16 %v7213_v17, %v7212_v53 }
0x167c   :  { %6964 = vmatprep.subr.bf16.mxu1 %v6963_v18 }
0x167d   :  { %6966 = vmatpush3.bf16.msra.mxu1 %v6963_v18 }
0x167e   :  { %v7351_v49 = vpop.eup %7350  ;;  %6663 = vmatprep.subr.mxu1 %v5976_v43 }
0x167f   :  { %v7353_v19 = vpop.eup %7352  ;;  %v3845_v41 = vsel %vm897_vm7, %v7351_v49, 0.0 }
0x1680   :  { %3846 = vadd.xlane.f32.xlu1 %v3845_v41  ;;  %v3858_v20 = vmul.f32 %v7353_v19, %v7345_v33 }
0x1682   :  { %6653 = vmatprep.mubr.msk.f32.mxu1 %vm897_vm7, %v3858_v20  ;;  %v5977_v20 = vld [vmem:[%s8555_s6 + $0x30] sm:$0xff] }
0x170d   :  { %v3847_v21 = vpop.xlane.xlu1 %3846 }
0x170e   :  { %7354 = vrcp.f32 %v3847_v21 }
0x1714   :  { %v8303_v22 = vpop.f32.mrb[58].mxu0 }
0x1715   :  { %v8305_v51 = vpop.f32.mrb[59].mxu0 }
0x1718   :  { %v7355_v24 = vpop.eup %7354 }
0x1719   :  { %v3859_v26 = vmul.f32 %v7355_v24, %v7351_v49 }
0x171b   :  { %6654 = vmatmul.mubr.msk.f32.vlgmr.msra.gmra.mrb[38].mxu1 %vm897_vm7, %v3859_v26 }
0x171c   :  { %v6685_v27 = vpop.f32.mrb[60].mxu0  ;;  %6664 = vmatpush3.msra.mxu1 %v5976_v43 }
0x171d   :  { %v4413_v28 = vmul.f32 0.35355338, %v6685_v27  ;;  %v4312_v29 = vpop.f32.mrb[61].mxu0  ;;  %6671 = vmatprep.subr.mxu1 %v5975_v30 }
0x171e   :  { %v4412_v56 = vmul.f32 0.35355338, %v4312_v29 }
0x171f   :  { %v4419_v58 = vsel %vm897_vm7, %v4413_v28, -inf }
0x1720   :  { %4420 = vmax.xlane.f32.xlu1 %v4419_v58  ;;  %v4416_v36 = vsel %vm897_vm7, %v4412_v56, -inf }
0x1724   :  { %4417 = vmax.xlane.f32.xlu1 %v4416_v36  ;;  %v6692_v37 = vpop.f32.mrb[62].mxu0 }
0x1725   :  { %v4403_v38 = vpop.f32.mrb[63].mxu0  ;;  %v4415_v44 = vmul.f32 0.35355338, %v6692_v37 }
0x1726   :  { %v4414_v42 = vmul.f32 0.35355338, %v4403_v38 }
0x1727   :  { %v4425_v48 = vsel %vm897_vm7, %v4415_v44, -inf }
0x1728   :  { %v4422_v46 = vsel %vm897_vm7, %v4414_v42, -inf }
0x1729   :  { %4423 = vmax.xlane.f32.xlu1 %v4422_v46 }
0x172d   :  { %4426 = vmax.xlane.f32.xlu1 %v4425_v48 }
0x17ad   :  { %v4421_v52 = vpop.xlane.xlu1 %4420 }
0x17ae   :  { %v4429_v33 = vsub.f32 %v4413_v28, %v4421_v52 }
0x17b0   :  { %v4434_v55 = vmul.f32 1.442695, %v4429_v33 }
0x17b1   :  { %v4418_v57 = vpop.xlane.xlu1 %4417 }
0x17b2   :  { %7356 = vpow2.f32 %v4434_v55  ;;  %v4428_v60 = vsub.f32 %v4412_v56, %v4418_v57 }
0x17b4   :  { %v4432_v61 = vmul.f32 1.442695, %v4428_v60 }
0x17b6   :  { %7358 = vpow2.f32 %v4432_v61  ;;  %v4424_v62 = vpop.xlane.xlu1 %4423 }
0x17b7   :  { %v4430_v32 = vsub.f32 %v4414_v42, %v4424_v62 }
0x17b9   :  { %v4436_v0 = vmul.f32 1.442695, %v4430_v32 }
0x17ba   :  { %v4427_v1 = vpop.xlane.xlu1 %4426 }
0x17bb   :  { %7360 = vpow2.f32 %v4436_v0  ;;  %v4431_v2 = vsub.f32 %v4415_v44, %v4427_v1 }
0x17bc   :  { %v7357_v3 = vpop.eup %7356 }
0x17bd   :  { %v4438_v4 = vmul.f32 1.442695, %v4431_v2  ;;  %v4443_v5 = vsel %vm897_vm7, %v7357_v3, 0.0 }
0x17be   :  { %4444 = vadd.xlane.f32.xlu1 %v4443_v5 }
0x17bf   :  { %7362 = vpow2.f32 %v4438_v4 }
0x17c0   :  { %v7359_v6 = vpop.eup %7358 }
0x17c1   :  { %v4440_v7 = vsel %vm897_vm7, %v7359_v6, 0.0 }
0x17c2   :  { %4441 = vadd.xlane.f32.xlu1 %v4440_v7 }
0x17c5   :  { %v7361_v8 = vpop.eup %7360 }
0x17c6   :  { %v4446_v9 = vsel %vm897_vm7, %v7361_v8, 0.0 }
0x17c7   :  { %4447 = vadd.xlane.f32.xlu0 %v4446_v9 }
0x17c9   :  { %v7363_v25 = vpop.eup %7362 }
0x17ca   :  { %v4449_v23 = vsel %vm897_vm7, %v7363_v25, 0.0 }
0x17cb   :  { %4450 = vadd.xlane.f32.xlu1 %v4449_v23 }
0x17dc   :  { %7215 = vrot.lane.b32.xlu1 %v8188_v31, %s8602_s1 }
0x17dd   :  { %7230 = vrot.lane.b32.xlu0 %v8200_v59, %s8603_s0 }
0x17e0   :  { %7220 = vrot.lane.b32.xlu1 %v8200_v59, %s8602_s1 }
0x17e4   :  { %7225 = vrot.lane.b32.xlu1 %v8188_v31, %s8603_s0 }
0x17e8   :  { %4735 = vrot.lane.b32.xlu1 %v8182_v47, %s8604_s21 }
0x17ec   :  { %4737 = vrot.lane.b32.xlu1 %v8180_v45, %s8604_s21 }
0x17ee   :  { %v6655_v14 = vpop.f32.mrb[38].mxu1 }
0x17ef   :  { %v3940_v15 = vpop.f32.mrb[39].mxu1 }
0x17f0   :  { %4826 = vrot.lane.b32.xlu1 %v8194_v50, %s8604_s21  ;;  %6665 = vmatprep.mubr.msk.f32.mxu1 %vm720_vm5, %v3940_v15 }
0x17f1   :  { %6666 = vmatmul.mubr.msk.f32.vlgmr.msra.gmra.mrb[40].mxu1 %vm720_vm5, %v6655_v14 }
0x17f2   :  { %6668 = vmatprep.mubr.msk.f32.mxu1 %vm720_vm5, %v8305_v51  ;;  %6672 = vmatpush3.msra.mxu1 %v5975_v30 }
0x17f4   :  { %4828 = vrot.lane.b32.xlu1 %v8190_v54, %s8604_s21 }
0x17f5   :  { %6669 = vmatmul.mubr.msk.f32.gmra.mrb[42].mxu1 %vm720_vm5, %v8303_v22 }
0x17f6   :  { %6673 = vmatprep.mubr.msk.f32.mxu1 %vm720_vm5, %v8258_v11 }
0x17f9   :  { %6674 = vmatmul.mubr.msk.f32.vlgmr.msra.gmra.mrb[40].mxu1 %vm720_vm5, %v8256_v10 }
0x17fa   :  { %6676 = vmatprep.mubr.msk.f32.mxu1 %vm720_vm5, %v8262_v13 }
0x17fd   :  { %6677 = vmatmul.mubr.msk.f32.gmra.mrb[42].mxu1 %vm720_vm5, %v8260_v12 }
0x184b   :  { %v4445_v45 = vpop.xlane.xlu1 %4444 }
0x184f   :  { %v4442_v47 = vpop.xlane.xlu1 %4441 }
0x1850   :  { %7364 = vrcp.f32 %v4442_v47 }
0x1854   :  { %v4448_v50 = vpop.xlane.xlu0 %4447 }
0x1855   :  { %7366 = vrcp.f32 %v4448_v50 }
0x1856   :  { %7368 = vrcp.f32 %v4445_v45 }
0x1858   :  { %v4451_v54 = vpop.xlane.xlu1 %4450  ;;  %v7231_v10 = vpop.permute.xlu0 %7230 }
0x1859   :  { %7370 = vrcp.f32 %v4451_v54  ;;  %v7233_v21 = vunpack.i.h.bf16 %v7231_v10  ;;  %v7232_v22 = vunpack.i.l.bf16 %v7231_v10 }
0x185a   :  { %v7365_v16 = vpop.eup %7364 }
0x185b   :  { %v4456_v17 = vmul.f32 %v7365_v16, %v7359_v6  ;;  %v6997_v56 = vpack.c.bf16 %v7233_v21, %v7232_v22 }
0x185c   :  { %v7216_v11 = vpop.permute.xlu1 %7215 }
0x185d   :  { %v7218_v53 = vunpack.i.h.bf16 %v7216_v11  ;;  %v7217_v18 = vunpack.i.l.bf16 %v7216_v11  ;;  %6697 = vmatprep.mubr.msk.f32.mxu1 %vm897_vm7, %v4456_v17 }
0x185f   :  { %v7367_v13 = vpop.eup %7366  ;;  %v6983_v49 = vpack.c.bf16 %v7218_v53, %v7217_v18 }
0x1860   :  { %v7369_v19 = vpop.eup %7368  ;;  %v7221_v12 = vpop.permute.xlu1 %7220  ;;  %v4458_v41 = vmul.f32 %v7367_v13, %v7361_v8 }
0x1861   :  { %v7223_v51 = vunpack.i.h.bf16 %v7221_v12  ;;  %v7222_v24 = vunpack.i.l.bf16 %v7221_v12  ;;  %6984 = vmatprep.subr.bf16.mxu1 %v6983_v49  ;;  %v4457_v26 = vmul.f32 %v7369_v19, %v7357_v3 }
0x1862   :  { %6986 = vmatpush3.bf16.msra.mxu1 %v6983_v49  ;;  %6704 = vmatprep.mubr.msk.f32.mxu0 %vm897_vm7, %v4458_v41 }
0x1863   :  { %v6987_v27 = vpack.c.bf16 %v7223_v51, %v7222_v24  ;;  %6707 = vmatprep.subr.mxu1 %v5977_v20  ;;  %v7371_v28 = vpop.eup %7370 }
0x1864   :  { %v7226_v29 = vpop.permute.xlu1 %7225  ;;  %v4459_v37 = vmul.f32 %v7371_v28, %v7363_v25 }
0x1865   :  { %v7228_v58 = vunpack.i.h.bf16 %v7226_v29  ;;  %v7227_v36 = vunpack.i.l.bf16 %v7226_v29  ;;  %6698 = vmatmul.mubr.msk.f32.vlgmr.msra.gmra.mrb[44].mxu1 %vm897_vm7, %v4457_v26  ;;  %6988 = vmatprep.subr.bf16.mxu0 %v6987_v27 }
0x1866   :  { %6990 = vmatpush3.bf16.msra.mxu0 %v6987_v27  ;;  %6708 = vmatpush3.msra.mxu1 %v5977_v20 }
0x1867   :  { %v6991_v38 = vpack.c.bf16 %v7228_v58, %v7227_v36  ;;  %6999 = vmatprep.subr.msk.bf16.mxu1 %vm7844_vm6, %v6997_v56 }
0x1868   :  { %v4736_v42 = vpop.permute.xlu1 %4735 }
0x1869   :  { %6705 = vmatmul.mubr.msk.f32.vlgmr.msra.gmra.mrb[64].mxu0 %vm897_vm7, %v4459_v37  ;;  %6993 = vmatprep.subr.msk.bf16.mxu0 %vm7844_vm6, %v6991_v38 }
0x186a   :  { %6719 = vmatprep.mubr.msk.f32.mxu0 %vm720_vm5, %v4736_v42  ;;  %v5978_v42 = vld [vmem:[%s8555_s6 + $0x38] sm:$0xff] }
0x186c   :  { %v4738_v44 = vpop.permute.xlu1 %4737 }
0x186f   :  { %6996 = vmatpush3.bf16.xpose.msk.msra.mxu0 %vm7844_vm6, %v6991_v38 }
0x1870   :  { %v4827_v43 = vpop.permute.xlu1 %4826 }
0x1874   :  { %v4829_v33 = vpop.permute.xlu1 %4828 }
0x1876   :  { %6720 = vmatmul.mubr.msk.f32.vlgmr.msra.gmra.mrb[66].mxu0 %vm720_vm5, %v4738_v44 }
0x1938   :  { %v6699_v46 = vpop.f32.mrb[44].mxu1 }
0x1939   :  { %v4538_v48 = vpop.f32.mrb[45].mxu1 }
0x193a   :  { %6709 = vmatprep.mubr.msk.f32.mxu1 %vm720_vm5, %v4538_v48 }
0x193b   :  { %6710 = vmatmul.mubr.msk.f32.vlgmr.msra.gmra.mrb[40].mxu1 %vm720_vm5, %v6699_v46 }
0x193c   :  { %7002 = vmatpush3.bf16.xpose.msk.msra.mxu1 %vm7844_vm6, %v6997_v56  ;;  %v6706_v30 = vpop.f32.mrb[64].mxu0 }
0x193d   :  { %v4625_v52 = vpop.f32.mrb[65].mxu0 }
0x193e   :  { %6712 = vmatprep.mubr.msk.f32.mxu1 %vm720_vm5, %v4625_v52 }
0x193f   :  { %6713 = vmatmul.mubr.msk.f32.gmra.mrb[42].mxu1 %vm720_vm5, %v6706_v30  ;;  %v6044_v30 = vld [vmem:[%s8556_s7 + $0x1] ss:$0 sm:$0xff] }
0x1940   :  { %6726 = vmatprep.mubr.msk.f32.mxu1 %vm720_vm5, %v4827_v43 }
0x1943   :  { %6727 = vmatmul.mubr.msk.f32.vlgmr.msra.gmra.mrb[46].mxu1 %vm720_vm5, %v4829_v33 }
0x1949   :  { %v6721_v55 = vpop.f32.mrb[66].mxu0 }
0x194a   :  { %v4918_v57 = vmul.f32 0.35355338, %v6721_v55  ;;  %v4817_v60 = vpop.f32.mrb[67].mxu0 }
0x194b   :  { %v4917_v61 = vmul.f32 0.35355338, %v4817_v60 }
0x194c   :  { %v4924_v62 = vsel %vm897_vm7, %v4918_v57, -inf }
0x194d   :  { %4925 = vmax.xlane.f32.xlu0 %v4924_v62  ;;  %v4921_v63 = vsel %vm897_vm7, %v4917_v61, -inf }
0x194e   :  { %4922 = vmax.xlane.f32.xlu1 %v4921_v63 }
0x19da   :  { %v4926_v32 = vpop.xlane.xlu0 %4925 }
0x19db   :  { %v4923_v0 = vpop.xlane.xlu1 %4922  ;;  %v4934_v1 = vsub.f32 %v4918_v57, %v4926_v32 }
0x19dc   :  { %v4933_v2 = vsub.f32 %v4917_v61, %v4923_v0 }
0x19dd   :  { %v4939_v3 = vmul.f32 1.442695, %v4934_v1 }
0x19de   :  { %v4937_v4 = vmul.f32 1.442695, %v4933_v2 }
0x19df   :  { %7372 = vpow2.f32 %v4939_v3 }
0x19e0   :  { %7374 = vpow2.f32 %v4937_v4 }
0x19e9   :  { %v7373_v25 = vpop.eup %7372 }
0x19ea   :  { %v7375_v14 = vpop.eup %7374  ;;  %v4948_v15 = vsel %vm897_vm7, %v7373_v25, 0.0 }
0x19eb   :  { %v4945_v45 = vsel %vm897_vm7, %v7375_v14, 0.0 }
0x1a16   :  { %v6728_v5 = vpop.f32.mrb[46].mxu1 }
0x1a17   :  { %v4920_v6 = vmul.f32 0.35355338, %v6728_v5  ;;  %v4908_v7 = vpop.f32.mrb[47].mxu1 }
0x1a18   :  { %v4919_v8 = vmul.f32 0.35355338, %v4908_v7 }
0x1a19   :  { %v4930_v9 = vsel %vm897_vm7, %v4920_v6, -inf }
0x1a1a   :  { %4931 = vmax.xlane.f32.xlu1 %v4930_v9  ;;  %v4927_v23 = vsel %vm897_vm7, %v4919_v8, -inf }
0x1a1b   :  { %4928 = vmax.xlane.f32.xlu0 %v4927_v23 }
0x1a1e   :  { %4949 = vadd.xlane.f32.xlu1 %v4948_v15 }
0x1a1f   :  { %4946 = vadd.xlane.f32.xlu0 %v4945_v45 }
0x1aa7   :  { %v4932_v47 = vpop.xlane.xlu1 %4931 }
0x1aa8   :  { %v4936_v50 = vsub.f32 %v4920_v6, %v4932_v47  ;;  %v4929_v54 = vpop.xlane.xlu0 %4928 }
0x1aa9   :  { %v4935_v16 = vsub.f32 %v4919_v8, %v4929_v54 }
0x1aaa   :  { %v4943_v17 = vmul.f32 1.442695, %v4936_v50 }
0x1aab   :  { %v4941_v11 = vmul.f32 1.442695, %v4935_v16  ;;  %v4950_v41 = vpop.xlane.xlu1 %4949 }
0x1aac   :  { %7376 = vpow2.f32 %v4943_v17  ;;  %v4947_v53 = vpop.xlane.xlu0 %4946 }
0x1aad   :  { %7378 = vpow2.f32 %v4941_v11 }
0x1aae   :  { %7380 = vrcp.f32 %v4947_v53 }
0x1aaf   :  { %7382 = vrcp.f32 %v4950_v41 }
0x1ab6   :  { %v7377_v18 = vpop.eup %7376 }
0x1ab7   :  { %v7379_v10 = vpop.eup %7378  ;;  %v4954_v13 = vsel %vm897_vm7, %v7377_v18, 0.0 }
0x1ab8   :  { %4955 = vadd.xlane.f32.xlu1 %v4954_v13  ;;  %v4951_v49 = vsel %vm897_vm7, %v7379_v10, 0.0  ;;  %v7381_v19 = vpop.eup %7380  ;;  %v6050_v13 = vld [vmem:[%s8557_s8 + $0x28] sm:$0xff] }
0x1ab9   :  { %4952 = vadd.xlane.f32.xlu0 %v4951_v49  ;;  %v4961_v12 = vmul.f32 %v7381_v19, %v7375_v14  ;;  %v7383_v58 = vpop.eup %7382  ;;  %v6051_v19 = vld [vmem:[%s8557_s8 + $0x30] sm:$0xff] }
0x1aba   :  { %v4962_v36 = vmul.f32 %v7383_v58, %v7373_v25 }
0x1abb   :  { %6733 = vmatprep.mubr.msk.f32.mxu0 %vm897_vm7, %v4961_v12  ;;  %v6052_v12 = vld [vmem:[%s8557_s8 + $0x38] sm:$0xff] }
0x1abc   :  { %v7015_v41 = vpack.c.bf16 %v6052_v12, %v6051_v19 }
0x1ac9   :  { %7240 = vrot.lane.b32.xlu1 %v8200_v59, %s8605_s26 }
0x1acf   :  { %7235 = vrot.lane.b32.xlu0 %v8188_v31, %s8605_s26 }
0x1b45   :  { %v4956_v20 = vpop.xlane.xlu1 %4955 }
0x1b46   :  { %7384 = vrcp.f32 %v4956_v20  ;;  %v4953_v21 = vpop.xlane.xlu0 %4952  ;;  %v6059_v20 = vld [vmem:[%s8559_s10 + $0x40] sm:$0xff] }
0x1b47   :  { %7386 = vrcp.f32 %v4953_v21  ;;  %v6060_v21 = vld [vmem:[%s8559_s10 + $0x48] sm:$0xff] }
0x1b49   :  { %v7241_v22 = vpop.permute.xlu1 %7240 }
0x1b4a   :  { %v7243_v51 = vunpack.i.h.bf16 %v7241_v22  ;;  %v7242_v24 = vunpack.i.l.bf16 %v7241_v22  ;;  %v7236_v26 = vpop.permute.xlu0 %7235  ;;  %v6061_v22 = vld [vmem:[%s8559_s10 + $0x50] sm:$0xff] }
0x1b4b   :  { %v7238_v27 = vunpack.i.h.bf16 %v7236_v26  ;;  %v7237_v28 = vunpack.i.l.bf16 %v7236_v26 }
0x1b4c   :  { %v7007_v29 = vpack.c.bf16 %v7243_v51, %v7242_v24  ;;  %v7019_v51 = vpack.c.bf16 %v6060_v21, %v6059_v20  ;;  %v6062_v24 = vld [vmem:[%s8559_s10 + $0x58] sm:$0xff] }
0x1b4d   :  { %v7003_v56 = vpack.c.bf16 %v7238_v27, %v7237_v28  ;;  %v7023_v26 = vpack.c.bf16 %v6062_v24, %v6061_v22  ;;  %v6063_v27 = vld [vmem:[%s8559_s10 + $0x60] sm:$0xff]  ;;  %v6064_v28 = vld [vmem:[%s8559_s10 + $0x68] sm:$0xff] }
0x1b4e   :  { %7008 = vmatprep.subr.bf16.mxu1 %v7007_v29 }
0x1b4f   :  { %7004 = vmatprep.subr.bf16.mxu0 %v7003_v56  ;;  %7010 = vmatpush3.bf16.msra.mxu1 %v7007_v29  ;;  %v7027_v29 = vpack.c.bf16 %v6064_v28, %v6063_v27 }
0x1b50   :  { %v7385_v59 = vpop.eup %7384  ;;  %7006 = vmatpush3.bf16.msra.mxu0 %v7003_v56  ;;  %6743 = vmatprep.subr.mxu1 %v5978_v42 }
0x1b51   :  { %v7387_v31 = vpop.eup %7386  ;;  %v4964_v38 = vmul.f32 %v7385_v59, %v7377_v18 }
0x1b52   :  { %v4963_v37 = vmul.f32 %v7387_v31, %v7379_v10  ;;  %v6049_v10 = vld [vmem:[%s8557_s8 + $0x20] sm:$0xff] }
0x1b53   :  { %6734 = vmatmul.mubr.msk.f32.vlgmr.msra.gmra.mrb[68].mxu0 %vm897_vm7, %v4962_v36  ;;  %v7011_v49 = vpack.c.bf16 %v6050_v13, %v6049_v10 }
0x1b54   :  { %6740 = vmatprep.mubr.msk.f32.mxu1 %vm897_vm7, %v4963_v37 }
0x1b55   :  { %6741 = vmatmul.mubr.msk.f32.vlgmr.msra.gmra.mrb[48].mxu1 %vm897_vm7, %v4964_v38  ;;  %7012 = vmatprep.subr.bf16.mxu0 %v7011_v49 }
0x1b56   :  { %6744 = vmatpush3.msra.mxu1 %v5978_v42  ;;  %7014 = vmatpush3.bf16.msra.mxu0 %v7011_v49 }
0x1b57   :  { %7016 = vmatprep.subr.bf16.mxu0 %v7015_v41  ;;  %7020 = vmatprep.subr.bf16.mxu1 %v7019_v51 }
0x1b5a   :  { %7018 = vmatpush3.bf16.msra.mxu0 %v7015_v41 }
0x1c26   :  { %v6735_v44 = vpop.f32.mrb[68].mxu0 }
0x1c27   :  { %v5043_v46 = vpop.f32.mrb[69].mxu0 }
0x1c28   :  { %v6742_v48 = vpop.f32.mrb[48].mxu1  ;;  %6745 = vmatprep.mubr.msk.f32.mxu1 %vm720_vm5, %v5043_v46 }
0x1c29   :  { %v5130_v43 = vpop.f32.mrb[49].mxu1  ;;  %6746 = vmatmul.mubr.msk.f32.vlgmr.msra.gmra.mrb[40].mxu1 %vm720_vm5, %v6735_v44 }
0x1c2a   :  { %6748 = vmatprep.mubr.msk.f32.mxu1 %vm720_vm5, %v5130_v43  ;;  %7022 = vmatpush3.bf16.msra.mxu1 %v7019_v51 }
0x1c2b   :  { %7024 = vmatprep.subr.bf16.mxu1 %v7023_v26 }
0x1c2d   :  { %6749 = vmatmul.mubr.msk.f32.gmra.mrb[42].mxu1 %vm720_vm5, %v6742_v48 }
0x1c2e   :  { %7026 = vmatpush3.bf16.msra.mxu1 %v7023_v26 }
0x1c2f   :  { %7028 = vmatprep.subr.bf16.mxu1 %v7027_v29 }
0x1c32   :  { %7030 = vmatpush3.bf16.msra.mxu1 %v7027_v29 }
0x1cfc   :  { %v6747_v52 = vpop.f32.mrb[40].mxu1 }
0x1cfd   :  { %v5249_v33 = vadd.f32 %v6747_v52, %v6044_v30  ;;  %v5217_v55 = vpop.f32.mrb[41].mxu1  ;;  %v6047_v52 = vld [vmem:[%s8561_s12 + $0x1] ss:$0 sm:$0xff] }
0x1cfe   :  { %v5248_v57 = vadd.f32 %v6044_v30, %v5217_v55 }
0x1cff   :  { %v5253_v60 = vadd.f32 %v5249_v33, %v8163_v35 }
0x1d00   :  { %v5252_v61 = vadd.f32 %v5248_v57, %v8161_v34  ;;  %v6750_v62 = vpop.f32.mrb[42].mxu1 }
0x1d01   :  { %v5251_v63 = vadd.f32 %v6750_v62, %v6044_v30  ;;  %v5227_v32 = vpop.f32.mrb[43].mxu1  ;;  %v5263_v0 = vsel %vm536_vm4, %v5253_v60, 0.0 }
0x1d02   :  { %v5250_v1 = vadd.f32 %v6044_v30, %v5227_v32  ;;  %5264 = vadd.xlane.f32.xlu0 %v5263_v0  ;;  %v5260_v2 = vsel %vm536_vm4, %v5252_v61, 0.0 }
0x1d03   :  { %v5255_v3 = vadd.f32 %v5251_v63, %v8171_v39  ;;  %5261 = vadd.xlane.f32.xlu1 %v5260_v2 }
0x1d04   :  { %v5254_v4 = vadd.f32 %v5250_v1, %v8169_v40 }
0x1d05   :  { %v5269_v5 = vsel %vm536_vm4, %v5255_v3, 0.0 }
0x1d06   :  { %v5266_v35 = vsel %vm536_vm4, %v5254_v4, 0.0 }
0x1d07   :  { %5270 = vadd.xlane.f32.xlu1 %v5269_v5  ;;  %5267 = vadd.xlane.f32.xlu0 %v5266_v35 }
0x1d8f   :  { %v5265_v34 = vpop.xlane.xlu0 %5264 }
0x1d90   :  { %v5273_v6 = vmul.f32 0.03125, %v5265_v34  ;;  %v5262_v7 = vpop.xlane.xlu1 %5261 }
0x1d91   :  { %v5272_v8 = vmul.f32 0.03125, %v5262_v7  ;;  %v6066_v7 = vld [vmem:[%s8559_s10 + $0x78] sm:$0xff] }
0x1d92   :  { %v8409_v9 = vsub.f32 %v5253_v60, %v5273_v6  ;;  %v6048_v60 = vld [vmem:[%s8562_s13 + $0x1] ss:$0 sm:$0xff]  ;;  %v6065_v6 = vld [vmem:[%s8559_s10 + $0x70] sm:$0xff]  ;;  %s7443_s13 = smov [#allocation2]  }
0x1d93   :  { %v8411_v25 = vsub.f32 %v5252_v61, %v5272_v8  ;;  %v7031_v8 = vpack.c.bf16 %v6066_v7, %v6065_v6  ;;  %s5838_s25 = sshll.u32 %s7443_s13, 4  ;;  %s5839_s25 = int_to_ptr.vmem [resolvable:$true] %s5838_s25 }
0x1d94   :  { %v5271_v23 = vpop.xlane.xlu1 %5270  ;;  %v5268_v14 = vpop.xlane.xlu0 %5267  ;;  %v5281_v39 = vmul.f32 %v8409_v9, %v8409_v9  ;;  %p7409_p1 = scmp.lt.s32.totalorder %s5839_s25, %s5839_s25 }
0x1d95   :  { %v5275_v40 = vmul.f32 0.03125, %v5271_v23  ;;  %v5274_v15 = vmul.f32 0.03125, %v5268_v14  ;;  %v5280_v45 = vmul.f32 %v8411_v25, %v8411_v25  ;;  %7032 = vmatprep.subr.bf16.mxu1 %v7031_v8 }
0x1d96   :  { %v5287_v47 = vsel %vm536_vm4, %v5281_v39, 0.0  ;;  %7034 = vmatpush3.bf16.msra.mxu1 %v7031_v8 }
0x1d97   :  { %v8418_v50 = vsub.f32 %v5255_v3, %v5275_v40  ;;  %v8420_v54 = vsub.f32 %v5254_v4, %v5274_v15  ;;  %5288 = vadd.xlane.f32.xlu1 %v5287_v47  ;;  %v5284_v16 = vsel %vm536_vm4, %v5280_v45, 0.0 }
0x1d98   :  { %5285 = vadd.xlane.f32.xlu0 %v5284_v16 }
0x1d99   :  { %v5283_v17 = vmul.f32 %v8418_v50, %v8418_v50  ;;  %v5282_v11 = vmul.f32 %v8420_v54, %v8420_v54 }
0x1d9b   :  { %v5293_v53 = vsel %vm536_vm4, %v5283_v17, 0.0  ;;  %v5290_v18 = vsel %vm536_vm4, %v5282_v11, 0.0  ;;  %v6068_v11 = vld [vmem:[%s8560_s11 + $0x1] ss:$0 sm:$0xff] }
0x1d9c   :  { %5294 = vadd.xlane.f32.xlu1 %v5293_v53  ;;  %5291 = vadd.xlane.f32.xlu0 %v5290_v18 }
0x1e24   :  { %v5289_v56 = vpop.xlane.xlu1 %5288 }
0x1e25   :  { %v5297_v58 = vmul.f32 0.03125, %v5289_v56  ;;  %v5286_v59 = vpop.xlane.xlu0 %5285 }
0x1e26   :  { %v5296_v31 = vmul.f32 0.03125, %v5286_v59 }
0x1e27   :  { %v5301_v36 = vadd.f32 1e-05, %v5297_v58 }
0x1e28   :  { %v5300_v37 = vadd.f32 1e-05, %v5296_v31 }
0x1e29   :  { %7388 = vrsqrt.f32 %v5301_v36  ;;  %v5295_v38 = vpop.xlane.xlu1 %5294  ;;  %v5292_v42 = vpop.xlane.xlu0 %5291 }
0x1e2a   :  { %7390 = vrsqrt.f32 %v5300_v37  ;;  %v5299_v44 = vmul.f32 0.03125, %v5295_v38  ;;  %v5298_v46 = vmul.f32 0.03125, %v5292_v42 }
0x1e2c   :  { %v5303_v48 = vadd.f32 1e-05, %v5299_v44  ;;  %v5302_v43 = vadd.f32 1e-05, %v5298_v46 }
0x1e2e   :  { %7392 = vrsqrt.f32 %v5303_v48 }
0x1e2f   :  { %7394 = vrsqrt.f32 %v5302_v43 }
0x1e33   :  { %v7389_v30 = vpop.eup %7388 }
0x1e34   :  { %v7391_v33 = vpop.eup %7390  ;;  %v5309_v55 = vmul.f32 %v7389_v30, %v8409_v9  ;;  %v6054_v9 = vld [vmem:[%s8558_s9 + $0x1] ss:$0 sm:$0xff] }
0x1e35   :  { %v5308_v57 = vmul.f32 %v7391_v33, %v8411_v25 }
0x1e36   :  { %v5319_v61 = vmul.f32 %v6047_v52, %v5309_v55 }
0x1e37   :  { %v5318_v62 = vmul.f32 %v6047_v52, %v5308_v57 }
0x1e38   :  { %v7393_v63 = vpop.eup %7392  ;;  %v5329_v2 = vadd.f32 %v6048_v60, %v5319_v61 }
0x1e39   :  { %v7395_v32 = vpop.eup %7394  ;;  %v5328_v0 = vadd.f32 %v6048_v60, %v5318_v62  ;;  %v5311_v1 = vmul.f32 %v7393_v63, %v8418_v50  ;;  %v5661_v62 = vld [vmem:[%s8565_s16] sm:$0xff]  ;;  %v5662_v63 = vld [vmem:[%s8565_s16 + $0x8] sm:$0xff] }
0x1e3a   :  { %v5310_v3 = vmul.f32 %v7395_v32, %v8420_v54  ;;  %v5663_v32 = vld [vmem:[%s8565_s16 + $0x10] sm:$0xff] }
0x1e3b   :  { %6759 = vmatprep.mubr.msk.f32.mxu0 %vm536_vm4, %v5328_v0  ;;  %v5321_v4 = vmul.f32 %v6047_v52, %v5311_v1  ;;  %v7036_v1 = vpack.c.bf16 %v5662_v63, %v5661_v62 }
0x1e3c   :  { %6760 = vmatmul.mubr.msk.f32.vlgmr.msra.gmra.mrb[70].mxu0 %vm536_vm4, %v5329_v2  ;;  %v5320_v5 = vmul.f32 %v6047_v52, %v5310_v3  ;;  %v7442_v3 = vmov 0.0  }
0x1e3d   :  { %v5331_v35 = vadd.f32 %v6048_v60, %v5321_v4 }
0x1e3e   :  { %v5330_v34 = vadd.f32 %v6048_v60, %v5320_v5 }
0x1e40   :  { %6762 = vmatprep.mubr.msk.f32.mxu0 %vm536_vm4, %v5330_v34 }
0x1e41   :  { %6763 = vmatmul.mubr.msk.f32.gmra.mrb[72].mxu0 %vm536_vm4, %v5331_v35 }
0x1e42   :  { %6795 = vmatprep.mubr.msk.f32.mxu0 %vm7441_vm9, %v7442_v3 }
0x1f0f   :  { %v6761_v25 = vpop.f32.mrb[70].mxu0 }
0x1f10   :  { %v5429_v23 = vadd.f32 %v6761_v25, %v6054_v9  ;;  %v5423_v14 = vpop.f32.mrb[71].mxu0 }
0x1f11   :  { %v5424_v39 = vadd.f32 %v6054_v9, %v5423_v14 }
0x1f12   :  { %v5443_v15 = vmax.f32 %v5429_v23, 0.0 }
0x1f13   :  { %v5442_v40 = vmax.f32 %v5424_v39, 0.0 }
0x1f14   :  { %v6764_v45 = vpop.f32.mrb[72].mxu0 }
0x1f15   :  { %v5439_v47 = vadd.f32 %v6764_v45, %v6054_v9  ;;  %v5433_v50 = vpop.f32.mrb[73].mxu0  ;;  %6781 = vmatprep.mubr.msk.f32.mxu1 %vm2941_vm8, %v5442_v40  ;;  %v6075_v45 = vld [vmem:[%s8563_s14 + $0x1] ss:$0 sm:$0xff] }
0x1f16   :  { %v5434_v54 = vadd.f32 %v6054_v9, %v5433_v50  ;;  %6782 = vmatmul.mubr.msk.f32.vlgmr.msra.gmra.mrb[50].mxu1 %vm2941_vm8, %v5443_v15 }
0x1f17   :  { %v5445_v17 = vmax.f32 %v5439_v47, 0.0 }
0x1f18   :  { %v5444_v16 = vmax.f32 %v5434_v54, 0.0  ;;  %v6076_v54 = vld [vmem:[%s8564_s15 + $0x1] ss:$0 sm:$0xff] }
0x1f1a   :  { %6784 = vmatprep.mubr.msk.f32.mxu1 %vm2941_vm8, %v5444_v16 }
0x1f1b   :  { %6785 = vmatmul.mubr.msk.f32.gmra.mrb[52].mxu1 %vm2941_vm8, %v5445_v17 }
0x1fe9   :  { %v6783_v53 = vpop.f32.mrb[50].mxu1 }
0x1fea   :  { %v5547_v18 = vadd.f32 %v6783_v53, %v6068_v11  ;;  %v5541_v10 = vpop.f32.mrb[51].mxu1 }
0x1feb   :  { %v5542_v13 = vadd.f32 %v6068_v11, %v5541_v10 }
0x1fec   :  { %v5561_v49 = vadd.f32 %v5547_v18, %v5329_v2  ;;  %v5664_v2 = vld [vmem:[%s8565_s16 + $0x18] sm:$0xff] }
0x1fed   :  { %v5560_v19 = vadd.f32 %v5542_v13, %v5328_v0  ;;  %v7440_v0 = vmov 0.0|0.0   ;;  %v7039_v4 = vpack.c.bf16 %v5664_v2, %v5663_v32  ;;  %v6079_v32 = vld [vmem:[%s8568_s19] ss:$0 sm:$0xff] }
0x1fee   :  { %v6786_v12 = vpop.f32.mrb[52].mxu1  ;;  %v5571_v41 = vsel %vm536_vm4, %v5561_v49, 0.0  ;;  %7035 = vmatprep.subr.bf16.mxu0 %v7440_v0 }
0x1fef   :  { %v5557_v20 = vadd.f32 %v6786_v12, %v6068_v11  ;;  %v5551_v21 = vpop.f32.mrb[53].mxu1  ;;  %5572 = vadd.xlane.f32.xlu1 %v5571_v41  ;;  %v5568_v22 = vsel %vm536_vm4, %v5560_v19, 0.0  ;;  %7037 = vmatpush3.bf16.msra.mxu0 %v7036_v1 }
0x1ff0   :  { %v5552_v51 = vadd.f32 %v6068_v11, %v5551_v21  ;;  %5569 = vadd.xlane.f32.xlu0 %v5568_v22  ;;  %7038 = vmatprep.subr.bf16.mxu0 %v7440_v0 }
0x1ff1   :  { %v5563_v24 = vadd.f32 %v5557_v20, %v5331_v35 }
0x1ff2   :  { %v5562_v26 = vadd.f32 %v5552_v51, %v5330_v34 }
0x1ff3   :  { %v5577_v27 = vsel %vm536_vm4, %v5563_v24, 0.0  ;;  %7040 = vmatpush3.bf16.msra.mxu0 %v7039_v4 }
0x1ff4   :  { %5578 = vadd.xlane.f32.xlu1 %v5577_v27  ;;  %v5574_v28 = vsel %vm536_vm4, %v5562_v26, 0.0  ;;  %7041 = vmatprep.subr.bf16.mxu0 %v7440_v0 }
0x1ff5   :  { %5575 = vadd.xlane.f32.xlu0 %v5574_v28 }
0x207c   :  { %v5573_v29 = vpop.xlane.xlu1 %5572 }
0x207d   :  { %v5581_v56 = vmul.f32 0.03125, %v5573_v29  ;;  %v5570_v58 = vpop.xlane.xlu0 %5569 }
0x207e   :  { %v5580_v59 = vmul.f32 0.03125, %v5570_v58 }
0x207f   :  { %v5585_v31 = vsub.f32 %v5561_v49, %v5581_v56 }
0x2080   :  { %v5584_v36 = vsub.f32 %v5560_v19, %v5580_v59 }
0x2081   :  { %v5579_v37 = vpop.xlane.xlu1 %5578  ;;  %v5589_v38 = vmul.f32 %v5585_v31, %v5585_v31 }
0x2082   :  { %v5583_v42 = vmul.f32 0.03125, %v5579_v37  ;;  %v5576_v44 = vpop.xlane.xlu0 %5575  ;;  %v5588_v46 = vmul.f32 %v5584_v36, %v5584_v36 }
0x2083   :  { %v5582_v48 = vmul.f32 0.03125, %v5576_v44  ;;  %v5595_v43 = vsel %vm536_vm4, %v5589_v38, 0.0 }
0x2084   :  { %v5587_v30 = vsub.f32 %v5563_v24, %v5583_v42  ;;  %5596 = vadd.xlane.f32.xlu1 %v5595_v43  ;;  %v5592_v52 = vsel %vm536_vm4, %v5588_v46, 0.0 }
0x2085   :  { %v5586_v33 = vsub.f32 %v5562_v26, %v5582_v48  ;;  %5593 = vadd.xlane.f32.xlu0 %v5592_v52 }
0x2086   :  { %v5591_v55 = vmul.f32 %v5587_v30, %v5587_v30 }
0x2087   :  { %v5590_v57 = vmul.f32 %v5586_v33, %v5586_v33 }
0x2088   :  { %v5601_v60 = vsel %vm536_vm4, %v5591_v55, 0.0  ;;  %v5749_v55 = vld [vmem:[%s8567_s18 + $0x8] sm:$0xff] }
0x2089   :  { %5602 = vadd.xlane.f32.xlu1 %v5601_v60  ;;  %v5598_v61 = vsel %vm536_vm4, %v5590_v57, 0.0  ;;  %v6077_v60 = vld [vmem:[%s8566_s17] ss:$0 sm:$0xff] }
0x208a   :  { %5599 = vadd.xlane.f32.xlu0 %v5598_v61 }
0x2111   :  { %v5597_v5 = vpop.xlane.xlu1 %5596 }
0x2112   :  { %v5605_v35 = vmul.f32 0.03125, %v5597_v5  ;;  %v5594_v34 = vpop.xlane.xlu0 %5593 }
0x2113   :  { %v5604_v6 = vmul.f32 0.03125, %v5594_v34 }
0x2114   :  { %v5609_v7 = vadd.f32 1e-05, %v5605_v35 }
0x2115   :  { %v5608_v8 = vadd.f32 1e-05, %v5604_v6 }
0x2116   :  { %7396 = vrsqrt.f32 %v5609_v7  ;;  %v5603_v9 = vpop.xlane.xlu1 %5602 }
0x2117   :  { %7398 = vrsqrt.f32 %v5608_v8  ;;  %v5607_v25 = vmul.f32 0.03125, %v5603_v9  ;;  %v5600_v23 = vpop.xlane.xlu0 %5599 }
0x2118   :  { %v5606_v14 = vmul.f32 0.03125, %v5600_v23 }
0x2119   :  { %v5611_v39 = vadd.f32 1e-05, %v5607_v25 }
0x211a   :  { %v5610_v40 = vadd.f32 1e-05, %v5606_v14 }
0x211b   :  { %7400 = vrsqrt.f32 %v5611_v39 }
0x211c   :  { %7402 = vrsqrt.f32 %v5610_v40 }
0x2120   :  { %v7397_v15 = vpop.eup %7396 }
0x2121   :  { %v7399_v47 = vpop.eup %7398  ;;  %v5617_v50 = vmul.f32 %v7397_v15, %v5585_v31 }
0x2122   :  { %v5616_v16 = vmul.f32 %v7399_v47, %v5584_v36 }
0x2123   :  { %v5627_v17 = vmul.f32 %v6075_v45, %v5617_v50 }
0x2124   :  { %v5626_v11 = vmul.f32 %v6075_v45, %v5616_v16 }
0x2125   :  { %v7401_v53 = vpop.eup %7400  ;;  %v5637_v18 = vadd.f32 %v6076_v54, %v5627_v17 }
0x2126   :  { %v7403_v10 = vpop.eup %7402  ;;  %v5636_v13 = vadd.f32 %v6076_v54, %v5626_v11  ;;  %v5619_v49 = vmul.f32 %v7401_v53, %v5587_v30 }
0x2127   :  { %v5641_v19 = vsel %vm536_vm4, %v5637_v18, 0.0  ;;  %v5618_v12 = vmul.f32 %v7403_v10, %v5586_v33  ;;  %v5748_v33 = vld [vmem:[%s8567_s18] sm:$0xff]  ;;  %s7404_s18 = scalar_lea.vmem %s5839_s25, 32 }
0x2128   :  { %v5640_v41 = vsel %vm536_vm4, %v5636_v13, 0.0  ;;  %v5629_v20 = vmul.f32 %v6075_v45, %v5619_v49  ;;  %v7042_v57 = vpack.c.bf16 %v5749_v55, %v5748_v33  ;;  %p7405_p0 = scmp.ne.s32.totalorder %s5839_s25, %s7404_s18  ;;  %p7410_p2 = scmp.lt.s32.totalorder %s7404_s18, %s7404_s18 }
0x2129   :  { %v5628_v21 = vmul.f32 %v6075_v45, %v5618_v12  ;;  %v5642_v22 = vadd.f32 %v5641_v19, %v5640_v41 }
0x212a   :  { %v5639_v51 = vadd.f32 %v6076_v54, %v5629_v20  ;;  %p7411_p3 = por %p7410_p2, %p7409_p1 }
0x212b   :  { %v5638_v24 = vadd.f32 %v6076_v54, %v5628_v21  ;;  %v5643_v26 = vrot.slane %v5642_v22, 4 }
0x212c   :  { %v5650_v27 = vsel %vm536_vm4, %v5639_v51, 0.0  ;;  %p7412_p4 = pnand %p7411_p3, %p7405_p0 }
0x212d   :  { %v5649_v28 = vsel %vm536_vm4, %v5638_v24, 0.0  ;;  %v5644_v29 = vadd.f32 %v5643_v26, %v5642_v22 }
0x212e   :  { %v5651_v56 = vadd.f32 %v5650_v27, %v5649_v28 }
0x212f   :  { %v5645_v58 = vrot.slane %v5644_v29, 2 }
0x2130   :  { %v5652_v59 = vrot.slane %v5651_v56, 4 }
0x2131   :  { %v5646_v31 = vadd.f32 %v5645_v58, %v5644_v29 }
0x2132   :  { %v5653_v36 = vadd.f32 %v5652_v59, %v5651_v56 }
0x2133   :  { %v5647_v37 = vrot.slane %v5646_v31, 1 }
0x2134   :  { %v5654_v38 = vrot.slane %v5653_v36, 2 }
0x2135   :  { %v5648_v44 = vadd.f32 %v5647_v37, %v5646_v31 }
0x2136   :  { %v5655_v42 = vadd.f32 %v5654_v38, %v5653_v36 }
0x2137   :  { %v5659_v43 = vmul.f32 0.0625, %v5648_v44 }
0x2138   :  { %v5656_v46 = vrot.slane %v5655_v42, 1 }
0x213a   :  { %v5657_v48 = vadd.f32 %v5656_v46, %v5655_v42 }
0x213c   :  { %v5660_v30 = vmul.f32 0.0625, %v5657_v48 }
0x213e   :  { %v5675_v52 = vsel %vm5674_vm10, %v5660_v30, %v5659_v43 }
0x213f   :  { %6796 = vmatmul.mubr.msk.f32.vlgmr.msra.gmra.mrb[74].mxu0 %vm536_vm4, %v5675_v52 }
0x2140   :  { %6802 = vmatprep.mubr.msk.f32.mxu0 %vm7441_vm9, %v7442_v3  ;;  %7043 = vmatpush3.bf16.msra.mxu0 %v7042_v57 }
0x2212   :  { %v5744_v61 = vpop.f32.mrb[74].mxu0 }
0x2213   :  { %v5745_v62 = vadd.f32 %v6077_v60, %v5744_v61  ;;  %v6797_v63 = vpop.f32.mrb[75].mxu0 }
0x2215   :  { %6803 = vmatmul.mubr.msk.f32.vlgmr.msra.gmra.mrb[76].mxu0 %vm897_vm7, %v5745_v62 }
0x22e8   :  { %v5826_v0 = vpop.f32.mrb[76].mxu0 }
0x22e9   :  { %v5827_v1 = vadd.f32 %v6079_v32, %v5826_v0  ;;  %v6804_v2 = vpop.f32.mrb[77].mxu0 }
0x22eb   :  { %5831 = vst.msk [vmem:[#allocation2] sm:$0x3] %vm5830_vm11, %v5827_v1 }
0x22ec   :  { %7415 = shalt.err (!%p7412_p4)
}
0x22ed   :  { %s7416_s28 = scalar_lea.hbm %s8569_s20, 32 }
0x22ee   :  { %p7417_p5 = scmp.ne.s32.totalorder %s8569_s20, %s7416_s28  ;;  %p7420_p6 = scmp.lt.u32.totalorder %s7416_s28, %s8569_s20 }
0x22f0   :  { %p7422_p7 = pnand %p7420_p6, %p7417_p5 }
0x22f2   :  { %7425 = shalt.err (!%p7422_p7)
}
0x22f3   :  { %5841 = dma.vmem_to_hbm [thread:$0]  %s5839_s25, 32, %s8569_s20, [#allocation3]  }
0x22f4   :  { %7426 = dma.done.wait [#allocation3], 32  }
0x22f5   :  { %7427 = vsyncadd [#allocation3], 4294967264 }
0x22f6   :  { %5845 = vsyncpa [#allocation3], 1 }

</bundles_post_ra>
